<compile_context>
chip_gen: v7x
topology: tpu7x:2x2x1
jax: 0.10.0
libtpu: 0.0.40
codegen_flags: <defaults>
</compile_context>

<pallas_src>
import functools

import jax
import jax.numpy as jnp
from jax.experimental import pallas as pl
from jax.experimental.pallas import tpu as pltpu


_VMEM_LIMIT_BYTES = 40 * 1024 * 1024  # > v5e 16 MiB default, < v7x 64 MiB phys.


def _round_up(x, m):
    return ((x + m - 1) // m) * m


def _choose_m_tiling(M, tm):
    """Pick (tm_eff, Mp): prefer no padding (tile == M or a mult-of-8 divisor)."""
    tm = max(8, tm - (tm % 8))
    if M <= tm:
        return M, M                      # single tile, block == full dim (legal)
    lo = max(tm // 2, 8)
    for t in range(tm, lo - 1, -8):      # multiple-of-8 divisor of M, close to tm
        if M % t == 0:
            return t, M
    return tm, _round_up(M, tm)          # fallback: pad (done in bf16)


# ----------------------------------------------------------------------------
# Fused matmul + bias [+ folded BN] + activation (single K block)
# ----------------------------------------------------------------------------
def _apply_activation(z, activation):
    if activation == "leaky":
        return jnp.where(z >= 0.0, z, 0.2 * z)
    if activation == "sigmoid":
        return jax.nn.sigmoid(z)
    return z


def _matmul_act_kernel(*refs, activation, has_bn):
    if has_bn:
        a_ref, w_ref, b_ref, scale_ref, shift_ref, o_ref = refs
    else:
        a_ref, w_ref, b_ref, o_ref = refs
        scale_ref = shift_ref = None
    z = jnp.dot(a_ref[...], w_ref[...], preferred_element_type=jnp.float32)
    z = z + b_ref[...]
    if has_bn:
        z = z * scale_ref[...] + shift_ref[...]
    z = _apply_activation(z, activation)
    o_ref[...] = z.astype(o_ref.dtype)


def fused_matmul(a, w, b, scale=None, shift=None, *, activation,
                 out_dtype=jnp.float32, tm=1024):
    """out = act([scale *](a @ w + b)[+ shift]); bf16 operands, f32 accumulate."""
    M, K = a.shape
    K2, N = w.shape
    assert K == K2
    has_bn = scale is not None

    a = a.astype(jnp.bfloat16)           # cast BEFORE any pad (half the bytes)
    w = w.astype(jnp.bfloat16)
    b = b.reshape(1, N).astype(jnp.float32)

    tm_eff, Mp = _choose_m_tiling(M, tm)
    if Mp != M:
        a = jnp.pad(a, ((0, Mp - M), (0, 0)))
    grid_m = Mp // tm_eff

    in_specs = [
        pl.BlockSpec((tm_eff, K), lambda m: (m, 0)),
        pl.BlockSpec((K, N), lambda m: (0, 0)),
        pl.BlockSpec((1, N), lambda m: (0, 0)),
    ]
    operands = [a, w, b]
    if has_bn:
        scale = scale.reshape(1, N).astype(jnp.float32)
        shift = shift.reshape(1, N).astype(jnp.float32)
        in_specs += [pl.BlockSpec((1, N), lambda m: (0, 0)),
                     pl.BlockSpec((1, N), lambda m: (0, 0))]
        operands += [scale, shift]

    out = pl.pallas_call(
        functools.partial(_matmul_act_kernel, activation=activation,
                          has_bn=has_bn),
        out_shape=jax.ShapeDtypeStruct((Mp, N), out_dtype),
        grid=(grid_m,),
        in_specs=in_specs,
        out_specs=pl.BlockSpec((tm_eff, N), lambda m: (m, 0)),
        compiler_params=pltpu.CompilerParams(
            dimension_semantics=("parallel",),
            vmem_limit_bytes=_VMEM_LIMIT_BYTES),
    )(*operands)

    return out[:M] if Mp != M else out


def _fused_matmul_ref(a, w, b, scale=None, shift=None, *, activation,
                      out_dtype=jnp.float32, tm=None):
    z = jnp.dot(a.astype(jnp.bfloat16), w.astype(jnp.bfloat16),
                preferred_element_type=jnp.float32)
    z = z + b.reshape(1, -1).astype(jnp.float32)
    if scale is not None:
        z = z * scale.reshape(1, -1) + shift.reshape(1, -1)
    z = _apply_activation(z, activation)
    return z.astype(out_dtype)


# ----------------------------------------------------------------------------
# Fused FC head: Linear(6272,1024)+BN1d+LeakyReLU  ->  Linear(1024,128p)+Sigmoid
# ----------------------------------------------------------------------------
def _fc_head_kernel(a_ref, w1_ref, b1_ref, s1_ref, t1_ref, w2_ref, b2_ref,
                    o_ref, acc_ref):
    k = pl.program_id(1)

    @pl.when(k == 0)
    def _():
        acc_ref[...] = jnp.zeros_like(acc_ref)

    acc_ref[...] += jnp.dot(a_ref[...], w1_ref[...],
                            preferred_element_type=jnp.float32)

    @pl.when(k == pl.num_programs(1) - 1)
    def _():
        h = acc_ref[...] + b1_ref[...]
        h = h * s1_ref[...] + t1_ref[...]
        h = jnp.where(h >= 0.0, h, 0.2 * h)                 # LeakyReLU(0.2)
        z = jnp.dot(h.astype(jnp.bfloat16), w2_ref[...],
                    preferred_element_type=jnp.float32)      # fc2 (padded N=128)
        z = z + b2_ref[...]
        o_ref[...] = jax.nn.sigmoid(z).astype(o_ref.dtype)


def fc_head(a, w1, b1, s1, t1, w2p, b2p, *, tm=1024, tk=896,
            out_dtype=jnp.float32):
    M, K = a.shape
    K2, N1 = w1.shape
    N1b, N2 = w2p.shape
    assert K == K2 and N1 == N1b
    if tk >= K:
        tk = K
    assert K % tk == 0
    nk = K // tk

    a = a.astype(jnp.bfloat16)
    w1 = w1.astype(jnp.bfloat16)
    w2p = w2p.astype(jnp.bfloat16)
    b1 = b1.reshape(1, N1).astype(jnp.float32)
    s1 = s1.reshape(1, N1).astype(jnp.float32)
    t1 = t1.reshape(1, N1).astype(jnp.float32)
    b2p = b2p.reshape(1, N2).astype(jnp.float32)

    tm_eff, Mp = _choose_m_tiling(M, tm)
    if Mp != M:
        a = jnp.pad(a, ((0, Mp - M), (0, 0)))
    grid_m = Mp // tm_eff
    # NOTE: at small batch fc1 is weight-bandwidth bound, so we keep grid_m
    # minimal (weight streamed once) rather than splitting M for v7x's 2nd TC.

    out = pl.pallas_call(
        _fc_head_kernel,
        out_shape=jax.ShapeDtypeStruct((Mp, N2), out_dtype),
        grid=(grid_m, nk),
        in_specs=[
            pl.BlockSpec((tm_eff, tk), lambda m, k: (m, k)),
            pl.BlockSpec((tk, N1), lambda m, k: (k, 0)),
            pl.BlockSpec((1, N1), lambda m, k: (0, 0)),
            pl.BlockSpec((1, N1), lambda m, k: (0, 0)),
            pl.BlockSpec((1, N1), lambda m, k: (0, 0)),
            pl.BlockSpec((N1, N2), lambda m, k: (0, 0)),   # fc2 weight, resident
            pl.BlockSpec((1, N2), lambda m, k: (0, 0)),
        ],
        out_specs=pl.BlockSpec((tm_eff, N2), lambda m, k: (m, 0)),
        scratch_shapes=[pltpu.VMEM((tm_eff, N1), jnp.float32)],
        compiler_params=pltpu.CompilerParams(
            dimension_semantics=("parallel", "arbitrary"),
            vmem_limit_bytes=_VMEM_LIMIT_BYTES),
    )(a, w1, b1, s1, t1, w2p, b2p)

    return out[:M] if Mp != M else out


def _fc_head_ref(a, w1, b1, s1, t1, w2p, b2p, *, tm=None, tk=None,
                 out_dtype=jnp.float32):
    h = _fused_matmul_ref(a, w1, b1, s1, t1, activation="leaky",
                          out_dtype=jnp.float32)
    return _fused_matmul_ref(h, w2p, b2p, activation="sigmoid",
                             out_dtype=out_dtype)


# ----------------------------------------------------------------------------
# Glue: im2col patch extraction (plain JAX) for 4x4, stride-2, pad-1 convs
# ----------------------------------------------------------------------------
def im2col(x_nhwc, k=4, s=2, p=1):
    N, H, W, C = x_nhwc.shape
    xp = jnp.pad(x_nhwc, ((0, 0), (p, p), (p, p), (0, 0)))
    HO = (H + 2 * p - k) // s + 1
    WO = (W + 2 * p - k) // s + 1
    idx_i = (jnp.arange(HO) * s)[:, None] + jnp.arange(k)[None, :]  # (HO, k)
    idx_j = (jnp.arange(WO) * s)[:, None] + jnp.arange(k)[None, :]  # (WO, k)
    t = xp[:, idx_i, :, :]                         # (N, HO, k, W+2p, C)
    t = t[:, :, :, idx_j, :]                       # (N, HO, k, WO, k, C)
    t = jnp.transpose(t, (0, 1, 3, 2, 4, 5))       # (N, HO, WO, kh, kw, C)
    return t.reshape(N * HO * WO, k * k * C), HO, WO


# ----------------------------------------------------------------------------
# Parameter initialization (deterministic, synthetic — matches module shapes)
# Weight rows are in im2col (kh, kw, Cin)-major order; loading a real PyTorch
# checkpoint would require the usual (out,in,kh,kw) -> (kh,kw,in,out) reshape.
# ----------------------------------------------------------------------------
def init_params(key):
    ks = jax.random.split(key, 12)
    n = lambda k, shape: (0.02 * jax.random.normal(k, shape)).astype(jnp.float32)
    return {
        "w1": n(ks[0], (16, 64)),          # Conv2d(1, 64, 4) as im2col weight
        "b1": jnp.zeros((64,), jnp.float32),
        "w2": n(ks[1], (1024, 128)),       # Conv2d(64, 128, 4) as im2col weight
        "b2": jnp.zeros((128,), jnp.float32),
        "bn2_gamma": 1.0 + 0.1 * jax.random.normal(ks[2], (128,)).astype(jnp.float32),
        "bn2_beta": 0.1 * jax.random.normal(ks[3], (128,)).astype(jnp.float32),
        "bn2_mean": 0.1 * jax.random.normal(ks[4], (128,)).astype(jnp.float32),
        "bn2_var": jnp.abs(1.0 + 0.1 * jax.random.normal(ks[5], (128,))).astype(jnp.float32),
        # fc1 stored as (in=6272, out=1024), rows in PyTorch NCHW-flat order.
        "fc1_w": n(ks[6], (6272, 1024)),
        "fc1_b": jnp.zeros((1024,), jnp.float32),
        "bn1_gamma": 1.0 + 0.1 * jax.random.normal(ks[7], (1024,)).astype(jnp.float32),
        "bn1_beta": 0.1 * jax.random.normal(ks[8], (1024,)).astype(jnp.float32),
        "bn1_mean": 0.1 * jax.random.normal(ks[9], (1024,)).astype(jnp.float32),
        "bn1_var": jnp.abs(1.0 + 0.1 * jax.random.normal(ks[10], (1024,))).astype(jnp.float32),
        "fc2_w": n(ks[11], (1024, 1)),
        "fc2_b": jnp.zeros((1,), jnp.float32),
    }


def _bn_fold(gamma, beta, mean, var, eps=1e-5):
    scale = gamma / jnp.sqrt(var + eps)
    shift = beta - mean * scale
    return scale, shift


def fold_params(params, eps=1e-5):
    """One-time, out-of-hot-path parameter preparation."""
    fp = {}
    # conv1: im2col weight (16,64), bf16 — no K padding (K=16 block == full dim).
    fp["w1"] = params["w1"].astype(jnp.bfloat16)
    fp["b1"] = params["b1"]
    # conv2 (+ folded BatchNorm2d).
    fp["w2"] = params["w2"].astype(jnp.bfloat16)
    fp["b2"] = params["b2"]
    fp["bn2_scale"], fp["bn2_shift"] = _bn_fold(
        params["bn2_gamma"], params["bn2_beta"],
        params["bn2_mean"], params["bn2_var"], eps)
    # fc1: permute rows from NCHW-flat (c*49 + h*7 + w) to NHWC-flat order so
    # the forward pass can flatten NHWC activations directly (no transpose).
    h = jnp.arange(7)[:, None, None]
    w = jnp.arange(7)[None, :, None]
    c = jnp.arange(128)[None, None, :]
    nchw_of_nhwc = (c * 49 + h * 7 + w).reshape(-1)            # (6272,)
    fp["fc1_w"] = params["fc1_w"][nchw_of_nhwc, :].astype(jnp.bfloat16)
    fp["fc1_b"] = params["fc1_b"]
    fp["bn1_scale"], fp["bn1_shift"] = _bn_fold(
        params["bn1_gamma"], params["bn1_beta"],
        params["bn1_mean"], params["bn1_var"], eps)
    # fc2: pad output dim 1 -> 128 for a lane-dense store (sliced back to 1).
    fp["fc2_wp"] = (jnp.zeros((1024, 128), jnp.float32)
                    .at[:, :1].set(params["fc2_w"]).astype(jnp.bfloat16))
    fp["fc2_bp"] = jnp.zeros((128,), jnp.float32).at[:1].set(params["fc2_b"])
    return fp


# ----------------------------------------------------------------------------
# Discriminator forward
# ----------------------------------------------------------------------------
def discriminator_forward(x_nchw, fp, *, use_pallas=True):
    mm = fused_matmul if use_pallas else _fused_matmul_ref
    head = fc_head if use_pallas else _fc_head_ref

    # bf16 activations end-to-end; cast before any pad / im2col gather.
    x = jnp.transpose(x_nchw, (0, 2, 3, 1)).astype(jnp.bfloat16)   # NHWC
    N = x.shape[0]

    # conv1 + LeakyReLU(0.2); K=16 im2col, no zero-padding, no BN operands.
    p1, ho1, wo1 = im2col(x)                                   # (N*14*14, 16) bf16
    h1 = mm(p1, fp["w1"], fp["b1"],
            activation="leaky", out_dtype=jnp.bfloat16, tm=2048)
    h1 = h1.reshape(N, ho1, wo1, 64)                           # (N,14,14,64) bf16

    # conv2 + BatchNorm2d + LeakyReLU(0.2); bf16 patches.
    # TODO(synk): move patch extraction in-kernel to kill the 4x duplication.
    p2, ho2, wo2 = im2col(h1)                                  # (N*7*7, 1024) bf16
    h2 = mm(p2, fp["w2"], fp["b2"], fp["bn2_scale"], fp["bn2_shift"],
            activation="leaky", out_dtype=jnp.bfloat16, tm=1024)
    h2 = h2.reshape(N, ho2, wo2, 128)                          # (N,7,7,128)

    # Flatten directly in NHWC order (fc1 rows were permuted at fold time).
    flat = h2.reshape(N, ho2 * wo2 * 128)                      # (N, 6272) bf16

    # fc1 + BatchNorm1d + LeakyReLU + fc2 + Sigmoid fused into ONE kernel.
    out = head(flat, fp["fc1_w"], fp["fc1_b"], fp["bn1_scale"], fp["bn1_shift"],
               fp["fc2_wp"], fp["fc2_bp"], tm=1024, tk=896)    # (N, 128) f32
    return out[:, :1]                                          # (N, 1)


if __name__ == "__main__":
    key = jax.random.PRNGKey(0)
    kx, kp = jax.random.split(key)

    # Small batch; spatial size must be 28 (the FC layer hard-codes 128*7*7).
    x = jax.random.normal(kx, (2, 1, 28, 28), dtype=jnp.float32)
    fp = fold_params(init_params(kp))

    fwd = jax.jit(functools.partial(discriminator_forward, use_pallas=True))
    ref_fwd = jax.jit(functools.partial(discriminator_forward, use_pallas=False))

    out = jax.block_until_ready(fwd(x, fp))
    ref = jax.block_until_ready(ref_fwd(x, fp))

    assert out.shape == (2, 1), out.shape
    assert bool(jnp.all(jnp.isfinite(out)))
    assert jnp.allclose(out, ref, rtol=1e-2, atol=1e-2), (out, ref)

    print("KERNEL_OK")
</pallas_src>

<mosaic_0001>
module attributes {stable_mosaic.version = 11 : i64} {
  func.func @_matmul_act_kernel(%arg0: i32, %arg1: memref<392x16xbf16, #tpu.memory_space<vmem>>, %arg2: memref<16x64xbf16, #tpu.memory_space<vmem>>, %arg3: memref<1x64xf32, #tpu.memory_space<vmem>>, %arg4: memref<392x64xbf16, #tpu.memory_space<vmem>>) attributes {dimension_semantics = [#tpu.dimension_semantics<parallel>], iteration_bounds = array<i64: 1>, scalar_prefetch = 0 : i64, scratch_operands = 0 : i64, tpu.core_type = #tpu.core_type<tc>, window_params = [{transform_indices = @transform_0, window_bounds = array<i64: 392, 16>}, {pipeline_mode = #tpu.pipeline_mode<synchronous>, transform_indices = @transform_1, window_bounds = array<i64: 16, 64>}, {pipeline_mode = #tpu.pipeline_mode<synchronous>, transform_indices = @transform_2, window_bounds = array<i64: 1, 64>}, {transform_indices = @transform_3, window_bounds = array<i64: 392, 64>}]} {
    %c0 = arith.constant 0 : index
    %c0_0 = arith.constant 0 : index
    %0 = vector.load %arg1[%c0, %c0_0] : memref<392x16xbf16, #tpu.memory_space<vmem>>, vector<392x16xbf16>
    %c0_1 = arith.constant 0 : index
    %c0_2 = arith.constant 0 : index
    %1 = vector.load %arg2[%c0_1, %c0_2] : memref<16x64xbf16, #tpu.memory_space<vmem>>, vector<16x64xbf16>
    %cst = arith.constant dense<0.000000e+00> : vector<392x64xf32>
    %2 = tpu.matmul %0, %1, %cst {dimension_numbers = #tpu.dot_dimension_numbers<[1], [0], [0], [1], [0, 0, 1, 1], [], []>} : vector<392x16xbf16>, vector<16x64xbf16>, vector<392x64xf32> -> vector<392x64xf32>
    %c0_3 = arith.constant 0 : index
    %c0_4 = arith.constant 0 : index
    %3 = vector.load %arg3[%c0_3, %c0_4] : memref<1x64xf32, #tpu.memory_space<vmem>>, vector<1x64xf32>
    %4 = vector.broadcast %3 : vector<1x64xf32> to vector<392x64xf32>
    %5 = arith.addf %2, %4 : vector<392x64xf32>
    %cst_5 = arith.constant 0.000000e+00 : f32
    %6 = vector.broadcast %cst_5 : f32 to vector<392x64xf32>
    %7 = arith.cmpf oge, %5, %6 : vector<392x64xf32>
    %cst_6 = arith.constant 2.000000e-01 : f32
    %8 = vector.broadcast %cst_6 : f32 to vector<392x64xf32>
    %9 = arith.mulf %8, %5 : vector<392x64xf32>
    %10 = arith.select %7, %5, %9 : vector<392x64xi1>, vector<392x64xf32>
    %11 = arith.truncf %10 : vector<392x64xf32> to vector<392x64xbf16>
    %c0_7 = arith.constant 0 : index
    %c0_8 = arith.constant 0 : index
    %12 = vector.load %arg4[%c0_7, %c0_8] : memref<392x64xbf16, #tpu.memory_space<vmem>>, vector<392x64xbf16>
    tpu.vector_store %arg4[%c0_7, %c0_8], %11 {strides = array<i32>} : memref<392x64xbf16, #tpu.memory_space<vmem>>, vector<392x64xbf16>,
    return
  }
  func.func @transform_0(%arg0: i32) -> (i32, i32) {
    %c0_i32 = arith.constant 0 : i32
    %c0_i32_0 = arith.constant 0 : i32
    return %arg0, %c0_i32 : i32, i32
  }
  func.func @transform_1(%arg0: i32) -> (i32, i32) {
    %c0_i32 = arith.constant 0 : i32
    %c0_i32_0 = arith.constant 0 : i32
    %c0_i32_1 = arith.constant 0 : i32
    return %c0_i32, %c0_i32_0 : i32, i32
  }
  func.func @transform_2(%arg0: i32) -> (i32, i32) {
    %c0_i32 = arith.constant 0 : i32
    %c0_i32_0 = arith.constant 0 : i32
    %c0_i32_1 = arith.constant 0 : i32
    return %c0_i32, %c0_i32_0 : i32, i32
  }
  func.func @transform_3(%arg0: i32) -> (i32, i32) {
    %c0_i32 = arith.constant 0 : i32
    %c0_i32_0 = arith.constant 0 : i32
    return %arg0, %c0_i32 : i32, i32
  }
}

module attributes {stable_mosaic.version = 11 : i64} {
  func.func @_matmul_act_kernel(%arg0: i32, %arg1: memref<98x1024xbf16, #tpu.memory_space<vmem>>, %arg2: memref<1024x128xbf16, #tpu.memory_space<vmem>>, %arg3: memref<1x128xf32, #tpu.memory_space<vmem>>, %arg4: memref<1x128xf32, #tpu.memory_space<vmem>>, %arg5: memref<1x128xf32, #tpu.memory_space<vmem>>, %arg6: memref<98x128xbf16, #tpu.memory_space<vmem>>) attributes {dimension_semantics = [#tpu.dimension_semantics<parallel>], iteration_bounds = array<i64: 1>, scalar_prefetch = 0 : i64, scratch_operands = 0 : i64, tpu.core_type = #tpu.core_type<tc>, window_params = [{transform_indices = @transform_0, window_bounds = array<i64: 98, 1024>}, {pipeline_mode = #tpu.pipeline_mode<synchronous>, transform_indices = @transform_1, window_bounds = array<i64: 1024, 128>}, {pipeline_mode = #tpu.pipeline_mode<synchronous>, transform_indices = @transform_2, window_bounds = array<i64: 1, 128>}, {pipeline_mode = #tpu.pipeline_mode<synchronous>, transform_indices = @transform_3, window_bounds = array<i64: 1, 128>}, {pipeline_mode = #tpu.pipeline_mode<synchronous>, transform_indices = @transform_4, window_bounds = array<i64: 1, 128>}, {transform_indices = @transform_5, window_bounds = array<i64: 98, 128>}]} {
    %c0 = arith.constant 0 : index
    %c0_0 = arith.constant 0 : index
    %0 = vector.load %arg1[%c0, %c0_0] : memref<98x1024xbf16, #tpu.memory_space<vmem>>, vector<98x1024xbf16>
    %c0_1 = arith.constant 0 : index
    %c0_2 = arith.constant 0 : index
    %1 = vector.load %arg2[%c0_1, %c0_2] : memref<1024x128xbf16, #tpu.memory_space<vmem>>, vector<1024x128xbf16>
    %cst = arith.constant dense<0.000000e+00> : vector<98x128xf32>
    %2 = tpu.matmul %0, %1, %cst {dimension_numbers = #tpu.dot_dimension_numbers<[1], [0], [0], [1], [0, 0, 1, 1], [], []>} : vector<98x1024xbf16>, vector<1024x128xbf16>, vector<98x128xf32> -> vector<98x128xf32>
    %c0_3 = arith.constant 0 : index
    %c0_4 = arith.constant 0 : index
    %3 = vector.load %arg3[%c0_3, %c0_4] : memref<1x128xf32, #tpu.memory_space<vmem>>, vector<1x128xf32>
    %4 = vector.broadcast %3 : vector<1x128xf32> to vector<98x128xf32>
    %5 = arith.addf %2, %4 : vector<98x128xf32>
    %c0_5 = arith.constant 0 : index
    %c0_6 = arith.constant 0 : index
    %6 = vector.load %arg4[%c0_5, %c0_6] : memref<1x128xf32, #tpu.memory_space<vmem>>, vector<1x128xf32>
    %7 = vector.broadcast %6 : vector<1x128xf32> to vector<98x128xf32>
    %8 = arith.mulf %5, %7 : vector<98x128xf32>
    %c0_7 = arith.constant 0 : index
    %c0_8 = arith.constant 0 : index
    %9 = vector.load %arg5[%c0_7, %c0_8] : memref<1x128xf32, #tpu.memory_space<vmem>>, vector<1x128xf32>
    %10 = vector.broadcast %9 : vector<1x128xf32> to vector<98x128xf32>
    %11 = arith.addf %8, %10 : vector<98x128xf32>
    %cst_9 = arith.constant 0.000000e+00 : f32
    %12 = vector.broadcast %cst_9 : f32 to vector<98x128xf32>
    %13 = arith.cmpf oge, %11, %12 : vector<98x128xf32>
    %cst_10 = arith.constant 2.000000e-01 : f32
    %14 = vector.broadcast %cst_10 : f32 to vector<98x128xf32>
    %15 = arith.mulf %14, %11 : vector<98x128xf32>
    %16 = arith.select %13, %11, %15 : vector<98x128xi1>, vector<98x128xf32>
    %17 = arith.truncf %16 : vector<98x128xf32> to vector<98x128xbf16>
    %c0_11 = arith.constant 0 : index
    %c0_12 = arith.constant 0 : index
    %18 = vector.load %arg6[%c0_11, %c0_12] : memref<98x128xbf16, #tpu.memory_space<vmem>>, vector<98x128xbf16>
    tpu.vector_store %arg6[%c0_11, %c0_12], %17 {strides = array<i32>} : memref<98x128xbf16, #tpu.memory_space<vmem>>, vector<98x128xbf16>,
    return
  }
  func.func @transform_0(%arg0: i32) -> (i32, i32) {
    %c0_i32 = arith.constant 0 : i32
    %c0_i32_0 = arith.constant 0 : i32
    return %arg0, %c0_i32 : i32, i32
  }
  func.func @transform_1(%arg0: i32) -> (i32, i32) {
    %c0_i32 = arith.constant 0 : i32
    %c0_i32_0 = arith.constant 0 : i32
    %c0_i32_1 = arith.constant 0 : i32
    return %c0_i32, %c0_i32_0 : i32, i32
  }
  func.func @transform_2(%arg0: i32) -> (i32, i32) {
    %c0_i32 = arith.constant 0 : i32
    %c0_i32_0 = arith.constant 0 : i32
    %c0_i32_1 = arith.constant 0 : i32
    return %c0_i32, %c0_i32_0 : i32, i32
  }
  func.func @transform_3(%arg0: i32) -> (i32, i32) {
    %c0_i32 = arith.constant 0 : i32
    %c0_i32_0 = arith.constant 0 : i32
    %c0_i32_1 = arith.constant 0 : i32
    return %c0_i32, %c0_i32_0 : i32, i32
  }
  func.func @transform_4(%arg0: i32) -> (i32, i32) {
    %c0_i32 = arith.constant 0 : i32
    %c0_i32_0 = arith.constant 0 : i32
    %c0_i32_1 = arith.constant 0 : i32
    return %c0_i32, %c0_i32_0 : i32, i32
  }
  func.func @transform_5(%arg0: i32) -> (i32, i32) {
    %c0_i32 = arith.constant 0 : i32
    %c0_i32_0 = arith.constant 0 : i32
    return %arg0, %c0_i32 : i32, i32
  }
}

module attributes {stable_mosaic.version = 11 : i64} {
  func.func @_fc_head_kernel(%arg0: i32, %arg1: i32, %arg2: memref<2x896xbf16, #tpu.memory_space<vmem>>, %arg3: memref<896x1024xbf16, #tpu.memory_space<vmem>>, %arg4: memref<1x1024xf32, #tpu.memory_space<vmem>>, %arg5: memref<1x1024xf32, #tpu.memory_space<vmem>>, %arg6: memref<1x1024xf32, #tpu.memory_space<vmem>>, %arg7: memref<1024x128xbf16, #tpu.memory_space<vmem>>, %arg8: memref<1x128xf32, #tpu.memory_space<vmem>>, %arg9: memref<2x128xf32, #tpu.memory_space<vmem>>, %arg10: memref<2x1024xf32, #tpu.memory_space<vmem>>) attributes {dimension_semantics = [#tpu.dimension_semantics<parallel>, #tpu.dimension_semantics<arbitrary>], iteration_bounds = array<i64: 1, 7>, scalar_prefetch = 0 : i64, scratch_operands = 1 : i64, tpu.core_type = #tpu.core_type<tc>, window_params = [{transform_indices = @transform_0, window_bounds = array<i64: 2, 896>}, {transform_indices = @transform_1, window_bounds = array<i64: 896, 1024>}, {pipeline_mode = #tpu.pipeline_mode<synchronous>, transform_indices = @transform_2, window_bounds = array<i64: 1, 1024>}, {pipeline_mode = #tpu.pipeline_mode<synchronous>, transform_indices = @transform_3, window_bounds = array<i64: 1, 1024>}, {pipeline_mode = #tpu.pipeline_mode<synchronous>, transform_indices = @transform_4, window_bounds = array<i64: 1, 1024>}, {pipeline_mode = #tpu.pipeline_mode<synchronous>, transform_indices = @transform_5, window_bounds = array<i64: 1024, 128>}, {pipeline_mode = #tpu.pipeline_mode<synchronous>, transform_indices = @transform_6, window_bounds = array<i64: 1, 128>}, {transform_indices = @transform_7, window_bounds = array<i64: 2, 128>}]} {
    %c0_i32 = arith.constant 0 : i32
    %0 = arith.cmpi eq, %arg1, %c0_i32 : i32
    %1 = arith.extui %0 : i1 to i32
    %c0_i32_0 = arith.constant 0 : i32
    %2 = arith.cmpi ne, %1, %c0_i32_0 : i32
    scf.if %2 {
      %cst_9 = arith.constant 0.000000e+00 : f32
      %12 = vector.broadcast %cst_9 : f32 to vector<2x1024xf32>
      %c0_10 = arith.constant 0 : index
      %c0_11 = arith.constant 0 : index
      %13 = vector.load %arg10[%c0_10, %c0_11] : memref<2x1024xf32, #tpu.memory_space<vmem>>, vector<2x1024xf32>
      tpu.vector_store %arg10[%c0_10, %c0_11], %12 {strides = array<i32>} : memref<2x1024xf32, #tpu.memory_space<vmem>>, vector<2x1024xf32>,
    } else {
    }
    %c0 = arith.constant 0 : index
    %c0_1 = arith.constant 0 : index
    %3 = vector.load %arg10[%c0, %c0_1] : memref<2x1024xf32, #tpu.memory_space<vmem>>, vector<2x1024xf32>
    %c0_2 = arith.constant 0 : index
    %c0_3 = arith.constant 0 : index
    %4 = vector.load %arg2[%c0_2, %c0_3] : memref<2x896xbf16, #tpu.memory_space<vmem>>, vector<2x896xbf16>
    %c0_4 = arith.constant 0 : index
    %c0_5 = arith.constant 0 : index
    %5 = vector.load %arg3[%c0_4, %c0_5] : memref<896x1024xbf16, #tpu.memory_space<vmem>>, vector<896x1024xbf16>
    %cst = arith.constant dense<0.000000e+00> : vector<2x1024xf32>
    %6 = tpu.matmul %4, %5, %cst {dimension_numbers = #tpu.dot_dimension_numbers<[1], [0], [0], [1], [0, 0, 1, 1], [], []>} : vector<2x896xbf16>, vector<896x1024xbf16>, vector<2x1024xf32> -> vector<2x1024xf32>
    %7 = arith.addf %3, %6 : vector<2x1024xf32>
    %c0_6 = arith.constant 0 : index
    %c0_7 = arith.constant 0 : index
    %8 = vector.load %arg10[%c0_6, %c0_7] : memref<2x1024xf32, #tpu.memory_space<vmem>>, vector<2x1024xf32>
    tpu.vector_store %arg10[%c0_6, %c0_7], %7 {strides = array<i32>} : memref<2x1024xf32, #tpu.memory_space<vmem>>, vector<2x1024xf32>,
    %c6_i32 = arith.constant 6 : i32
    %9 = arith.cmpi eq, %arg1, %c6_i32 : i32
    %10 = arith.extui %9 : i1 to i32
    %c0_i32_8 = arith.constant 0 : i32
    %11 = arith.cmpi ne, %10, %c0_i32_8 : i32
    scf.if %11 {
      %c0_9 = arith.constant 0 : index
      %c0_10 = arith.constant 0 : index
      %12 = vector.load %arg10[%c0_9, %c0_10] : memref<2x1024xf32, #tpu.memory_space<vmem>>, vector<2x1024xf32>
      %c0_11 = arith.constant 0 : index
      %c0_12 = arith.constant 0 : index
      %13 = vector.load %arg4[%c0_11, %c0_12] : memref<1x1024xf32, #tpu.memory_space<vmem>>, vector<1x1024xf32>
      %14 = vector.broadcast %13 : vector<1x1024xf32> to vector<2x1024xf32>
      %15 = arith.addf %12, %14 : vector<2x1024xf32>
      %c0_13 = arith.constant 0 : index
      %c0_14 = arith.constant 0 : index
      %16 = vector.load %arg5[%c0_13, %c0_14] : memref<1x1024xf32, #tpu.memory_space<vmem>>, vector<1x1024xf32>
      %17 = vector.broadcast %16 : vector<1x1024xf32> to vector<2x1024xf32>
      %18 = arith.mulf %15, %17 : vector<2x1024xf32>
      %c0_15 = arith.constant 0 : index
      %c0_16 = arith.constant 0 : index
      %19 = vector.load %arg6[%c0_15, %c0_16] : memref<1x1024xf32, #tpu.memory_space<vmem>>, vector<1x1024xf32>
      %20 = vector.broadcast %19 : vector<1x1024xf32> to vector<2x1024xf32>
      %21 = arith.addf %18, %20 : vector<2x1024xf32>
      %cst_17 = arith.constant 0.000000e+00 : f32
      %22 = vector.broadcast %cst_17 : f32 to vector<2x1024xf32>
      %23 = arith.cmpf oge, %21, %22 : vector<2x1024xf32>
      %cst_18 = arith.constant 2.000000e-01 : f32
      %24 = vector.broadcast %cst_18 : f32 to vector<2x1024xf32>
      %25 = arith.mulf %24, %21 : vector<2x1024xf32>
      %26 = arith.select %23, %21, %25 : vector<2x1024xi1>, vector<2x1024xf32>
      %27 = arith.truncf %26 : vector<2x1024xf32> to vector<2x1024xbf16>
      %c0_19 = arith.constant 0 : index
      %c0_20 = arith.constant 0 : index
      %28 = vector.load %arg7[%c0_19, %c0_20] : memref<1024x128xbf16, #tpu.memory_space<vmem>>, vector<1024x128xbf16>
      %cst_21 = arith.constant dense<0.000000e+00> : vector<2x128xf32>
      %29 = tpu.matmul %27, %28, %cst_21 {dimension_numbers = #tpu.dot_dimension_numbers<[1], [0], [0], [1], [0, 0, 1, 1], [], []>} : vector<2x1024xbf16>, vector<1024x128xbf16>, vector<2x128xf32> -> vector<2x128xf32>
      %c0_22 = arith.constant 0 : index
      %c0_23 = arith.constant 0 : index
      %30 = vector.load %arg8[%c0_22, %c0_23] : memref<1x128xf32, #tpu.memory_space<vmem>>, vector<1x128xf32>
      %31 = vector.broadcast %30 : vector<1x128xf32> to vector<2x128xf32>
      %32 = arith.addf %29, %31 : vector<2x128xf32>
      %33 = arith.negf %32 : vector<2x128xf32>
      %34 = math.exp %33 : vector<2x128xf32>
      %cst_24 = arith.constant 1.000000e+00 : f32
      %35 = vector.broadcast %cst_24 : f32 to vector<2x128xf32>
      %36 = arith.addf %35, %34 : vector<2x128xf32>
      %37 = arith.divf %35, %36 : vector<2x128xf32>
      %c0_25 = arith.constant 0 : index
      %c0_26 = arith.constant 0 : index
      %38 = vector.load %arg9[%c0_25, %c0_26] : memref<2x128xf32, #tpu.memory_space<vmem>>, vector<2x128xf32>
      tpu.vector_store %arg9[%c0_25, %c0_26], %37 {strides = array<i32>} : memref<2x128xf32, #tpu.memory_space<vmem>>, vector<2x128xf32>,
    } else {
    }
    return
  }
  func.func @transform_0(%arg0: i32, %arg1: i32) -> (i32, i32) {
    %c0_i32 = arith.constant 0 : i32
    return %arg0, %arg1 : i32, i32
  }
  func.func @transform_1(%arg0: i32, %arg1: i32) -> (i32, i32) {
    %c0_i32 = arith.constant 0 : i32
    %c0_i32_0 = arith.constant 0 : i32
    return %arg1, %c0_i32 : i32, i32
  }
  func.func @transform_2(%arg0: i32, %arg1: i32) -> (i32, i32) {
    %c0_i32 = arith.constant 0 : i32
    %c0_i32_0 = arith.constant 0 : i32
    %c0_i32_1 = arith.constant 0 : i32
    return %c0_i32, %c0_i32_0 : i32, i32
  }
  func.func @transform_3(%arg0: i32, %arg1: i32) -> (i32, i32) {
    %c0_i32 = arith.constant 0 : i32
    %c0_i32_0 = arith.constant 0 : i32
    %c0_i32_1 = arith.constant 0 : i32
    return %c0_i32, %c0_i32_0 : i32, i32
  }
  func.func @transform_4(%arg0: i32, %arg1: i32) -> (i32, i32) {
    %c0_i32 = arith.constant 0 : i32
    %c0_i32_0 = arith.constant 0 : i32
    %c0_i32_1 = arith.constant 0 : i32
    return %c0_i32, %c0_i32_0 : i32, i32
  }
  func.func @transform_5(%arg0: i32, %arg1: i32) -> (i32, i32) {
    %c0_i32 = arith.constant 0 : i32
    %c0_i32_0 = arith.constant 0 : i32
    %c0_i32_1 = arith.constant 0 : i32
    return %c0_i32, %c0_i32_0 : i32, i32
  }
  func.func @transform_6(%arg0: i32, %arg1: i32) -> (i32, i32) {
    %c0_i32 = arith.constant 0 : i32
    %c0_i32_0 = arith.constant 0 : i32
    %c0_i32_1 = arith.constant 0 : i32
    return %c0_i32, %c0_i32_0 : i32, i32
  }
  func.func @transform_7(%arg0: i32, %arg1: i32) -> (i32, i32) {
    %c0_i32 = arith.constant 0 : i32
    %c0_i32_0 = arith.constant 0 : i32
    return %arg0, %c0_i32 : i32, i32
  }
}

</mosaic_0001>

<bundles_post_ra>
// kernel: discriminator_forward.3
= control target key start
LH: loop header
LB: loop body
LE: loop exit
PB: predicated region body
PF: predicated region fallthrough
CT: control target
= control target key end

     0   :  { %8 = vsyncpa [#allocation3], 0  ;;  %s1745_s0 = inlined_call_operand.vmem [shape: bf16[392,16], index: 0, kind: input, shape index: {}]   ;;  %s1746_s1 = inlined_call_operand.hbm [shape: bf16[16,64], index: 1, kind: input, shape index: {}]   ;;  %s1747_s2 = inlined_call_operand.hbm [shape: f32[1,64], index: 2, kind: input, shape index: {}]   ;;  %s1748_s3 = inlined_call_operand.vmem [shape: bf16[392,64], index: 3, kind: output, shape index: {}]  }
   0x1   :  { %9 = vsyncpa [#allocation5], 0  ;;  %s1296_s12 = smov [#allocation2]   ;;  %s1248_s16 = scalar_lea.hbm %s1746_s1, 128 }
   0x2   :  { %s17_s13 = sshll.u32 %s1296_s12, 4  ;;  %p1249_p0 = scmp.ne.s32.totalorder %s1746_s1, %s1248_s16  ;;  %s18_s13 = int_to_ptr.vmem [resolvable:$true] %s17_s13 }
   0x3   :  { %p1252_p1 = scmp.lt.u32.totalorder %s1248_s16, %s1746_s1 }
   0x5   :  { %p1254_p2 = pnand %p1252_p1, %p1249_p0 }
   0x7   :  { %1257 = shalt.err (!%p1254_p2)
}
   0x8   :  { %s1258_s21 = scalar_lea.vmem %s18_s13, 128  ;;  %p1263_p4 = scmp.lt.s32.totalorder %s18_s13, %s18_s13 }
   0x9   :  { %p1259_p3 = scmp.ne.s32.totalorder %s18_s13, %s1258_s21  ;;  %p1264_p5 = scmp.lt.s32.totalorder %s1258_s21, %s1258_s21 }
   0xb   :  { %p1265_p6 = por %p1264_p5, %p1263_p4 }
   0xd   :  { %p1266_p7 = pnand %p1265_p6, %p1259_p3 }
   0xf   :  { %1269 = shalt.err (!%p1266_p7)
}
  0x10   :  { %s1297_s22 = smov 64   ;;  %s1298_s23 = smov 4  }
  0x11   :  { %23 = dma.hbm_to_vmem [thread:$0]  %s1746_s1, 128, %s18_s13, [#allocation3], %s1297_s22, %s1297_s22, %s1298_s23  }
  0x12   :  { %s1299_s26 = smov [#allocation4]   ;;  %s1270_s30 = scalar_lea.hbm %s1747_s2, 16 }
  0x13   :  { %s30_s27 = sshll.u32 %s1299_s26, 4  ;;  %p1271_p8 = scmp.ne.s32.totalorder %s1747_s2, %s1270_s30  ;;  %s31_s27 = int_to_ptr.vmem [resolvable:$true] %s30_s27 }
  0x14   :  { %p1274_p9 = scmp.lt.u32.totalorder %s1270_s30, %s1747_s2 }
  0x16   :  { %p1276_p10 = pnand %p1274_p9, %p1271_p8 }
  0x18   :  { %1279 = shalt.err (!%p1276_p10)
}
  0x19   :  { %s1280_s8 = scalar_lea.vmem %s31_s27, 16  ;;  %s1284_s1 = scalar_lea.vmem %s31_s27, 32 }
  0x1a   :  { %p1281_p11 = scmp.ne.s32.totalorder %s31_s27, %s1280_s8  ;;  %p1285_p12 = scmp.lt.s32.totalorder %s31_s27, %s31_s27 }
  0x1b   :  { %p1286_p13 = scmp.lt.s32.totalorder %s1284_s1, %s1280_s8 }
  0x1d   :  { %p1287_p0 = por %p1286_p13, %p1285_p12 }
  0x1f   :  { %p1288_p1 = pnand %p1287_p0, %p1281_p11 }
  0x21   :  { %1291 = shalt.err (!%p1288_p1)
}
  0x22   :  { %33 = dma.hbm_to_vmem [thread:$0]  %s1747_s2, 16, %s31_s27, [#allocation5]  }
  0x23   :  { %1292 = dma.done.wait [#allocation3], 128  }
  0x24   :  { %1293 = vsyncadd [#allocation3], 4294967168 }
  0x25   :  { %1294 = dma.done.wait [#allocation5], 16  }
  0x26   :  { %1295 = vsyncadd [#allocation5], 4294967280  ;;  %v1300_v0 = vmov 0.0   ;;  %vm1301_vm0 = vmmov 0   ;;  %v1222_v1 = vld [vmem:[#allocation2] sm:$0xff]   ;;  %vm228_vm1 = vcmask 130048  }
  0x27   :  { %1112 = vmatprep.subr.bf16.mxu0 %v1300_v0  ;;  %1114 = vmatprep.mubr.msk.bf16.mxu0 %vm1301_vm0, %v1300_v0  ;;  %v1223_v2 = vld [vmem:[%s1745_s0] sm:$0xff]   ;;  %v1224_v3 = vld [vmem:[%s1745_s0 + $0x68] sm:$0xff]   ;;  %v1226_v5 = vld [vmem:[%s1745_s0 + $0x70] sm:$0xff]   ;;  %vm880_vm4 = vcmask 519168  }
  0x28   :  { %1214 = vmatprep.subr.bf16.mxu1 %v1300_v0  ;;  %1166 = vmatprep.mubr.msk.bf16.mxu1 %vm1301_vm0, %v1300_v0  ;;  %v1225_v4 = vld [vmem:[%s1745_s0 + $0x8] sm:$0xff]   ;;  %v1227_v6 = vld [vmem:[%s1745_s0 + $0x10] sm:$0xff]   ;;  %v1228_v7 = vld [vmem:[%s1745_s0 + $0x78] sm:$0xff]  }
  0x29   :  { %1113 = vmatpush3.bf16.msra.mxu0 %v1222_v1  ;;  %1215 = vmatpush3.bf16.msra.mxu1 %v1222_v1  ;;  %v1229_v8 = vld [vmem:[%s1745_s0 + $0x18] sm:$0xff]   ;;  %v1230_v9 = vld [vmem:[%s1745_s0 + $0x80] sm:$0xff]   ;;  %v1232_v11 = vld [vmem:[%s1745_s0 + $0x88] sm:$0xff]  }
  0x2a   :  { %v1231_v10 = vld [vmem:[%s1745_s0 + $0x20] sm:$0xff]   ;;  %v1233_v12 = vld [vmem:[%s1745_s0 + $0x28] sm:$0xff]   ;;  %v1234_v13 = vld [vmem:[%s1745_s0 + $0x90] sm:$0xff]  }
  0x2b   :  { %v1235_v14 = vld [vmem:[%s1745_s0 + $0x30] sm:$0xff]   ;;  %v1236_v15 = vld [vmem:[%s1745_s0 + $0x98] sm:$0xff]   ;;  %v1238_v17 = vld [vmem:[%s1745_s0 + $0xa0] sm:$0xff]  }
  0x2c   :  { %1115 = vmatmul.mubr.msk.bf16.vlgmr.msra.gmra.mrb[0].mxu0 %vm228_vm1, %v1223_v2  ;;  %1167 = vmatmul.mubr.msk.bf16.vlgmr.msra.gmra.mrb[0].mxu1 %vm228_vm1, %v1224_v3  ;;  %v1237_v16 = vld [vmem:[%s1745_s0 + $0x38] sm:$0xff]   ;;  %v1239_v18 = vld [vmem:[%s1745_s0 + $0x40] sm:$0xff]   ;;  %v1240_v19 = vld [vmem:[%s1745_s0 + $0xa8] sm:$0xff]  }
  0x2d   :  { %1118 = vmatprep.mubr.msk.bf16.mxu0 %vm1301_vm0, %v1300_v0  ;;  %1170 = vmatprep.mubr.msk.bf16.mxu1 %vm1301_vm0, %v1300_v0  ;;  %v1241_v20 = vld [vmem:[%s1745_s0 + $0x48] sm:$0xff]   ;;  %v1242_v21 = vld [vmem:[%s1745_s0 + $0xb0] sm:$0xff]   ;;  %v1244_v23 = vld [vmem:[%s1745_s0 + $0xb8] sm:$0xff]  }
  0x2e   :  { %v1243_v22 = vld [vmem:[%s1745_s0 + $0x50] sm:$0xff]   ;;  %v1245_v24 = vld [vmem:[%s1745_s0 + $0x58] sm:$0xff]   ;;  %v1246_v25 = vld [vmem:[%s1745_s0 + $0xc0] ss:$0 sps:$4 sm:$0xff]  }
  0x2f   :  { %v1247_v26 = vld [vmem:[%s1745_s0 + $0x60] sm:$0xff]   ;;  %v1498_v27 = vld [vmem:[#allocation4] ss:$0 sm:$0xff] }
  0x34   :  { %1119 = vmatmul.mubr.msk.bf16.gmra.mrb[4].mxu0 %vm228_vm1, %v1225_v4  ;;  %1171 = vmatmul.mubr.msk.bf16.gmra.mrb[4].mxu1 %vm228_vm1, %v1226_v5 }
  0x35   :  { %1122 = vmatprep.mubr.msk.bf16.mxu0 %vm1301_vm0, %v1300_v0  ;;  %1174 = vmatprep.mubr.msk.bf16.mxu1 %vm1301_vm0, %v1300_v0 }
  0x3c   :  { %1123 = vmatmul.mubr.msk.bf16.gmra.mrb[8].mxu0 %vm228_vm1, %v1227_v6  ;;  %1175 = vmatmul.mubr.msk.bf16.gmra.mrb[8].mxu1 %vm228_vm1, %v1228_v7 }
  0x3d   :  { %1126 = vmatprep.mubr.msk.bf16.mxu0 %vm1301_vm0, %v1300_v0  ;;  %1178 = vmatprep.mubr.msk.bf16.mxu1 %vm1301_vm0, %v1300_v0 }
  0x44   :  { %1127 = vmatmul.mubr.msk.bf16.gmra.mrb[12].mxu0 %vm228_vm1, %v1229_v8  ;;  %1179 = vmatmul.mubr.msk.bf16.gmra.mrb[12].mxu1 %vm228_vm1, %v1230_v9 }
  0x45   :  { %1130 = vmatprep.mubr.msk.bf16.mxu0 %vm1301_vm0, %v1300_v0  ;;  %1182 = vmatprep.mubr.msk.bf16.mxu1 %vm1301_vm0, %v1300_v0 }
  0x4c   :  { %1131 = vmatmul.mubr.msk.bf16.gmra.mrb[16].mxu0 %vm228_vm1, %v1231_v10  ;;  %1183 = vmatmul.mubr.msk.bf16.gmra.mrb[16].mxu1 %vm228_vm1, %v1232_v11 }
  0x4d   :  { %1134 = vmatprep.mubr.msk.bf16.mxu0 %vm1301_vm0, %v1300_v0  ;;  %1186 = vmatprep.mubr.msk.bf16.mxu1 %vm1301_vm0, %v1300_v0 }
  0x54   :  { %1135 = vmatmul.mubr.msk.bf16.gmra.mrb[20].mxu0 %vm228_vm1, %v1233_v12  ;;  %1187 = vmatmul.mubr.msk.bf16.gmra.mrb[20].mxu1 %vm228_vm1, %v1234_v13 }
  0x55   :  { %1138 = vmatprep.mubr.msk.bf16.mxu0 %vm1301_vm0, %v1300_v0  ;;  %1190 = vmatprep.mubr.msk.bf16.mxu1 %vm1301_vm0, %v1300_v0 }
  0x5c   :  { %1139 = vmatmul.mubr.msk.bf16.gmra.mrb[24].mxu0 %vm228_vm1, %v1235_v14  ;;  %1191 = vmatmul.mubr.msk.bf16.gmra.mrb[24].mxu1 %vm228_vm1, %v1236_v15 }
  0x5d   :  { %1142 = vmatprep.mubr.msk.bf16.mxu0 %vm1301_vm0, %v1300_v0  ;;  %1194 = vmatprep.mubr.msk.bf16.mxu1 %vm1301_vm0, %v1300_v0 }
  0x64   :  { %1143 = vmatmul.mubr.msk.bf16.gmra.mrb[28].mxu0 %vm228_vm1, %v1237_v16  ;;  %1195 = vmatmul.mubr.msk.bf16.gmra.mrb[28].mxu1 %vm228_vm1, %v1238_v17 }
  0x65   :  { %1146 = vmatprep.mubr.msk.bf16.mxu0 %vm1301_vm0, %v1300_v0  ;;  %1198 = vmatprep.mubr.msk.bf16.mxu1 %vm1301_vm0, %v1300_v0 }
  0x6c   :  { %1147 = vmatmul.mubr.msk.bf16.gmra.mrb[32].mxu0 %vm228_vm1, %v1239_v18  ;;  %1199 = vmatmul.mubr.msk.bf16.gmra.mrb[32].mxu1 %vm228_vm1, %v1240_v19 }
  0x6d   :  { %1150 = vmatprep.mubr.msk.bf16.mxu0 %vm1301_vm0, %v1300_v0  ;;  %1202 = vmatprep.mubr.msk.bf16.mxu1 %vm1301_vm0, %v1300_v0 }
  0x74   :  { %1151 = vmatmul.mubr.msk.bf16.gmra.mrb[36].mxu0 %vm228_vm1, %v1241_v20  ;;  %1203 = vmatmul.mubr.msk.bf16.gmra.mrb[36].mxu1 %vm228_vm1, %v1242_v21 }
  0x75   :  { %1154 = vmatprep.mubr.msk.bf16.mxu0 %vm1301_vm0, %v1300_v0  ;;  %1206 = vmatprep.mubr.msk.bf16.mxu1 %vm1301_vm0, %v1300_v0 }
  0x7c   :  { %1155 = vmatmul.mubr.msk.bf16.gmra.mrb[40].mxu0 %vm228_vm1, %v1243_v22  ;;  %1207 = vmatmul.mubr.msk.bf16.gmra.mrb[40].mxu1 %vm228_vm1, %v1244_v23 }
  0x7d   :  { %1158 = vmatprep.mubr.msk.bf16.mxu0 %vm1301_vm0, %v1300_v0  ;;  %1210 = vmatprep.mubr.msk.bf16.mxu1 %vm1301_vm0, %v1300_v0 }
  0x84   :  { %1159 = vmatmul.mubr.msk.bf16.gmra.mrb[44].mxu0 %vm228_vm1, %v1245_v24  ;;  %1211 = vmatmul.mubr.msk.bf16.gmra.mrb[44].mxu1 %vm228_vm1, %v1246_v25 }
  0x85   :  { %1162 = vmatprep.mubr.msk.bf16.mxu0 %vm1301_vm0, %v1300_v0 }
  0x8c   :  { %1163 = vmatmul.mubr.msk.bf16.gmra.mrb[48].mxu0 %vm228_vm1, %v1247_v26 }
  0xff   :  { %v338_v28 = vpop.f32.mrb[0].mxu0  ;;  %v442_v29 = vpop.f32.mrb[0].mxu1 }
 0x100   :  { %v339_v30 = vadd.f32 %v1498_v27, %v338_v28  ;;  %v1116_v31 = vpop.f32.mrb[1].mxu0  ;;  %v443_v32 = vadd.f32 %v1498_v27, %v442_v29  ;;  %v1168_v33 = vpop.f32.mrb[1].mxu1 }
 0x101   :  { %v341_v34 = vpop.f32.mrb[2].mxu0  ;;  %v445_v35 = vpop.f32.mrb[2].mxu1 }
 0x102   :  { %vm536_vm2 = vcmp.ge.f32.partialorder %v339_v30, 0.0  ;;  %v585_v36 = vmul.f32 0.2, %v339_v30  ;;  %v342_v37 = vadd.f32 %v1498_v27, %v341_v34  ;;  %v1117_v38 = vpop.f32.mrb[3].mxu0  ;;  %vm562_vm3 = vcmp.ge.f32.partialorder %v443_v32, 0.0  ;;  %v1169_v39 = vpop.f32.mrb[3].mxu1 }
 0x103   :  { %v611_v40 = vmul.f32 0.2, %v443_v32  ;;  %v446_v41 = vadd.f32 %v1498_v27, %v445_v35 }
 0x104   :  { %v634_v42 = vsel %vm536_vm2, %v339_v30, %v585_v36  ;;  %vm537_vm5 = vcmp.ge.f32.partialorder %v342_v37, 0.0  ;;  %v586_v43 = vmul.f32 0.2, %v342_v37 }
 0x105   :  { %v1037_v44 = vpack.c.bf16 %v634_v42, %v634_v42  ;;  %v660_v45 = vsel %vm562_vm3, %v443_v32, %v611_v40  ;;  %vm563_vm6 = vcmp.ge.f32.partialorder %v446_v41, 0.0  ;;  %v612_v46 = vmul.f32 0.2, %v446_v41 }
 0x106   :  { %v635_v47 = vsel %vm537_vm5, %v342_v37, %v586_v43  ;;  %v1063_v48 = vpack.c.bf16 %v660_v45, %v660_v45 }
 0x107   :  { %881 = vst.msk [vmem:[%s1748_s3] sm:$0xf] %vm880_vm4, %v1037_v44  ;;  %v1038_v49 = vpack.c.bf16 %v635_v47, %v635_v47  ;;  %v346_v50 = vpop.f32.mrb[4].mxu0  ;;  %v661_v51 = vsel %vm563_vm6, %v446_v41, %v612_v46  ;;  %v450_v52 = vpop.f32.mrb[4].mxu1 }
 0x108   :  { %907 = vst.msk [vmem:[%s1748_s3 + $0x68] sm:$0xf] %vm880_vm4, %v1063_v48  ;;  %v347_v53 = vadd.f32 %v1498_v27, %v346_v50  ;;  %v1064_v54 = vpack.c.bf16 %v661_v51, %v661_v51  ;;  %v1120_v55 = vpop.f32.mrb[5].mxu0  ;;  %v451_v56 = vadd.f32 %v1498_v27, %v450_v52  ;;  %v1172_v57 = vpop.f32.mrb[5].mxu1 }
 0x109   :  { %882 = vst.msk [vmem:[%s1748_s3 + $0x4] sm:$0xf] %vm880_vm4, %v1038_v49  ;;  %v349_v58 = vpop.f32.mrb[6].mxu0  ;;  %v453_v59 = vpop.f32.mrb[6].mxu1 }
 0x10a   :  { %vm538_vm7 = vcmp.ge.f32.partialorder %v347_v53, 0.0  ;;  %v587_v60 = vmul.f32 0.2, %v347_v53  ;;  %908 = vst.msk [vmem:[%s1748_s3 + $0x6c] sm:$0xf] %vm880_vm4, %v1064_v54  ;;  %v350_v61 = vadd.f32 %v1498_v27, %v349_v58  ;;  %v1121_v62 = vpop.f32.mrb[7].mxu0  ;;  %v454_v1 = vadd.f32 %v1498_v27, %v453_v59 }
 0x10b   :  { %vm564_vm8 = vcmp.ge.f32.partialorder %v451_v56, 0.0  ;;  %v1173_v63 = vpop.f32.mrb[7].mxu1  ;;  %v613_v0 = vmul.f32 0.2, %v451_v56 }
 0x10c   :  { %v636_v2 = vsel %vm538_vm7, %v347_v53, %v587_v60  ;;  %vm539_vm9 = vcmp.ge.f32.partialorder %v350_v61, 0.0  ;;  %v588_v3 = vmul.f32 0.2, %v350_v61  ;;  %vm565_vm10 = vcmp.ge.f32.partialorder %v454_v1, 0.0 }
 0x10d   :  { %v1039_v4 = vpack.c.bf16 %v636_v2, %v636_v2  ;;  %v662_v5 = vsel %vm564_vm8, %v451_v56, %v613_v0  ;;  %v614_v6 = vmul.f32 0.2, %v454_v1 }
 0x10e   :  { %v637_v7 = vsel %vm539_vm9, %v350_v61, %v588_v3  ;;  %v1065_v8 = vpack.c.bf16 %v662_v5, %v662_v5 }
 0x10f   :  { %883 = vst.msk [vmem:[%s1748_s3 + $0x8] sm:$0xf] %vm880_vm4, %v1039_v4  ;;  %v1040_v9 = vpack.c.bf16 %v637_v7, %v637_v7  ;;  %v354_v10 = vpop.f32.mrb[8].mxu0  ;;  %v663_v11 = vsel %vm565_vm10, %v454_v1, %v614_v6  ;;  %v458_v12 = vpop.f32.mrb[8].mxu1 }
 0x110   :  { %909 = vst.msk [vmem:[%s1748_s3 + $0x70] sm:$0xf] %vm880_vm4, %v1065_v8  ;;  %v355_v13 = vadd.f32 %v1498_v27, %v354_v10  ;;  %v1066_v14 = vpack.c.bf16 %v663_v11, %v663_v11  ;;  %v1124_v15 = vpop.f32.mrb[9].mxu0  ;;  %v459_v16 = vadd.f32 %v1498_v27, %v458_v12  ;;  %v1176_v17 = vpop.f32.mrb[9].mxu1 }
 0x111   :  { %884 = vst.msk [vmem:[%s1748_s3 + $0xc] sm:$0xf] %vm880_vm4, %v1040_v9  ;;  %v357_v18 = vpop.f32.mrb[10].mxu0  ;;  %v461_v19 = vpop.f32.mrb[10].mxu1 }
 0x112   :  { %vm540_vm11 = vcmp.ge.f32.partialorder %v355_v13, 0.0  ;;  %v589_v20 = vmul.f32 0.2, %v355_v13  ;;  %910 = vst.msk [vmem:[%s1748_s3 + $0x74] sm:$0xf] %vm880_vm4, %v1066_v14  ;;  %v358_v21 = vadd.f32 %v1498_v27, %v357_v18  ;;  %v1125_v22 = vpop.f32.mrb[11].mxu0  ;;  %v462_v25 = vadd.f32 %v1498_v27, %v461_v19 }
 0x113   :  { %vm566_vm12 = vcmp.ge.f32.partialorder %v459_v16, 0.0  ;;  %v1177_v23 = vpop.f32.mrb[11].mxu1  ;;  %v615_v24 = vmul.f32 0.2, %v459_v16 }
 0x114   :  { %v638_v26 = vsel %vm540_vm11, %v355_v13, %v589_v20  ;;  %vm541_vm13 = vcmp.ge.f32.partialorder %v358_v21, 0.0  ;;  %v590_v28 = vmul.f32 0.2, %v358_v21  ;;  %vm567_vm14 = vcmp.ge.f32.partialorder %v462_v25, 0.0 }
 0x115   :  { %v1041_v29 = vpack.c.bf16 %v638_v26, %v638_v26  ;;  %v664_v30 = vsel %vm566_vm12, %v459_v16, %v615_v24  ;;  %v616_v31 = vmul.f32 0.2, %v462_v25 }
 0x116   :  { %v639_v32 = vsel %vm541_vm13, %v358_v21, %v590_v28  ;;  %v1067_v33 = vpack.c.bf16 %v664_v30, %v664_v30 }
 0x117   :  { %885 = vst.msk [vmem:[%s1748_s3 + $0x10] sm:$0xf] %vm880_vm4, %v1041_v29  ;;  %v1042_v34 = vpack.c.bf16 %v639_v32, %v639_v32  ;;  %v362_v35 = vpop.f32.mrb[12].mxu0  ;;  %v665_v36 = vsel %vm567_vm14, %v462_v25, %v616_v31  ;;  %v466_v37 = vpop.f32.mrb[12].mxu1 }
 0x118   :  { %911 = vst.msk [vmem:[%s1748_s3 + $0x78] sm:$0xf] %vm880_vm4, %v1067_v33  ;;  %v363_v38 = vadd.f32 %v1498_v27, %v362_v35  ;;  %v1068_v39 = vpack.c.bf16 %v665_v36, %v665_v36  ;;  %v1128_v40 = vpop.f32.mrb[13].mxu0  ;;  %v467_v41 = vadd.f32 %v1498_v27, %v466_v37  ;;  %v1180_v42 = vpop.f32.mrb[13].mxu1 }
 0x119   :  { %886 = vst.msk [vmem:[%s1748_s3 + $0x14] sm:$0xf] %vm880_vm4, %v1042_v34  ;;  %v365_v43 = vpop.f32.mrb[14].mxu0  ;;  %v469_v44 = vpop.f32.mrb[14].mxu1 }
 0x11a   :  { %vm542_vm15 = vcmp.ge.f32.partialorder %v363_v38, 0.0  ;;  %v591_v45 = vmul.f32 0.2, %v363_v38  ;;  %912 = vst.msk [vmem:[%s1748_s3 + $0x7c] sm:$0xf] %vm880_vm4, %v1068_v39  ;;  %v366_v46 = vadd.f32 %v1498_v27, %v365_v43  ;;  %v1129_v47 = vpop.f32.mrb[15].mxu0  ;;  %v470_v50 = vadd.f32 %v1498_v27, %v469_v44 }
 0x11b   :  { %vm568_vm0 = vcmp.ge.f32.partialorder %v467_v41, 0.0  ;;  %v1181_v48 = vpop.f32.mrb[15].mxu1  ;;  %v617_v49 = vmul.f32 0.2, %v467_v41 }
 0x11c   :  { %v640_v51 = vsel %vm542_vm15, %v363_v38, %v591_v45  ;;  %vm543_vm1 = vcmp.ge.f32.partialorder %v366_v46, 0.0  ;;  %v592_v52 = vmul.f32 0.2, %v366_v46  ;;  %vm569_vm2 = vcmp.ge.f32.partialorder %v470_v50, 0.0 }
 0x11d   :  { %v1043_v53 = vpack.c.bf16 %v640_v51, %v640_v51  ;;  %v666_v54 = vsel %vm568_vm0, %v467_v41, %v617_v49  ;;  %v618_v55 = vmul.f32 0.2, %v470_v50 }
 0x11e   :  { %v641_v56 = vsel %vm543_vm1, %v366_v46, %v592_v52  ;;  %v1069_v57 = vpack.c.bf16 %v666_v54, %v666_v54 }
 0x11f   :  { %887 = vst.msk [vmem:[%s1748_s3 + $0x18] sm:$0xf] %vm880_vm4, %v1043_v53  ;;  %v1044_v58 = vpack.c.bf16 %v641_v56, %v641_v56  ;;  %v370_v59 = vpop.f32.mrb[16].mxu0  ;;  %v667_v60 = vsel %vm569_vm2, %v470_v50, %v618_v55  ;;  %v474_v61 = vpop.f32.mrb[16].mxu1 }
 0x120   :  { %913 = vst.msk [vmem:[%s1748_s3 + $0x80] sm:$0xf] %vm880_vm4, %v1069_v57  ;;  %v371_v62 = vadd.f32 %v1498_v27, %v370_v59  ;;  %v1070_v63 = vpack.c.bf16 %v667_v60, %v667_v60  ;;  %v1132_v0 = vpop.f32.mrb[17].mxu0  ;;  %v475_v1 = vadd.f32 %v1498_v27, %v474_v61  ;;  %v1184_v2 = vpop.f32.mrb[17].mxu1 }
 0x121   :  { %888 = vst.msk [vmem:[%s1748_s3 + $0x1c] sm:$0xf] %vm880_vm4, %v1044_v58  ;;  %v373_v3 = vpop.f32.mrb[18].mxu0  ;;  %v477_v4 = vpop.f32.mrb[18].mxu1 }
 0x122   :  { %vm544_vm3 = vcmp.ge.f32.partialorder %v371_v62, 0.0  ;;  %v593_v5 = vmul.f32 0.2, %v371_v62  ;;  %914 = vst.msk [vmem:[%s1748_s3 + $0x84] sm:$0xf] %vm880_vm4, %v1070_v63  ;;  %v374_v6 = vadd.f32 %v1498_v27, %v373_v3  ;;  %v1133_v7 = vpop.f32.mrb[19].mxu0  ;;  %v478_v10 = vadd.f32 %v1498_v27, %v477_v4 }
 0x123   :  { %vm570_vm5 = vcmp.ge.f32.partialorder %v475_v1, 0.0  ;;  %v1185_v8 = vpop.f32.mrb[19].mxu1  ;;  %v619_v9 = vmul.f32 0.2, %v475_v1 }
 0x124   :  { %v642_v11 = vsel %vm544_vm3, %v371_v62, %v593_v5  ;;  %vm545_vm6 = vcmp.ge.f32.partialorder %v374_v6, 0.0  ;;  %v594_v12 = vmul.f32 0.2, %v374_v6  ;;  %vm571_vm7 = vcmp.ge.f32.partialorder %v478_v10, 0.0 }
 0x125   :  { %v1045_v13 = vpack.c.bf16 %v642_v11, %v642_v11  ;;  %v668_v14 = vsel %vm570_vm5, %v475_v1, %v619_v9  ;;  %v620_v15 = vmul.f32 0.2, %v478_v10 }
 0x126   :  { %v643_v16 = vsel %vm545_vm6, %v374_v6, %v594_v12  ;;  %v1071_v17 = vpack.c.bf16 %v668_v14, %v668_v14 }
 0x127   :  { %889 = vst.msk [vmem:[%s1748_s3 + $0x20] sm:$0xf] %vm880_vm4, %v1045_v13  ;;  %v1046_v18 = vpack.c.bf16 %v643_v16, %v643_v16  ;;  %v378_v19 = vpop.f32.mrb[20].mxu0  ;;  %v669_v20 = vsel %vm571_vm7, %v478_v10, %v620_v15  ;;  %v482_v21 = vpop.f32.mrb[20].mxu1 }
 0x128   :  { %915 = vst.msk [vmem:[%s1748_s3 + $0x88] sm:$0xf] %vm880_vm4, %v1071_v17  ;;  %v379_v22 = vadd.f32 %v1498_v27, %v378_v19  ;;  %v1072_v23 = vpack.c.bf16 %v669_v20, %v669_v20  ;;  %v1136_v24 = vpop.f32.mrb[21].mxu0  ;;  %v483_v25 = vadd.f32 %v1498_v27, %v482_v21  ;;  %v1188_v26 = vpop.f32.mrb[21].mxu1 }
 0x129   :  { %890 = vst.msk [vmem:[%s1748_s3 + $0x24] sm:$0xf] %vm880_vm4, %v1046_v18  ;;  %v381_v28 = vpop.f32.mrb[22].mxu0  ;;  %v485_v29 = vpop.f32.mrb[22].mxu1 }
 0x12a   :  { %vm546_vm8 = vcmp.ge.f32.partialorder %v379_v22, 0.0  ;;  %v595_v30 = vmul.f32 0.2, %v379_v22  ;;  %916 = vst.msk [vmem:[%s1748_s3 + $0x8c] sm:$0xf] %vm880_vm4, %v1072_v23  ;;  %v382_v31 = vadd.f32 %v1498_v27, %v381_v28  ;;  %v1137_v32 = vpop.f32.mrb[23].mxu0  ;;  %v486_v35 = vadd.f32 %v1498_v27, %v485_v29 }
 0x12b   :  { %vm572_vm9 = vcmp.ge.f32.partialorder %v483_v25, 0.0  ;;  %v1189_v33 = vpop.f32.mrb[23].mxu1  ;;  %v621_v34 = vmul.f32 0.2, %v483_v25 }
 0x12c   :  { %v644_v36 = vsel %vm546_vm8, %v379_v22, %v595_v30  ;;  %vm547_vm10 = vcmp.ge.f32.partialorder %v382_v31, 0.0  ;;  %v596_v37 = vmul.f32 0.2, %v382_v31  ;;  %vm573_vm11 = vcmp.ge.f32.partialorder %v486_v35, 0.0 }
 0x12d   :  { %v1047_v38 = vpack.c.bf16 %v644_v36, %v644_v36  ;;  %v670_v39 = vsel %vm572_vm9, %v483_v25, %v621_v34  ;;  %v622_v40 = vmul.f32 0.2, %v486_v35 }
 0x12e   :  { %v645_v41 = vsel %vm547_vm10, %v382_v31, %v596_v37  ;;  %v1073_v42 = vpack.c.bf16 %v670_v39, %v670_v39 }
 0x12f   :  { %891 = vst.msk [vmem:[%s1748_s3 + $0x28] sm:$0xf] %vm880_vm4, %v1047_v38  ;;  %v1048_v43 = vpack.c.bf16 %v645_v41, %v645_v41  ;;  %v386_v44 = vpop.f32.mrb[24].mxu0  ;;  %v671_v45 = vsel %vm573_vm11, %v486_v35, %v622_v40  ;;  %v490_v46 = vpop.f32.mrb[24].mxu1 }
 0x130   :  { %917 = vst.msk [vmem:[%s1748_s3 + $0x90] sm:$0xf] %vm880_vm4, %v1073_v42  ;;  %v387_v47 = vadd.f32 %v1498_v27, %v386_v44  ;;  %v1074_v48 = vpack.c.bf16 %v671_v45, %v671_v45  ;;  %v1140_v49 = vpop.f32.mrb[25].mxu0  ;;  %v491_v50 = vadd.f32 %v1498_v27, %v490_v46  ;;  %v1192_v51 = vpop.f32.mrb[25].mxu1 }
 0x131   :  { %892 = vst.msk [vmem:[%s1748_s3 + $0x2c] sm:$0xf] %vm880_vm4, %v1048_v43  ;;  %v389_v52 = vpop.f32.mrb[26].mxu0  ;;  %v493_v53 = vpop.f32.mrb[26].mxu1 }
 0x132   :  { %vm548_vm12 = vcmp.ge.f32.partialorder %v387_v47, 0.0  ;;  %v597_v54 = vmul.f32 0.2, %v387_v47  ;;  %918 = vst.msk [vmem:[%s1748_s3 + $0x94] sm:$0xf] %vm880_vm4, %v1074_v48  ;;  %v390_v55 = vadd.f32 %v1498_v27, %v389_v52  ;;  %v1141_v56 = vpop.f32.mrb[27].mxu0  ;;  %v494_v59 = vadd.f32 %v1498_v27, %v493_v53 }
 0x133   :  { %vm574_vm13 = vcmp.ge.f32.partialorder %v491_v50, 0.0  ;;  %v1193_v57 = vpop.f32.mrb[27].mxu1  ;;  %v623_v58 = vmul.f32 0.2, %v491_v50 }
 0x134   :  { %v646_v60 = vsel %vm548_vm12, %v387_v47, %v597_v54  ;;  %vm549_vm14 = vcmp.ge.f32.partialorder %v390_v55, 0.0  ;;  %v598_v61 = vmul.f32 0.2, %v390_v55  ;;  %vm575_vm15 = vcmp.ge.f32.partialorder %v494_v59, 0.0 }
 0x135   :  { %v1049_v62 = vpack.c.bf16 %v646_v60, %v646_v60  ;;  %v672_v63 = vsel %vm574_vm13, %v491_v50, %v623_v58  ;;  %v624_v0 = vmul.f32 0.2, %v494_v59 }
 0x136   :  { %v647_v1 = vsel %vm549_vm14, %v390_v55, %v598_v61  ;;  %v1075_v2 = vpack.c.bf16 %v672_v63, %v672_v63 }
 0x137   :  { %893 = vst.msk [vmem:[%s1748_s3 + $0x30] sm:$0xf] %vm880_vm4, %v1049_v62  ;;  %v1050_v3 = vpack.c.bf16 %v647_v1, %v647_v1  ;;  %v394_v4 = vpop.f32.mrb[28].mxu0  ;;  %v673_v5 = vsel %vm575_vm15, %v494_v59, %v624_v0  ;;  %v498_v6 = vpop.f32.mrb[28].mxu1 }
 0x138   :  { %919 = vst.msk [vmem:[%s1748_s3 + $0x98] sm:$0xf] %vm880_vm4, %v1075_v2  ;;  %v395_v7 = vadd.f32 %v1498_v27, %v394_v4  ;;  %v1076_v8 = vpack.c.bf16 %v673_v5, %v673_v5  ;;  %v1144_v9 = vpop.f32.mrb[29].mxu0  ;;  %v499_v10 = vadd.f32 %v1498_v27, %v498_v6  ;;  %v1196_v11 = vpop.f32.mrb[29].mxu1 }
 0x139   :  { %894 = vst.msk [vmem:[%s1748_s3 + $0x34] sm:$0xf] %vm880_vm4, %v1050_v3  ;;  %v397_v12 = vpop.f32.mrb[30].mxu0  ;;  %v501_v13 = vpop.f32.mrb[30].mxu1 }
 0x13a   :  { %vm550_vm0 = vcmp.ge.f32.partialorder %v395_v7, 0.0  ;;  %v599_v14 = vmul.f32 0.2, %v395_v7  ;;  %920 = vst.msk [vmem:[%s1748_s3 + $0x9c] sm:$0xf] %vm880_vm4, %v1076_v8  ;;  %v398_v15 = vadd.f32 %v1498_v27, %v397_v12  ;;  %v1145_v16 = vpop.f32.mrb[31].mxu0  ;;  %v502_v19 = vadd.f32 %v1498_v27, %v501_v13 }
 0x13b   :  { %vm576_vm1 = vcmp.ge.f32.partialorder %v499_v10, 0.0  ;;  %v1197_v17 = vpop.f32.mrb[31].mxu1  ;;  %v625_v18 = vmul.f32 0.2, %v499_v10 }
 0x13c   :  { %v648_v20 = vsel %vm550_vm0, %v395_v7, %v599_v14  ;;  %vm551_vm2 = vcmp.ge.f32.partialorder %v398_v15, 0.0  ;;  %v600_v21 = vmul.f32 0.2, %v398_v15  ;;  %vm577_vm3 = vcmp.ge.f32.partialorder %v502_v19, 0.0 }
 0x13d   :  { %v1051_v22 = vpack.c.bf16 %v648_v20, %v648_v20  ;;  %v674_v23 = vsel %vm576_vm1, %v499_v10, %v625_v18  ;;  %v626_v24 = vmul.f32 0.2, %v502_v19 }
 0x13e   :  { %v649_v25 = vsel %vm551_vm2, %v398_v15, %v600_v21  ;;  %v1077_v26 = vpack.c.bf16 %v674_v23, %v674_v23 }
 0x13f   :  { %895 = vst.msk [vmem:[%s1748_s3 + $0x38] sm:$0xf] %vm880_vm4, %v1051_v22  ;;  %v1052_v28 = vpack.c.bf16 %v649_v25, %v649_v25  ;;  %v402_v29 = vpop.f32.mrb[32].mxu0  ;;  %v675_v30 = vsel %vm577_vm3, %v502_v19, %v626_v24  ;;  %v506_v31 = vpop.f32.mrb[32].mxu1 }
 0x140   :  { %921 = vst.msk [vmem:[%s1748_s3 + $0xa0] sm:$0xf] %vm880_vm4, %v1077_v26  ;;  %v403_v32 = vadd.f32 %v1498_v27, %v402_v29  ;;  %v1078_v33 = vpack.c.bf16 %v675_v30, %v675_v30  ;;  %v1148_v34 = vpop.f32.mrb[33].mxu0  ;;  %v507_v35 = vadd.f32 %v1498_v27, %v506_v31  ;;  %v1200_v36 = vpop.f32.mrb[33].mxu1 }
 0x141   :  { %896 = vst.msk [vmem:[%s1748_s3 + $0x3c] sm:$0xf] %vm880_vm4, %v1052_v28  ;;  %v405_v37 = vpop.f32.mrb[34].mxu0  ;;  %v509_v38 = vpop.f32.mrb[34].mxu1 }
 0x142   :  { %vm552_vm5 = vcmp.ge.f32.partialorder %v403_v32, 0.0  ;;  %v601_v39 = vmul.f32 0.2, %v403_v32  ;;  %922 = vst.msk [vmem:[%s1748_s3 + $0xa4] sm:$0xf] %vm880_vm4, %v1078_v33  ;;  %v406_v40 = vadd.f32 %v1498_v27, %v405_v37  ;;  %v1149_v41 = vpop.f32.mrb[35].mxu0  ;;  %v510_v44 = vadd.f32 %v1498_v27, %v509_v38 }
 0x143   :  { %vm578_vm6 = vcmp.ge.f32.partialorder %v507_v35, 0.0  ;;  %v1201_v42 = vpop.f32.mrb[35].mxu1  ;;  %v627_v43 = vmul.f32 0.2, %v507_v35 }
 0x144   :  { %v650_v45 = vsel %vm552_vm5, %v403_v32, %v601_v39  ;;  %vm553_vm7 = vcmp.ge.f32.partialorder %v406_v40, 0.0  ;;  %v602_v46 = vmul.f32 0.2, %v406_v40  ;;  %vm579_vm8 = vcmp.ge.f32.partialorder %v510_v44, 0.0 }
 0x145   :  { %v1053_v47 = vpack.c.bf16 %v650_v45, %v650_v45  ;;  %v676_v48 = vsel %vm578_vm6, %v507_v35, %v627_v43  ;;  %v628_v49 = vmul.f32 0.2, %v510_v44 }
 0x146   :  { %v651_v50 = vsel %vm553_vm7, %v406_v40, %v602_v46  ;;  %v1079_v51 = vpack.c.bf16 %v676_v48, %v676_v48 }
 0x147   :  { %897 = vst.msk [vmem:[%s1748_s3 + $0x40] sm:$0xf] %vm880_vm4, %v1053_v47  ;;  %v1054_v52 = vpack.c.bf16 %v651_v50, %v651_v50  ;;  %v410_v53 = vpop.f32.mrb[36].mxu0  ;;  %v677_v54 = vsel %vm579_vm8, %v510_v44, %v628_v49  ;;  %v514_v55 = vpop.f32.mrb[36].mxu1 }
 0x148   :  { %923 = vst.msk [vmem:[%s1748_s3 + $0xa8] sm:$0xf] %vm880_vm4, %v1079_v51  ;;  %v411_v56 = vadd.f32 %v1498_v27, %v410_v53  ;;  %v1080_v57 = vpack.c.bf16 %v677_v54, %v677_v54  ;;  %v1152_v58 = vpop.f32.mrb[37].mxu0  ;;  %v515_v59 = vadd.f32 %v1498_v27, %v514_v55  ;;  %v1204_v60 = vpop.f32.mrb[37].mxu1 }
 0x149   :  { %898 = vst.msk [vmem:[%s1748_s3 + $0x44] sm:$0xf] %vm880_vm4, %v1054_v52  ;;  %v413_v61 = vpop.f32.mrb[38].mxu0  ;;  %v517_v62 = vpop.f32.mrb[38].mxu1 }
 0x14a   :  { %vm554_vm9 = vcmp.ge.f32.partialorder %v411_v56, 0.0  ;;  %v603_v63 = vmul.f32 0.2, %v411_v56  ;;  %924 = vst.msk [vmem:[%s1748_s3 + $0xac] sm:$0xf] %vm880_vm4, %v1080_v57  ;;  %v414_v0 = vadd.f32 %v1498_v27, %v413_v61  ;;  %v1153_v1 = vpop.f32.mrb[39].mxu0  ;;  %v518_v4 = vadd.f32 %v1498_v27, %v517_v62 }
 0x14b   :  { %vm580_vm10 = vcmp.ge.f32.partialorder %v515_v59, 0.0  ;;  %v1205_v2 = vpop.f32.mrb[39].mxu1  ;;  %v629_v3 = vmul.f32 0.2, %v515_v59 }
 0x14c   :  { %v652_v5 = vsel %vm554_vm9, %v411_v56, %v603_v63  ;;  %vm555_vm11 = vcmp.ge.f32.partialorder %v414_v0, 0.0  ;;  %v604_v6 = vmul.f32 0.2, %v414_v0  ;;  %vm581_vm12 = vcmp.ge.f32.partialorder %v518_v4, 0.0 }
 0x14d   :  { %v1055_v7 = vpack.c.bf16 %v652_v5, %v652_v5  ;;  %v678_v8 = vsel %vm580_vm10, %v515_v59, %v629_v3  ;;  %v630_v9 = vmul.f32 0.2, %v518_v4 }
 0x14e   :  { %v653_v10 = vsel %vm555_vm11, %v414_v0, %v604_v6  ;;  %v1081_v11 = vpack.c.bf16 %v678_v8, %v678_v8 }
 0x14f   :  { %899 = vst.msk [vmem:[%s1748_s3 + $0x48] sm:$0xf] %vm880_vm4, %v1055_v7  ;;  %v1056_v12 = vpack.c.bf16 %v653_v10, %v653_v10  ;;  %v418_v13 = vpop.f32.mrb[40].mxu0  ;;  %v679_v14 = vsel %vm581_vm12, %v518_v4, %v630_v9  ;;  %v522_v15 = vpop.f32.mrb[40].mxu1 }
 0x150   :  { %925 = vst.msk [vmem:[%s1748_s3 + $0xb0] sm:$0xf] %vm880_vm4, %v1081_v11  ;;  %v419_v16 = vadd.f32 %v1498_v27, %v418_v13  ;;  %v1082_v17 = vpack.c.bf16 %v679_v14, %v679_v14  ;;  %v1156_v18 = vpop.f32.mrb[41].mxu0  ;;  %v523_v19 = vadd.f32 %v1498_v27, %v522_v15  ;;  %v1208_v20 = vpop.f32.mrb[41].mxu1 }
 0x151   :  { %900 = vst.msk [vmem:[%s1748_s3 + $0x4c] sm:$0xf] %vm880_vm4, %v1056_v12  ;;  %v421_v21 = vpop.f32.mrb[42].mxu0  ;;  %v525_v22 = vpop.f32.mrb[42].mxu1 }
 0x152   :  { %vm556_vm13 = vcmp.ge.f32.partialorder %v419_v16, 0.0  ;;  %v605_v23 = vmul.f32 0.2, %v419_v16  ;;  %926 = vst.msk [vmem:[%s1748_s3 + $0xb4] sm:$0xf] %vm880_vm4, %v1082_v17  ;;  %v422_v24 = vadd.f32 %v1498_v27, %v421_v21  ;;  %v1157_v25 = vpop.f32.mrb[43].mxu0  ;;  %v526_v29 = vadd.f32 %v1498_v27, %v525_v22 }
 0x153   :  { %vm582_vm14 = vcmp.ge.f32.partialorder %v523_v19, 0.0  ;;  %v1209_v26 = vpop.f32.mrb[43].mxu1  ;;  %v631_v28 = vmul.f32 0.2, %v523_v19 }
 0x154   :  { %v654_v30 = vsel %vm556_vm13, %v419_v16, %v605_v23  ;;  %vm557_vm15 = vcmp.ge.f32.partialorder %v422_v24, 0.0  ;;  %v606_v31 = vmul.f32 0.2, %v422_v24  ;;  %vm583_vm0 = vcmp.ge.f32.partialorder %v526_v29, 0.0 }
 0x155   :  { %v1057_v32 = vpack.c.bf16 %v654_v30, %v654_v30  ;;  %v680_v33 = vsel %vm582_vm14, %v523_v19, %v631_v28  ;;  %v632_v34 = vmul.f32 0.2, %v526_v29 }
 0x156   :  { %v655_v35 = vsel %vm557_vm15, %v422_v24, %v606_v31  ;;  %v1083_v36 = vpack.c.bf16 %v680_v33, %v680_v33 }
 0x157   :  { %901 = vst.msk [vmem:[%s1748_s3 + $0x50] sm:$0xf] %vm880_vm4, %v1057_v32  ;;  %v1058_v37 = vpack.c.bf16 %v655_v35, %v655_v35  ;;  %v426_v38 = vpop.f32.mrb[44].mxu0  ;;  %v681_v39 = vsel %vm583_vm0, %v526_v29, %v632_v34  ;;  %v530_v40 = vpop.f32.mrb[44].mxu1 }
 0x158   :  { %927 = vst.msk [vmem:[%s1748_s3 + $0xb8] sm:$0xf] %vm880_vm4, %v1083_v36  ;;  %v427_v41 = vadd.f32 %v1498_v27, %v426_v38  ;;  %v1084_v42 = vpack.c.bf16 %v681_v39, %v681_v39  ;;  %v1160_v43 = vpop.f32.mrb[45].mxu0  ;;  %v531_v44 = vadd.f32 %v1498_v27, %v530_v40  ;;  %v1212_v45 = vpop.f32.mrb[45].mxu1 }
 0x159   :  { %902 = vst.msk [vmem:[%s1748_s3 + $0x54] sm:$0xf] %vm880_vm4, %v1058_v37  ;;  %v429_v46 = vpop.f32.mrb[46].mxu0  ;;  %v533_v47 = vpop.f32.mrb[46].mxu1 }
 0x15a   :  { %vm558_vm1 = vcmp.ge.f32.partialorder %v427_v41, 0.0  ;;  %v607_v48 = vmul.f32 0.2, %v427_v41  ;;  %928 = vst.msk [vmem:[%s1748_s3 + $0xbc] sm:$0xf] %vm880_vm4, %v1084_v42  ;;  %v430_v49 = vadd.f32 %v1498_v27, %v429_v46  ;;  %v1161_v50 = vpop.f32.mrb[47].mxu0 }
 0x15b   :  { %vm584_vm2 = vcmp.ge.f32.partialorder %v531_v44, 0.0  ;;  %v1213_v51 = vpop.f32.mrb[47].mxu1  ;;  %v633_v52 = vmul.f32 0.2, %v531_v44 }
 0x15c   :  { %v656_v53 = vsel %vm558_vm1, %v427_v41, %v607_v48  ;;  %vm559_vm3 = vcmp.ge.f32.partialorder %v430_v49, 0.0  ;;  %v608_v54 = vmul.f32 0.2, %v430_v49 }
 0x15d   :  { %v1059_v55 = vpack.c.bf16 %v656_v53, %v656_v53  ;;  %v682_v56 = vsel %vm584_vm2, %v531_v44, %v633_v52 }
 0x15e   :  { %v657_v57 = vsel %vm559_vm3, %v430_v49, %v608_v54  ;;  %v1085_v58 = vpack.c.bf16 %v682_v56, %v682_v56 }
 0x15f   :  { %903 = vst.msk [vmem:[%s1748_s3 + $0x58] sm:$0xf] %vm880_vm4, %v1059_v55  ;;  %v1060_v59 = vpack.c.bf16 %v657_v57, %v657_v57  ;;  %v434_v60 = vpop.f32.mrb[48].mxu0 }
 0x160   :  { %929 = vst.msk [vmem:[%s1748_s3 + $0xc0] sm:$0xf] %vm880_vm4, %v1085_v58  ;;  %v435_v61 = vadd.f32 %v1498_v27, %v434_v60  ;;  %v1164_v62 = vpop.f32.mrb[49].mxu0 }
 0x161   :  { %904 = vst.msk [vmem:[%s1748_s3 + $0x5c] sm:$0xf] %vm880_vm4, %v1060_v59  ;;  %v437_v63 = vpop.f32.mrb[50].mxu0 }
 0x162   :  { %vm560_vm5 = vcmp.ge.f32.partialorder %v435_v61, 0.0  ;;  %v609_v0 = vmul.f32 0.2, %v435_v61  ;;  %v438_v1 = vadd.f32 %v1498_v27, %v437_v63  ;;  %v1165_v2 = vpop.f32.mrb[51].mxu0 }
 0x164   :  { %v658_v3 = vsel %vm560_vm5, %v435_v61, %v609_v0  ;;  %vm561_vm6 = vcmp.ge.f32.partialorder %v438_v1, 0.0  ;;  %v610_v4 = vmul.f32 0.2, %v438_v1 }
 0x165   :  { %v1061_v5 = vpack.c.bf16 %v658_v3, %v658_v3 }
 0x166   :  { %v659_v6 = vsel %vm561_vm6, %v438_v1, %v610_v4 }
 0x167   :  { %905 = vst.msk [vmem:[%s1748_s3 + $0x60] sm:$0xf] %vm880_vm4, %v1061_v5  ;;  %v1062_v7 = vpack.c.bf16 %v659_v6, %v659_v6 }
 0x169   :  { %906 = vst.msk [vmem:[%s1748_s3 + $0x64] sm:$0xf] %vm880_vm4, %v1062_v7 }
 0x16a   :  { %934 = vsyncpa [#allocation3], 1 }
 0x16b   :  { %935 = vsyncpa [#allocation5], 1 }

// kernel: discriminator_forward.4
= control target key start
LH: loop header
LB: loop body
LE: loop exit
PB: predicated region body
PF: predicated region fallthrough
CT: control target
= control target key end

     0   :  { %10 = vsyncpa [#allocation3], 0  ;;  %s2353_s0 = inlined_call_operand.vmem [shape: bf16[98,1024], index: 0, kind: input, shape index: {}]   ;;  %s2354_s1 = inlined_call_operand.hbm [shape: bf16[1024,128], index: 1, kind: input, shape index: {}]   ;;  %s2355_s2 = inlined_call_operand.hbm [shape: f32[1,128], index: 2, kind: input, shape index: {}]   ;;  %s2356_s3 = inlined_call_operand.hbm [shape: f32[1,128], index: 3, kind: input, shape index: {}]   ;;  %s2357_s4 = inlined_call_operand.hbm [shape: f32[1,128], index: 4, kind: input, shape index: {}]   ;;  %s2358_s5 = inlined_call_operand.vmem [shape: bf16[98,128], index: 5, kind: output, shape index: {}]  }
   0x1   :  { %11 = vsyncpa [#allocation5], 0 }
   0x2   :  { %12 = vsyncpa [#allocation8], 0  ;;  %s2001_s18 = smov [#allocation4]   ;;  %s2002_s20 = smov [#allocation2]  }
   0x3   :  { %s33_s19 = sshll.u32 %s2001_s18, 4  ;;  %s20_s21 = sshll.u32 %s2002_s20, 4  ;;  %s34_s19 = int_to_ptr.vmem [resolvable:$true] %s33_s19  ;;  %s2037_s21 = int_to_ptr.vmem [resolvable:$true] %s20_s21 }
   0x4   :  { %s1907_s24 = scalar_lea.hbm %s2355_s2, 16 }
   0x5   :  { %p1908_p0 = scmp.ne.s32.totalorder %s2355_s2, %s1907_s24  ;;  %p1911_p1 = scmp.lt.u32.totalorder %s1907_s24, %s2355_s2 }
   0x7   :  { %p1913_p2 = pnand %p1911_p1, %p1908_p0 }
   0x9   :  { %1916 = shalt.err (!%p1913_p2)
}
   0xa   :  { %s1917_s29 = scalar_lea.vmem %s34_s19, 16  ;;  %s1921_s30 = scalar_lea.vmem %s34_s19, 32 }
   0xb   :  { %p1918_p3 = scmp.ne.s32.totalorder %s34_s19, %s1917_s29  ;;  %p1922_p4 = scmp.lt.s32.totalorder %s34_s19, %s34_s19 }
   0xc   :  { %p1923_p5 = scmp.lt.s32.totalorder %s1921_s30, %s1917_s29 }
   0xe   :  { %p1924_p6 = por %p1923_p5, %p1922_p4 }
  0x10   :  { %p1925_p7 = pnand %p1924_p6, %p1918_p3 }
  0x12   :  { %1928 = shalt.err (!%p1925_p7)
}
  0x13   :  { %36 = dma.hbm_to_vmem [thread:$0]  %s2355_s2, 16, %s34_s19, [#allocation5]  }
  0x14   :  { %s1929_s10 = scalar_lea.hbm %s2354_s1, 8192 }
  0x15   :  { %p1930_p8 = scmp.ne.s32.totalorder %s2354_s1, %s1929_s10  ;;  %p1933_p9 = scmp.lt.u32.totalorder %s1929_s10, %s2354_s1 }
  0x17   :  { %p1935_p10 = pnand %p1933_p9, %p1930_p8 }
  0x19   :  { %1938 = shalt.err (!%p1935_p10)
}
  0x1a   :  { %s1939_s15 = scalar_lea.vmem %s2037_s21, 8192  ;;  %p1944_p12 = scmp.lt.s32.totalorder %s2037_s21, %s2037_s21 }
  0x1b   :  { %p1940_p11 = scmp.ne.s32.totalorder %s2037_s21, %s1939_s15  ;;  %p1945_p13 = scmp.lt.s32.totalorder %s1939_s15, %s1939_s15 }
  0x1d   :  { %p1946_p0 = por %p1945_p13, %p1944_p12 }
  0x1f   :  { %p1947_p1 = pnand %p1946_p0, %p1940_p11 }
  0x21   :  { %1950 = shalt.err (!%p1947_p1)
}
  0x22   :  { %s2003_s2 = smov 64   ;;  %s2004_s16 = smov 4  }
  0x23   :  { %26 = dma.hbm_to_vmem [thread:$0]  %s2354_s1, 8192, %s2037_s21, [#allocation3], %s2003_s2, %s2003_s2, %s2004_s16  }
  0x24   :  { %s2005_s19 = smov [#allocation6]   ;;  %s2006_s22 = smov [#allocation7]  }
  0x25   :  { %s43_s20 = sshll.u32 %s2005_s19, 4  ;;  %s53_s23 = sshll.u32 %s2006_s22, 4  ;;  %s44_s20 = int_to_ptr.vmem [resolvable:$true] %s43_s20  ;;  %s54_s23 = int_to_ptr.vmem [resolvable:$true] %s53_s23 }
  0x26   :  { %s1951_s26 = scalar_lea.hbm %s2356_s3, 16 }
  0x27   :  { %p1952_p2 = scmp.ne.s32.totalorder %s2356_s3, %s1951_s26  ;;  %p1955_p3 = scmp.lt.u32.totalorder %s1951_s26, %s2356_s3 }
  0x29   :  { %p1957_p4 = pnand %p1955_p3, %p1952_p2 }
  0x2b   :  { %1960 = shalt.err (!%p1957_p4)
}
  0x2c   :  { %s1961_s1 = scalar_lea.vmem %s44_s20, 16  ;;  %s1965_s21 = scalar_lea.vmem %s44_s20, 32 }
  0x2d   :  { %p1962_p5 = scmp.ne.s32.totalorder %s44_s20, %s1961_s1  ;;  %p1966_p6 = scmp.lt.s32.totalorder %s44_s20, %s44_s20 }
  0x2e   :  { %p1967_p7 = scmp.lt.s32.totalorder %s1965_s21, %s1961_s1 }
  0x30   :  { %p1968_p8 = por %p1967_p7, %p1966_p6 }
  0x32   :  { %p1969_p9 = pnand %p1968_p8, %p1962_p5 }
  0x34   :  { %1972 = shalt.err (!%p1969_p9)
}
  0x35   :  { %46 = dma.hbm_to_vmem [thread:$0]  %s2356_s3, 16, %s44_s20, [#allocation5]  }
  0x36   :  { %s1973_s10 = scalar_lea.hbm %s2357_s4, 16 }
  0x37   :  { %p1974_p10 = scmp.ne.s32.totalorder %s2357_s4, %s1973_s10  ;;  %p1977_p11 = scmp.lt.u32.totalorder %s1973_s10, %s2357_s4 }
  0x39   :  { %p1979_p12 = pnand %p1977_p11, %p1974_p10 }
  0x3b   :  { %1982 = shalt.err (!%p1979_p12)
}
  0x3c   :  { %s1983_s15 = scalar_lea.vmem %s54_s23, 16  ;;  %s1987_s2 = scalar_lea.vmem %s54_s23, 32 }
  0x3d   :  { %p1984_p13 = scmp.ne.s32.totalorder %s54_s23, %s1983_s15  ;;  %p1988_p0 = scmp.lt.s32.totalorder %s54_s23, %s54_s23 }
  0x3e   :  { %p1989_p1 = scmp.lt.s32.totalorder %s1987_s2, %s1983_s15 }
  0x40   :  { %p1990_p2 = por %p1989_p1, %p1988_p0 }
  0x42   :  { %p1991_p3 = pnand %p1990_p2, %p1984_p13 }
  0x44   :  { %1994 = shalt.err (!%p1991_p3)
}
  0x45   :  { %56 = dma.hbm_to_vmem [thread:$0]  %s2357_s4, 16, %s54_s23, [#allocation8]  }
  0x46   :  { %1995 = dma.done.wait [#allocation3], 8192  }
  0x47   :  { %1996 = vsyncadd [#allocation3], 4294959104 }
  0x48   :  { %1997 = dma.done.wait [#allocation5], 32  }
  0x49   :  { %1998 = vsyncadd [#allocation5], 4294967264 }
  0x4a   :  { %1999 = dma.done.wait [#allocation8], 16  }
  0x4b   :  { %2000 = vsyncadd [#allocation8], 4294967280  ;;  %v1835_v0 = vld [vmem:[#allocation2 + $0x40] sm:$0xff]   ;;  %v1839_v4 = vld [vmem:[#allocation2 + $0x48] sm:$0xff]  }
  0x4c   :  { %v1836_v1 = vld [vmem:[#allocation2 + $0xc0] sm:$0xff]   ;;  %1597 = vmatprep.subr.bf16.mxu0 %v1835_v0  ;;  %v1840_v5 = vld [vmem:[#allocation2 + $0xc8] sm:$0xff]   ;;  %v1843_v8 = vld [vmem:[#allocation2 + $0x50] sm:$0xff]  }
  0x4d   :  { %v1837_v2 = vld [vmem:[#allocation2] sm:$0xff]   ;;  %1655 = vmatprep.subr.bf16.mxu1 %v1836_v1  ;;  %v1841_v6 = vld [vmem:[#allocation2 + $0x8] sm:$0xff]   ;;  %v1844_v9 = vld [vmem:[#allocation2 + $0xd0] sm:$0xff]  }
  0x4e   :  { %v1838_v3 = vld [vmem:[#allocation2 + $0x80] sm:$0xff]   ;;  %1598 = vmatpush3.bf16.msra.mxu0 %v1837_v2  ;;  %v1842_v7 = vld [vmem:[#allocation2 + $0x88] sm:$0xff]   ;;  %v1845_v10 = vld [vmem:[#allocation2 + $0x10] sm:$0xff]  }
  0x4f   :  { %1656 = vmatpush3.bf16.msra.mxu1 %v1838_v3  ;;  %1599 = vmatprep.subr.bf16.mxu0 %v1839_v4  ;;  %v1846_v11 = vld [vmem:[#allocation2 + $0x90] sm:$0xff]   ;;  %v1847_v12 = vld [vmem:[#allocation2 + $0x58] sm:$0xff]   ;;  %v1851_v16 = vld [vmem:[#allocation2 + $0x60] sm:$0xff]  }
  0x50   :  { %1657 = vmatprep.subr.bf16.mxu1 %v1840_v5  ;;  %v1848_v13 = vld [vmem:[#allocation2 + $0xd8] sm:$0xff]   ;;  %v1852_v17 = vld [vmem:[#allocation2 + $0xe0] sm:$0xff]   ;;  %v1855_v20 = vld [vmem:[#allocation2 + $0x68] sm:$0xff]  }
  0x51   :  { %v1849_v14 = vld [vmem:[#allocation2 + $0x18] sm:$0xff]   ;;  %v1853_v18 = vld [vmem:[#allocation2 + $0x20] sm:$0xff]   ;;  %v1856_v21 = vld [vmem:[#allocation2 + $0xe8] sm:$0xff]  }
  0x52   :  { %1600 = vmatpush3.bf16.msra.mxu0 %v1841_v6  ;;  %v1850_v15 = vld [vmem:[#allocation2 + $0x98] sm:$0xff]   ;;  %v1854_v19 = vld [vmem:[#allocation2 + $0xa0] sm:$0xff]   ;;  %v1857_v22 = vld [vmem:[#allocation2 + $0x28] sm:$0xff]  }
  0x53   :  { %1658 = vmatpush3.bf16.msra.mxu1 %v1842_v7  ;;  %1601 = vmatprep.subr.bf16.mxu0 %v1843_v8  ;;  %v1858_v23 = vld [vmem:[#allocation2 + $0xa8] sm:$0xff]   ;;  %v1859_v24 = vld [vmem:[#allocation2 + $0x70] sm:$0xff]   ;;  %v1863_v28 = vld [vmem:[#allocation2 + $0x78] sm:$0xff]  }
  0x54   :  { %1659 = vmatprep.subr.bf16.mxu1 %v1844_v9  ;;  %v1860_v25 = vld [vmem:[#allocation2 + $0xf0] sm:$0xff]   ;;  %v1864_v29 = vld [vmem:[#allocation2 + $0xf8] sm:$0xff]   ;;  %v70_v32 = vld [vmem:[%s2353_s0] sm:$0xff] }
  0x55   :  { %v1861_v26 = vld [vmem:[#allocation2 + $0x30] sm:$0xff]   ;;  %v1865_v30 = vld [vmem:[#allocation2 + $0x38] sm:$0xff]   ;;  %v74_v33 = vld [vmem:[%s2353_s0 + $0x20] sm:$0xff] }
  0x56   :  { %1602 = vmatpush3.bf16.msra.mxu0 %v1845_v10  ;;  %v1862_v27 = vld [vmem:[#allocation2 + $0xb0] sm:$0xff]   ;;  %v1866_v31 = vld [vmem:[#allocation2 + $0xb8] sm:$0xff]   ;;  %v71_v34 = vld [vmem:[%s2353_s0 + $0x8] sm:$0xff]  ;;  %v1414_v35 = vcombine.low %v70_v32, %v74_v33  ;;  %v1415_v36 = vcombine.high %v70_v32, %v74_v33 }
  0x57   :  { %1660 = vmatpush3.bf16.msra.mxu1 %v1846_v11  ;;  %1603 = vmatprep.subr.bf16.mxu0 %v1847_v12  ;;  %v75_v37 = vld [vmem:[%s2353_s0 + $0x28] sm:$0xff]  ;;  %v1867_v40 = vld [vmem:[#allocation2 + $0x140] sm:$0xff]   ;;  %v1875_v56 = vld [vmem:[#allocation2 + $0x150] sm:$0xff]  }
  0x58   :  { %1661 = vmatprep.subr.bf16.mxu1 %v1848_v13  ;;  %v1416_v38 = vcombine.low %v71_v34, %v75_v37  ;;  %v1417_v39 = vcombine.high %v71_v34, %v75_v37  ;;  %941 = vmatprep.mubr.bf16.mxu0 %v1415_v36  ;;  %v1868_v41 = vld [vmem:[#allocation2 + $0x100] sm:$0xff]   ;;  %v79_v47 = vld [vmem:[%s2353_s0 + $0x48] sm:$0xff]  ;;  %v1876_v63 = vld [vmem:[#allocation2 + $0x110] sm:$0xff]  }
  0x59   :  { %v1869_v42 = vld [vmem:[#allocation2 + $0x1c0] sm:$0xff]   ;;  %v83_v48 = vld [vmem:[%s2353_s0 + $0x68] sm:$0xff]  ;;  %v1877_v0 = vld [vmem:[#allocation2 + $0x1d0] sm:$0xff]  }
  0x5a   :  { %1604 = vmatpush3.bf16.msra.mxu0 %v1849_v14  ;;  %1029 = vmatprep.mubr.bf16.mxu1 %v1417_v39  ;;  %v1870_v43 = vld [vmem:[#allocation2 + $0x180] sm:$0xff]   ;;  %v1425_v49 = vcombine.high %v79_v47, %v83_v48  ;;  %v1871_v50 = vld [vmem:[#allocation2 + $0x148] sm:$0xff]   ;;  %v1424_v53 = vcombine.low %v79_v47, %v83_v48  ;;  %v1878_v1 = vld [vmem:[#allocation2 + $0x190] sm:$0xff]  }
  0x5b   :  { %1662 = vmatpush3.bf16.msra.mxu1 %v1850_v15  ;;  %1605 = vmatprep.subr.bf16.mxu0 %v1851_v16  ;;  %v78_v44 = vld [vmem:[%s2353_s0 + $0x40] sm:$0xff]  ;;  %v1872_v52 = vld [vmem:[#allocation2 + $0x108] sm:$0xff]   ;;  %v1879_v3 = vld [vmem:[#allocation2 + $0x158] sm:$0xff]  }
  0x5c   :  { %1663 = vmatprep.subr.bf16.mxu1 %v1852_v17  ;;  %v82_v45 = vld [vmem:[%s2353_s0 + $0x60] sm:$0xff]  ;;  %v1873_v54 = vld [vmem:[#allocation2 + $0x1c8] sm:$0xff]   ;;  %v1880_v5 = vld [vmem:[#allocation2 + $0x118] sm:$0xff]  }
  0x5d   :  { %v1423_v46 = vcombine.high %v78_v44, %v82_v45  ;;  %v1422_v51 = vcombine.low %v78_v44, %v82_v45  ;;  %v1874_v55 = vld [vmem:[#allocation2 + $0x188] sm:$0xff]   ;;  %v86_v57 = vld [vmem:[%s2353_s0 + $0x80] sm:$0xff]  ;;  %v1881_v12 = vld [vmem:[#allocation2 + $0x1d8] sm:$0xff]  }
  0x5e   :  { %1606 = vmatpush3.bf16.msra.mxu0 %v1853_v18  ;;  %v90_v58 = vld [vmem:[%s2353_s0 + $0xa0] sm:$0xff]  ;;  %v87_v59 = vld [vmem:[%s2353_s0 + $0x88] sm:$0xff]  ;;  %v1882_v13 = vld [vmem:[#allocation2 + $0x198] sm:$0xff]  }
  0x5f   :  { %1664 = vmatpush3.bf16.msra.mxu1 %v1854_v19  ;;  %1607 = vmatprep.subr.bf16.mxu0 %v1855_v20  ;;  %v91_v60 = vld [vmem:[%s2353_s0 + $0xa8] sm:$0xff]  ;;  %v1431_v61 = vcombine.high %v86_v57, %v90_v58  ;;  %v1430_v2 = vcombine.low %v86_v57, %v90_v58  ;;  %v94_v6 = vld [vmem:[%s2353_s0 + $0xc0] sm:$0xff]  ;;  %v1899_v44 = vld [vmem:[#allocation2 + $0x178] sm:$0xff]  }
  0x60   :  { %1665 = vmatprep.subr.bf16.mxu1 %v1856_v21  ;;  %v1433_v62 = vcombine.high %v87_v59, %v91_v60  ;;  %v1432_v4 = vcombine.low %v87_v59, %v91_v60  ;;  %v98_v7 = vld [vmem:[%s2353_s0 + $0xe0] sm:$0xff]  ;;  %v95_v8 = vld [vmem:[%s2353_s0 + $0xc8] sm:$0xff]  ;;  %v1900_v45 = vld [vmem:[#allocation2 + $0x138] sm:$0xff]  }
  0x61   :  { %v1439_v9 = vcombine.high %v94_v6, %v98_v7  ;;  %v99_v10 = vld [vmem:[%s2353_s0 + $0xe8] sm:$0xff]  ;;  %v1883_v14 = vld [vmem:[#allocation2 + $0x160] sm:$0xff]   ;;  %v1438_v16 = vcombine.low %v94_v6, %v98_v7  ;;  %v1902_v48 = vld [vmem:[#allocation2 + $0x1b8] sm:$0xff]  }
  0x62   :  { %1608 = vmatpush3.bf16.msra.mxu0 %v1857_v22  ;;  %v1441_v11 = vcombine.high %v95_v8, %v99_v10  ;;  %v1884_v15 = vld [vmem:[#allocation2 + $0x120] sm:$0xff]   ;;  %v1440_v20 = vcombine.low %v95_v8, %v99_v10  ;;  %v103_v22 = vld [vmem:[%s2353_s0 + $0x108] sm:$0xff]  ;;  %v80_v60 = vld [vmem:[%s2353_s0 + $0x50] sm:$0xff] }
  0x63   :  { %1666 = vmatpush3.bf16.msra.mxu1 %v1858_v23  ;;  %1609 = vmatprep.subr.bf16.mxu0 %v1859_v24  ;;  %v1885_v17 = vld [vmem:[#allocation2 + $0x1e0] sm:$0xff]   ;;  %v107_v23 = vld [vmem:[%s2353_s0 + $0x128] sm:$0xff]  ;;  %v89_v6 = vld [vmem:[%s2353_s0 + $0x98] sm:$0xff] }
  0x64   :  { %1667 = vmatprep.subr.bf16.mxu1 %v1860_v25  ;;  %v102_v18 = vld [vmem:[%s2353_s0 + $0x100] sm:$0xff]  ;;  %v1449_v24 = vcombine.high %v103_v22, %v107_v23  ;;  %v111_v32 = vld [vmem:[%s2353_s0 + $0x148] sm:$0xff]  ;;  %v1448_v36 = vcombine.low %v103_v22, %v107_v23  ;;  %v93_v7 = vld [vmem:[%s2353_s0 + $0xb8] sm:$0xff] }
  0x65   :  { %v106_v19 = vld [vmem:[%s2353_s0 + $0x120] sm:$0xff]  ;;  %v115_v33 = vld [vmem:[%s2353_s0 + $0x168] sm:$0xff]  ;;  %v105_v22 = vld [vmem:[%s2353_s0 + $0x118] sm:$0xff] }
  0x66   :  { %1610 = vmatpush3.bf16.msra.mxu0 %v1861_v26  ;;  %v1447_v21 = vcombine.high %v102_v18, %v106_v19  ;;  %v1886_v25 = vld [vmem:[#allocation2 + $0x1a0] sm:$0xff]   ;;  %v1887_v26 = vld [vmem:[#allocation2 + $0x168] sm:$0xff]   ;;  %v1446_v34 = vcombine.low %v102_v18, %v106_v19  ;;  %v1457_v39 = vcombine.high %v111_v32, %v115_v33  ;;  %v109_v23 = vld [vmem:[%s2353_s0 + $0x138] sm:$0xff] }
  0x67   :  { %1668 = vmatpush3.bf16.msra.mxu1 %v1862_v27  ;;  %1611 = vmatprep.subr.bf16.mxu0 %v1863_v28  ;;  %v1888_v27 = vld [vmem:[#allocation2 + $0x128] sm:$0xff]  }
  0x68   :  { %1669 = vmatprep.subr.bf16.mxu1 %v1864_v29  ;;  %v1889_v28 = vld [vmem:[#allocation2 + $0x1e8] sm:$0xff]  }
  0x69   :  { %v1890_v29 = vld [vmem:[#allocation2 + $0x1a8] sm:$0xff]  }
  0x6a   :  { %1612 = vmatpush3.bf16.msra.mxu0 %v1865_v30  ;;  %v110_v30 = vld [vmem:[%s2353_s0 + $0x140] sm:$0xff] }
  0x6b   :  { %1670 = vmatpush3.bf16.msra.mxu1 %v1866_v31  ;;  %1713 = vmatprep.subr.bf16.mxu0 %v1867_v40  ;;  %v114_v31 = vld [vmem:[%s2353_s0 + $0x160] sm:$0xff]  ;;  %v1893_v40 = vld [vmem:[#allocation2 + $0x1f0] sm:$0xff]  }
  0x6c   :  { %1771 = vmatprep.subr.bf16.mxu1 %v1869_v42  ;;  %v1455_v37 = vcombine.high %v110_v30, %v114_v31  ;;  %v118_v42 = vld [vmem:[%s2353_s0 + $0x180] sm:$0x11]  ;;  %v1454_v47 = vcombine.low %v110_v30, %v114_v31  ;;  %v113_v30 = vld [vmem:[%s2353_s0 + $0x158] sm:$0xff] }
  0x6d   :  { %942 = vmatmul.mubr.bf16.vlgmr.msra.gmra.mrb[0].mxu0 %v1414_v35  ;;  %v1891_v35 = vld [vmem:[#allocation2 + $0x170] sm:$0xff]   ;;  %v117_v31 = vld [vmem:[%s2353_s0 + $0x178] sm:$0xff] }
  0x6e   :  { %1030 = vmatmul.mubr.bf16.vlgmr.msra.gmra.mrb[0].mxu1 %v1416_v38  ;;  %1714 = vmatpush3.bf16.msra.mxu0 %v1868_v41  ;;  %v1892_v38 = vld [vmem:[#allocation2 + $0x130] sm:$0xff]  }
  0x6f   :  { %1772 = vmatpush3.bf16.msra.mxu1 %v1870_v43  ;;  %949 = vmatprep.mubr.bf16.mxu0 %v1423_v46  ;;  %v1894_v41 = vld [vmem:[#allocation2 + $0x1b0] sm:$0xff]   ;;  %v119_v43 = vld [vmem:[%s2353_s0 + $0x188] sm:$0x11]  ;;  %v1901_v46 = vld [vmem:[#allocation2 + $0x1f8] sm:$0xff]  }
  0x70   :  { %1037 = vmatprep.mubr.bf16.mxu1 %v1425_v49  ;;  %1715 = vmatprep.subr.bf16.mxu0 %v1871_v50  ;;  %v1456_v49 = vcombine.low %v111_v32, %v115_v33  ;;  %v1463_v50 = vcombine.high %v118_v42, %v118_v42  ;;  %v1464_v57 = vcombine.low %v119_v43, %v119_v43 }
  0x71   :  { %1773 = vmatprep.subr.bf16.mxu1 %v1873_v54  ;;  %v73_v54 = vld [vmem:[%s2353_s0 + $0x18] sm:$0xff]  ;;  %v1452_v33 = vcombine.low %v105_v22, %v109_v23 }
  0x72   :  { %1716 = vmatpush3.bf16.msra.mxu0 %v1872_v52  ;;  %v72_v52 = vld [vmem:[%s2353_s0 + $0x10] sm:$0xff] }
  0x73   :  { %1774 = vmatpush3.bf16.msra.mxu1 %v1874_v55  ;;  %1717 = vmatprep.subr.bf16.mxu0 %v1875_v56  ;;  %v77_v55 = vld [vmem:[%s2353_s0 + $0x38] sm:$0xff]  ;;  %v1462_v56 = vcombine.low %v118_v42, %v118_v42 }
  0x74   :  { %1775 = vmatprep.subr.bf16.mxu1 %v1877_v0  ;;  %v1421_v59 = vcombine.high %v73_v54, %v77_v55 }
  0x75   :  { %950 = vmatmul.mubr.bf16.gmra.mrb[4].mxu0 %v1422_v51  ;;  %v1465_v51 = vcombine.high %v119_v43, %v119_v43 }
  0x76   :  { %1038 = vmatmul.mubr.bf16.gmra.mrb[4].mxu1 %v1424_v53  ;;  %957 = vmatprep.mubr.bf16.mxu0 %v1431_v61  ;;  %v76_v53 = vld [vmem:[%s2353_s0 + $0x30] sm:$0xff] }
  0x77   :  { %1045 = vmatprep.mubr.bf16.mxu1 %v1433_v62  ;;  %1718 = vmatpush3.bf16.msra.mxu0 %v1876_v63  ;;  %v1419_v58 = vcombine.high %v72_v52, %v76_v53  ;;  %v84_v61 = vld [vmem:[%s2353_s0 + $0x70] sm:$0xff]  ;;  %v81_v62 = vld [vmem:[%s2353_s0 + $0x58] sm:$0xff]  ;;  %v1418_v0 = vcombine.low %v72_v52, %v76_v53 }
  0x78   :  { %1776 = vmatpush3.bf16.msra.mxu1 %v1878_v1  ;;  %1719 = vmatprep.subr.bf16.mxu0 %v1879_v3  ;;  %v85_v63 = vld [vmem:[%s2353_s0 + $0x78] sm:$0xff]  ;;  %v1420_v1 = vcombine.low %v73_v54, %v77_v55  ;;  %v1426_v8 = vcombine.low %v80_v60, %v84_v61 }
  0x79   :  { %1777 = vmatprep.subr.bf16.mxu1 %v1881_v12  ;;  %v1429_v3 = vcombine.high %v81_v62, %v85_v63  ;;  %v96_v12 = vld [vmem:[%s2353_s0 + $0xd0] sm:$0xff] }
  0x7b   :  { %1720 = vmatpush3.bf16.msra.mxu0 %v1880_v5  ;;  %v92_v5 = vld [vmem:[%s2353_s0 + $0xb0] sm:$0xff] }
  0x7c   :  { %1778 = vmatpush3.bf16.msra.mxu1 %v1882_v13  ;;  %1721 = vmatprep.subr.bf16.mxu0 %v1883_v14  ;;  %v100_v13 = vld [vmem:[%s2353_s0 + $0xf0] sm:$0xff]  ;;  %v97_v14 = vld [vmem:[%s2353_s0 + $0xd8] sm:$0xff] }
  0x7d   :  { %958 = vmatmul.mubr.bf16.gmra.mrb[8].mxu0 %v1430_v2  ;;  %1779 = vmatprep.subr.bf16.mxu1 %v1885_v17  ;;  %v1427_v2 = vcombine.high %v80_v60, %v84_v61  ;;  %v1436_v17 = vcombine.low %v89_v6, %v93_v7  ;;  %v1443_v18 = vcombine.high %v96_v12, %v100_v13 }
  0x7e   :  { %1046 = vmatmul.mubr.bf16.gmra.mrb[8].mxu1 %v1432_v4  ;;  %965 = vmatprep.mubr.bf16.mxu0 %v1439_v9  ;;  %v88_v4 = vld [vmem:[%s2353_s0 + $0x90] sm:$0xff]  ;;  %v1428_v9 = vcombine.low %v81_v62, %v85_v63 }
  0x7f   :  { %1053 = vmatprep.mubr.bf16.mxu1 %v1441_v11  ;;  %1722 = vmatpush3.bf16.msra.mxu0 %v1884_v15  ;;  %v1435_v10 = vcombine.high %v88_v4, %v92_v5  ;;  %v1437_v11 = vcombine.high %v89_v6, %v93_v7  ;;  %v101_v15 = vld [vmem:[%s2353_s0 + $0xf8] sm:$0xff] }
  0x80   :  { %1780 = vmatpush3.bf16.msra.mxu1 %v1886_v25  ;;  %1723 = vmatprep.subr.bf16.mxu0 %v1887_v26  ;;  %v1445_v19 = vcombine.high %v97_v14, %v101_v15  ;;  %v1444_v25 = vcombine.low %v97_v14, %v101_v15 }
  0x81   :  { %1781 = vmatprep.subr.bf16.mxu1 %v1889_v28  ;;  %v112_v28 = vld [vmem:[%s2353_s0 + $0x150] sm:$0xff] }
  0x83   :  { %1724 = vmatpush3.bf16.msra.mxu0 %v1888_v27  ;;  %v1453_v27 = vcombine.high %v105_v22, %v109_v23 }
  0x84   :  { %1782 = vmatpush3.bf16.msra.mxu1 %v1890_v29  ;;  %1725 = vmatprep.subr.bf16.mxu0 %v1891_v35  ;;  %v116_v29 = vld [vmem:[%s2353_s0 + $0x170] sm:$0xff]  ;;  %v1461_v35 = vcombine.high %v113_v30, %v117_v31 }
  0x85   :  { %966 = vmatmul.mubr.bf16.gmra.mrb[12].mxu0 %v1438_v16  ;;  %1783 = vmatprep.subr.bf16.mxu1 %v1893_v40  ;;  %v1434_v16 = vcombine.low %v88_v4, %v92_v5 }
  0x86   :  { %1054 = vmatmul.mubr.bf16.gmra.mrb[12].mxu1 %v1440_v20  ;;  %973 = vmatprep.mubr.bf16.mxu0 %v1447_v21  ;;  %v104_v20 = vld [vmem:[%s2353_s0 + $0x110] sm:$0xff] }
  0x87   :  { %1061 = vmatprep.mubr.bf16.mxu1 %v1449_v24  ;;  %1726 = vmatpush3.bf16.msra.mxu0 %v1892_v38  ;;  %v108_v21 = vld [vmem:[%s2353_s0 + $0x130] sm:$0xff]  ;;  %v1442_v24 = vcombine.low %v96_v12, %v100_v13  ;;  %v1458_v38 = vcombine.low %v112_v28, %v116_v29 }
  0x88   :  { %1784 = vmatpush3.bf16.msra.mxu1 %v1894_v41  ;;  %1727 = vmatprep.subr.bf16.mxu0 %v1899_v44  ;;  %v1451_v26 = vcombine.high %v104_v20, %v108_v21  ;;  %v1450_v32 = vcombine.low %v104_v20, %v108_v21 }
  0x89   :  { %1785 = vmatprep.subr.bf16.mxu1 %v1901_v46  ;;  %v2248_v46 = vld [vmem:[#allocation4] ss:$0 sm:$0xff] }
  0x8b   :  { %1728 = vmatpush3.bf16.msra.mxu0 %v1900_v45 }
  0x8c   :  { %1786 = vmatpush3.bf16.msra.mxu1 %v1902_v48 }
  0x8d   :  { %974 = vmatmul.mubr.bf16.gmra.mrb[16].mxu0 %v1446_v34  ;;  %v1459_v34 = vcombine.high %v112_v28, %v116_v29 }
  0x8e   :  { %1062 = vmatmul.mubr.bf16.gmra.mrb[16].mxu1 %v1448_v36  ;;  %981 = vmatprep.mubr.bf16.mxu0 %v1455_v37  ;;  %v120_v36 = vld [vmem:[%s2353_s0 + $0x190] sm:$0x11]  ;;  %v121_v37 = vld [vmem:[%s2353_s0 + $0x198] sm:$0x11] }
  0x8f   :  { %1069 = vmatprep.mubr.bf16.mxu1 %v1457_v39  ;;  %v1460_v39 = vcombine.low %v113_v30, %v117_v31  ;;  %v1467_v40 = vcombine.high %v120_v36, %v120_v36  ;;  %v1469_v41 = vcombine.high %v121_v37, %v121_v37  ;;  %v1466_v42 = vcombine.low %v120_v36, %v120_v36 }
  0x90   :  { %v1468_v43 = vcombine.low %v121_v37, %v121_v37 }
  0x95   :  { %982 = vmatmul.mubr.bf16.gmra.mrb[20].mxu0 %v1454_v47 }
  0x96   :  { %1070 = vmatmul.mubr.bf16.gmra.mrb[20].mxu1 %v1456_v49  ;;  %989 = vmatprep.mubr.bf16.mxu0 %v1463_v50 }
  0x97   :  { %1077 = vmatprep.mubr.bf16.mxu1 %v1465_v51 }
  0x9d   :  { %990 = vmatmul.mubr.bf16.gmra.mrb[24].mxu0 %v1462_v56 }
  0x9e   :  { %1078 = vmatmul.mubr.bf16.gmra.mrb[24].mxu1 %v1464_v57  ;;  %1117 = vmatprep.mubr.bf16.mxu0 %v1419_v58 }
  0x9f   :  { %1205 = vmatprep.mubr.bf16.mxu1 %v1421_v59 }
  0xa5   :  { %1118 = vmatmul.mubr.bf16.vlgmr.msra.gmra.mrb[28].mxu0 %v1418_v0 }
  0xa6   :  { %1206 = vmatmul.mubr.bf16.vlgmr.msra.gmra.mrb[28].mxu1 %v1420_v1  ;;  %1125 = vmatprep.mubr.bf16.mxu0 %v1427_v2 }
  0xa7   :  { %1213 = vmatprep.mubr.bf16.mxu1 %v1429_v3 }
  0xad   :  { %1126 = vmatmul.mubr.bf16.gmra.mrb[32].mxu0 %v1426_v8 }
  0xae   :  { %1214 = vmatmul.mubr.bf16.gmra.mrb[32].mxu1 %v1428_v9  ;;  %1133 = vmatprep.mubr.bf16.mxu0 %v1435_v10 }
  0xaf   :  { %1221 = vmatprep.mubr.bf16.mxu1 %v1437_v11 }
  0xb5   :  { %1134 = vmatmul.mubr.bf16.gmra.mrb[36].mxu0 %v1434_v16 }
  0xb6   :  { %1222 = vmatmul.mubr.bf16.gmra.mrb[36].mxu1 %v1436_v17  ;;  %1141 = vmatprep.mubr.bf16.mxu0 %v1443_v18 }
  0xb7   :  { %1229 = vmatprep.mubr.bf16.mxu1 %v1445_v19 }
  0xbd   :  { %1142 = vmatmul.mubr.bf16.gmra.mrb[40].mxu0 %v1442_v24 }
  0xbe   :  { %1230 = vmatmul.mubr.bf16.gmra.mrb[40].mxu1 %v1444_v25  ;;  %1149 = vmatprep.mubr.bf16.mxu0 %v1451_v26 }
  0xbf   :  { %1237 = vmatprep.mubr.bf16.mxu1 %v1453_v27 }
  0xc5   :  { %1150 = vmatmul.mubr.bf16.gmra.mrb[44].mxu0 %v1450_v32 }
  0xc6   :  { %1238 = vmatmul.mubr.bf16.gmra.mrb[44].mxu1 %v1452_v33  ;;  %1157 = vmatprep.mubr.bf16.mxu0 %v1459_v34 }
  0xc7   :  { %1245 = vmatprep.mubr.bf16.mxu1 %v1461_v35 }
  0xcd   :  { %1158 = vmatmul.mubr.bf16.gmra.mrb[48].mxu0 %v1458_v38 }
  0xce   :  { %1246 = vmatmul.mubr.bf16.gmra.mrb[48].mxu1 %v1460_v39  ;;  %1165 = vmatprep.mubr.bf16.mxu0 %v1467_v40 }
  0xcf   :  { %1253 = vmatprep.mubr.bf16.mxu1 %v1469_v41 }
  0xd5   :  { %1166 = vmatmul.mubr.bf16.gmra.mrb[52].mxu0 %v1466_v42 }
  0xd6   :  { %1254 = vmatmul.mubr.bf16.gmra.mrb[52].mxu1 %v1468_v43 }
 0x140   :  { %v1613_v44 = vpop.f32.mrb[0].mxu0 }
 0x141   :  { %v1671_v45 = vpop.f32.mrb[0].mxu1  ;;  %v1614_v47 = vpop.f32.mrb[1].mxu0 }
 0x142   :  { %v1615_v48 = vadd.f32 %v1614_v47, %v1613_v44  ;;  %v1672_v49 = vpop.f32.mrb[1].mxu1  ;;  %v1616_v50 = vpop.f32.mrb[2].mxu0 }
 0x143   :  { %v1673_v51 = vadd.f32 %v1672_v49, %v1671_v45  ;;  %v1674_v52 = vpop.f32.mrb[2].mxu1  ;;  %v1617_v53 = vpop.f32.mrb[3].mxu0 }
 0x144   :  { %v944_v54 = vadd.f32 %v1615_v48, %v2248_v46  ;;  %v1618_v55 = vadd.f32 %v1617_v53, %v1616_v50  ;;  %v1675_v56 = vpop.f32.mrb[3].mxu1 }
 0x145   :  { %v1676_v57 = vadd.f32 %v1675_v56, %v1674_v52 }
 0x146   :  { %v2251_v58 = vadd.f32 %v1673_v51, %v944_v54  ;;  %v947_v59 = vadd.f32 %v1618_v55, %v2248_v46 }
 0x148   :  { %v2254_v60 = vadd.f32 %v1676_v57, %v947_v59  ;;  %v1619_v61 = vpop.f32.mrb[4].mxu0 }
 0x149   :  { %v1677_v62 = vpop.f32.mrb[4].mxu1  ;;  %v1620_v63 = vpop.f32.mrb[5].mxu0 }
 0x14a   :  { %v1621_v0 = vadd.f32 %v1620_v63, %v1619_v61  ;;  %v1678_v1 = vpop.f32.mrb[5].mxu1  ;;  %v1622_v2 = vpop.f32.mrb[6].mxu0 }
 0x14b   :  { %v1679_v3 = vadd.f32 %v1678_v1, %v1677_v62  ;;  %v1680_v4 = vpop.f32.mrb[6].mxu1  ;;  %v1623_v5 = vpop.f32.mrb[7].mxu0 }
 0x14c   :  { %v952_v6 = vadd.f32 %v1621_v0, %v2248_v46  ;;  %v1624_v7 = vadd.f32 %v1623_v5, %v1622_v2  ;;  %v1681_v8 = vpop.f32.mrb[7].mxu1 }
 0x14d   :  { %v1682_v9 = vadd.f32 %v1681_v8, %v1680_v4 }
 0x14e   :  { %v2257_v10 = vadd.f32 %v1679_v3, %v952_v6  ;;  %v955_v11 = vadd.f32 %v1624_v7, %v2248_v46 }
 0x150   :  { %v2260_v12 = vadd.f32 %v1682_v9, %v955_v11  ;;  %v1625_v13 = vpop.f32.mrb[8].mxu0 }
 0x151   :  { %v1683_v14 = vpop.f32.mrb[8].mxu1  ;;  %v1626_v15 = vpop.f32.mrb[9].mxu0 }
 0x152   :  { %v1627_v16 = vadd.f32 %v1626_v15, %v1625_v13  ;;  %v1684_v17 = vpop.f32.mrb[9].mxu1  ;;  %v1628_v18 = vpop.f32.mrb[10].mxu0 }
 0x153   :  { %v1685_v19 = vadd.f32 %v1684_v17, %v1683_v14  ;;  %v1686_v20 = vpop.f32.mrb[10].mxu1  ;;  %v1629_v21 = vpop.f32.mrb[11].mxu0 }
 0x154   :  { %v960_v22 = vadd.f32 %v1627_v16, %v2248_v46  ;;  %v1630_v23 = vadd.f32 %v1629_v21, %v1628_v18  ;;  %v1687_v24 = vpop.f32.mrb[11].mxu1 }
 0x155   :  { %v1688_v25 = vadd.f32 %v1687_v24, %v1686_v20 }
 0x156   :  { %v2263_v26 = vadd.f32 %v1685_v19, %v960_v22  ;;  %v963_v27 = vadd.f32 %v1630_v23, %v2248_v46 }
 0x158   :  { %v2266_v28 = vadd.f32 %v1688_v25, %v963_v27  ;;  %v1631_v29 = vpop.f32.mrb[12].mxu0 }
 0x159   :  { %v1689_v30 = vpop.f32.mrb[12].mxu1  ;;  %v1632_v31 = vpop.f32.mrb[13].mxu0 }
 0x15a   :  { %v1633_v32 = vadd.f32 %v1632_v31, %v1631_v29  ;;  %v1690_v33 = vpop.f32.mrb[13].mxu1  ;;  %v1634_v34 = vpop.f32.mrb[14].mxu0 }
 0x15b   :  { %v1691_v35 = vadd.f32 %v1690_v33, %v1689_v30  ;;  %v1692_v36 = vpop.f32.mrb[14].mxu1  ;;  %v1635_v37 = vpop.f32.mrb[15].mxu0 }
 0x15c   :  { %v968_v38 = vadd.f32 %v1633_v32, %v2248_v46  ;;  %v1636_v39 = vadd.f32 %v1635_v37, %v1634_v34  ;;  %v1693_v40 = vpop.f32.mrb[15].mxu1 }
 0x15d   :  { %v1694_v41 = vadd.f32 %v1693_v40, %v1692_v36 }
 0x15e   :  { %v2269_v42 = vadd.f32 %v1691_v35, %v968_v38  ;;  %v971_v43 = vadd.f32 %v1636_v39, %v2248_v46 }
 0x160   :  { %v2272_v44 = vadd.f32 %v1694_v41, %v971_v43  ;;  %v1637_v45 = vpop.f32.mrb[16].mxu0 }
 0x161   :  { %v1695_v47 = vpop.f32.mrb[16].mxu1  ;;  %v1638_v48 = vpop.f32.mrb[17].mxu0 }
 0x162   :  { %v1639_v49 = vadd.f32 %v1638_v48, %v1637_v45  ;;  %v1696_v50 = vpop.f32.mrb[17].mxu1  ;;  %v1640_v51 = vpop.f32.mrb[18].mxu0 }
 0x163   :  { %v1697_v52 = vadd.f32 %v1696_v50, %v1695_v47  ;;  %v1698_v53 = vpop.f32.mrb[18].mxu1  ;;  %v1641_v54 = vpop.f32.mrb[19].mxu0  ;;  %v2290_v47 = vld [vmem:[#allocation6] ss:$0 sm:$0xff]  ;;  %v2293_v50 = vld [vmem:[#allocation7] ss:$0 sm:$0xff] }
 0x164   :  { %v976_v55 = vadd.f32 %v1639_v49, %v2248_v46  ;;  %v1642_v56 = vadd.f32 %v1641_v54, %v1640_v51  ;;  %v1699_v57 = vpop.f32.mrb[19].mxu1 }
 0x165   :  { %v1700_v59 = vadd.f32 %v1699_v57, %v1698_v53 }
 0x166   :  { %v2275_v61 = vadd.f32 %v1697_v52, %v976_v55  ;;  %v979_v62 = vadd.f32 %v1642_v56, %v2248_v46 }
 0x168   :  { %v2278_v63 = vadd.f32 %v1700_v59, %v979_v62  ;;  %v1643_v0 = vpop.f32.mrb[20].mxu0 }
 0x169   :  { %v1701_v1 = vpop.f32.mrb[20].mxu1  ;;  %v1644_v2 = vpop.f32.mrb[21].mxu0 }
 0x16a   :  { %v1645_v3 = vadd.f32 %v1644_v2, %v1643_v0  ;;  %v1702_v4 = vpop.f32.mrb[21].mxu1  ;;  %v1646_v5 = vpop.f32.mrb[22].mxu0 }
 0x16b   :  { %v1703_v6 = vadd.f32 %v1702_v4, %v1701_v1  ;;  %v1704_v7 = vpop.f32.mrb[22].mxu1  ;;  %v1647_v8 = vpop.f32.mrb[23].mxu0 }
 0x16c   :  { %v984_v9 = vadd.f32 %v1645_v3, %v2248_v46  ;;  %v1648_v11 = vadd.f32 %v1647_v8, %v1646_v5  ;;  %v1705_v13 = vpop.f32.mrb[23].mxu1 }
 0x16d   :  { %v1706_v14 = vadd.f32 %v1705_v13, %v1704_v7 }
 0x16e   :  { %v2281_v15 = vadd.f32 %v1703_v6, %v984_v9  ;;  %v987_v16 = vadd.f32 %v1648_v11, %v2248_v46 }
 0x170   :  { %v2284_v17 = vadd.f32 %v1706_v14, %v987_v16  ;;  %v1649_v18 = vpop.f32.mrb[24].mxu0 }
 0x171   :  { %v1707_v19 = vpop.f32.mrb[24].mxu1  ;;  %v1650_v20 = vpop.f32.mrb[25].mxu0 }
 0x172   :  { %v1651_v21 = vadd.f32 %v1650_v20, %v1649_v18  ;;  %v1708_v22 = vpop.f32.mrb[25].mxu1  ;;  %v1652_v23 = vpop.f32.mrb[26].mxu0 }
 0x173   :  { %v1709_v24 = vadd.f32 %v1708_v22, %v1707_v19  ;;  %v1710_v25 = vpop.f32.mrb[26].mxu1  ;;  %v1653_v27 = vpop.f32.mrb[27].mxu0 }
 0x174   :  { %v992_v29 = vadd.f32 %v1651_v21, %v2248_v46  ;;  %v1711_v30 = vpop.f32.mrb[27].mxu1 }
 0x176   :  { %v2287_v31 = vadd.f32 %v1709_v24, %v992_v29 }
 0x178   :  { %v1729_v32 = vpop.f32.mrb[28].mxu0 }
 0x179   :  { %v1787_v33 = vpop.f32.mrb[28].mxu1  ;;  %v1730_v34 = vpop.f32.mrb[29].mxu0 }
 0x17a   :  { %v1731_v35 = vadd.f32 %v1730_v34, %v1729_v32  ;;  %v1788_v36 = vpop.f32.mrb[29].mxu1  ;;  %v1732_v37 = vpop.f32.mrb[30].mxu0 }
 0x17b   :  { %v1789_v38 = vadd.f32 %v1788_v36, %v1787_v33  ;;  %v1790_v39 = vpop.f32.mrb[30].mxu1  ;;  %v1733_v40 = vpop.f32.mrb[31].mxu0 }
 0x17c   :  { %v1120_v41 = vadd.f32 %v1731_v35, %v2251_v58  ;;  %v1734_v43 = vadd.f32 %v1733_v40, %v1732_v37  ;;  %v1791_v45 = vpop.f32.mrb[31].mxu1 }
 0x17d   :  { %v1792_v48 = vadd.f32 %v1791_v45, %v1790_v39 }
 0x17e   :  { %v1208_v46 = vadd.f32 %v1789_v38, %v1120_v41  ;;  %v1123_v49 = vadd.f32 %v1734_v43, %v2254_v60 }
 0x180   :  { %v1268_v51 = vmul.f32 %v2290_v47, %v1208_v46  ;;  %v1211_v52 = vadd.f32 %v1792_v48, %v1123_v49  ;;  %v1735_v53 = vpop.f32.mrb[32].mxu0 }
 0x181   :  { %v1793_v54 = vpop.f32.mrb[32].mxu1  ;;  %v1736_v55 = vpop.f32.mrb[33].mxu0 }
 0x182   :  { %v1288_v56 = vadd.f32 %v2293_v50, %v1268_v51  ;;  %v1269_v58 = vmul.f32 %v2290_v47, %v1211_v52  ;;  %v1737_v57 = vadd.f32 %v1736_v55, %v1735_v53  ;;  %v1794_v59 = vpop.f32.mrb[33].mxu1  ;;  %v1738_v62 = vpop.f32.mrb[34].mxu0 }
 0x183   :  { %v1795_v0 = vadd.f32 %v1794_v59, %v1793_v54  ;;  %v1796_v1 = vpop.f32.mrb[34].mxu1  ;;  %v1739_v2 = vpop.f32.mrb[35].mxu0 }
 0x184   :  { %v1314_v3 = vmul.f32 0.2, %v1288_v56  ;;  %v1289_v60 = vadd.f32 %v2293_v50, %v1269_v58  ;;  %v1128_v4 = vadd.f32 %v1737_v57, %v2257_v10  ;;  %v1797_v5 = vpop.f32.mrb[35].mxu1  ;;  %vm1301_vm0 = vcmp.ge.f32.partialorder %v1288_v56, 0.0 }
 0x185   :  { %v1740_v6 = vadd.f32 %v1739_v2, %v1738_v62  ;;  %v1798_v7 = vadd.f32 %v1797_v5, %v1796_v1 }
 0x186   :  { %vm1302_vm1 = vcmp.ge.f32.partialorder %v1289_v60, 0.0  ;;  %v1315_v8 = vmul.f32 0.2, %v1289_v60  ;;  %v1216_v9 = vadd.f32 %v1795_v0, %v1128_v4  ;;  %v1327_v13 = vsel %vm1301_vm0, %v1288_v56, %v1314_v3 }
 0x187   :  { %v1131_v11 = vadd.f32 %v1740_v6, %v2260_v12 }
 0x188   :  { %v1328_v14 = vsel %vm1302_vm1, %v1289_v60, %v1315_v8  ;;  %v1270_v16 = vmul.f32 %v2290_v47, %v1216_v9  ;;  %v1741_v18 = vpop.f32.mrb[36].mxu0 }
 0x189   :  { %v1565_v19 = vpack.c.bf16 %v1328_v14, %v1327_v13  ;;  %v1219_v20 = vadd.f32 %v1798_v7, %v1131_v11  ;;  %v1799_v21 = vpop.f32.mrb[36].mxu1  ;;  %v1742_v22 = vpop.f32.mrb[37].mxu0 }
 0x18a   :  { %v1290_v10 = vadd.f32 %v2293_v50, %v1270_v16  ;;  %v1743_v23 = vadd.f32 %v1742_v22, %v1741_v18  ;;  %v1800_v24 = vpop.f32.mrb[37].mxu1  ;;  %v1744_v25 = vpop.f32.mrb[38].mxu0 }
 0x18b   :  { %1566 = vst [vmem:[%s2358_s5] sm:$0xff] %v1565_v19   ;;  %v1271_v12 = vmul.f32 %v2290_v47, %v1219_v20  ;;  %v1801_v27 = vadd.f32 %v1800_v24, %v1799_v21  ;;  %v1802_v29 = vpop.f32.mrb[38].mxu1  ;;  %v1745_v30 = vpop.f32.mrb[39].mxu0 }
 0x18c   :  { %v1136_v32 = vadd.f32 %v1743_v23, %v2263_v26  ;;  %v1746_v33 = vadd.f32 %v1745_v30, %v1744_v25  ;;  %v1803_v34 = vpop.f32.mrb[39].mxu1  ;;  %v1316_v35 = vmul.f32 0.2, %v1290_v10  ;;  %vm1303_vm2 = vcmp.ge.f32.partialorder %v1290_v10, 0.0 }
 0x18d   :  { %v1291_v36 = vadd.f32 %v2293_v50, %v1271_v12  ;;  %v1804_v37 = vadd.f32 %v1803_v34, %v1802_v29 }
 0x18e   :  { %v1224_v38 = vadd.f32 %v1801_v27, %v1136_v32  ;;  %v1139_v39 = vadd.f32 %v1746_v33, %v2266_v28  ;;  %v1329_v48 = vsel %vm1303_vm2, %v1290_v10, %v1316_v35 }
 0x18f   :  { %vm1304_vm3 = vcmp.ge.f32.partialorder %v1291_v36, 0.0  ;;  %v1317_v40 = vmul.f32 0.2, %v1291_v36 }
 0x190   :  { %v1272_v41 = vmul.f32 %v2290_v47, %v1224_v38  ;;  %v1227_v43 = vadd.f32 %v1804_v37, %v1139_v39  ;;  %v1747_v45 = vpop.f32.mrb[40].mxu0 }
 0x191   :  { %v1330_v46 = vsel %vm1304_vm3, %v1291_v36, %v1317_v40  ;;  %v1805_v49 = vpop.f32.mrb[40].mxu1  ;;  %v1748_v26 = vpop.f32.mrb[41].mxu0 }
 0x192   :  { %v1570_v51 = vpack.c.bf16 %v1330_v46, %v1329_v48  ;;  %v1292_v52 = vadd.f32 %v2293_v50, %v1272_v41  ;;  %v1273_v53 = vmul.f32 %v2290_v47, %v1227_v43  ;;  %v1749_v54 = vadd.f32 %v1748_v26, %v1747_v45  ;;  %v1806_v55 = vpop.f32.mrb[41].mxu1  ;;  %v1750_v56 = vpop.f32.mrb[42].mxu0 }
 0x193   :  { %v1807_v58 = vadd.f32 %v1806_v55, %v1805_v49  ;;  %v1808_v28 = vpop.f32.mrb[42].mxu1  ;;  %v1751_v57 = vpop.f32.mrb[43].mxu0 }
 0x194   :  { %1592 = vst [vmem:[%s2358_s5 + $0x8] sm:$0xff] %v1570_v51   ;;  %v1318_v59 = vmul.f32 0.2, %v1292_v52  ;;  %v1293_v62 = vadd.f32 %v2293_v50, %v1273_v53  ;;  %v1144_v0 = vadd.f32 %v1749_v54, %v2269_v42  ;;  %v1809_v1 = vpop.f32.mrb[43].mxu1  ;;  %vm1305_vm4 = vcmp.ge.f32.partialorder %v1292_v52, 0.0 }
 0x195   :  { %v1752_v2 = vadd.f32 %v1751_v57, %v1750_v56  ;;  %v1810_v3 = vadd.f32 %v1809_v1, %v1808_v28 }
 0x196   :  { %vm1306_vm5 = vcmp.ge.f32.partialorder %v1293_v62, 0.0  ;;  %v1319_v60 = vmul.f32 0.2, %v1293_v62  ;;  %v1232_v4 = vadd.f32 %v1807_v58, %v1144_v0  ;;  %v1331_v6 = vsel %vm1305_vm4, %v1292_v52, %v1318_v59 }
 0x197   :  { %v1147_v5 = vadd.f32 %v1752_v2, %v2272_v44 }
 0x198   :  { %v1332_v7 = vsel %vm1306_vm5, %v1293_v62, %v1319_v60  ;;  %v1274_v8 = vmul.f32 %v2290_v47, %v1232_v4  ;;  %v1753_v9 = vpop.f32.mrb[44].mxu0 }
 0x199   :  { %v1575_v11 = vpack.c.bf16 %v1332_v7, %v1331_v6  ;;  %v1235_v13 = vadd.f32 %v1810_v3, %v1147_v5  ;;  %v1811_v14 = vpop.f32.mrb[44].mxu1  ;;  %v1754_v16 = vpop.f32.mrb[45].mxu0 }
 0x19a   :  { %v1294_v42 = vadd.f32 %v2293_v50, %v1274_v8  ;;  %v1755_v18 = vadd.f32 %v1754_v16, %v1753_v9  ;;  %v1812_v19 = vpop.f32.mrb[45].mxu1  ;;  %v1756_v20 = vpop.f32.mrb[46].mxu0 }
 0x19b   :  { %1593 = vst [vmem:[%s2358_s5 + $0x10] sm:$0xff] %v1575_v11   ;;  %v1275_v44 = vmul.f32 %v2290_v47, %v1235_v13  ;;  %v1813_v21 = vadd.f32 %v1812_v19, %v1811_v14  ;;  %v1814_v22 = vpop.f32.mrb[46].mxu1  ;;  %v1757_v10 = vpop.f32.mrb[47].mxu0 }
 0x19c   :  { %v1152_v23 = vadd.f32 %v1755_v18, %v2275_v61  ;;  %v1758_v24 = vadd.f32 %v1757_v10, %v1756_v20  ;;  %v1815_v25 = vpop.f32.mrb[47].mxu1  ;;  %v1320_v12 = vmul.f32 0.2, %v1294_v42  ;;  %vm1307_vm6 = vcmp.ge.f32.partialorder %v1294_v42, 0.0 }
 0x19d   :  { %v1295_v27 = vadd.f32 %v2293_v50, %v1275_v44  ;;  %v1816_v29 = vadd.f32 %v1815_v25, %v1814_v22 }
 0x19e   :  { %v1240_v30 = vadd.f32 %v1813_v21, %v1152_v23  ;;  %v1155_v32 = vadd.f32 %v1758_v24, %v2278_v63  ;;  %v1333_v37 = vsel %vm1307_vm6, %v1294_v42, %v1320_v12 }
 0x19f   :  { %vm1308_vm7 = vcmp.ge.f32.partialorder %v1295_v27, 0.0  ;;  %v1321_v33 = vmul.f32 0.2, %v1295_v27 }
 0x1a0   :  { %v1276_v34 = vmul.f32 %v2290_v47, %v1240_v30  ;;  %v1243_v35 = vadd.f32 %v1816_v29, %v1155_v32  ;;  %v1759_v36 = vpop.f32.mrb[48].mxu0 }
 0x1a1   :  { %v1334_v38 = vsel %vm1308_vm7, %v1295_v27, %v1321_v33  ;;  %v1817_v39 = vpop.f32.mrb[48].mxu1  ;;  %v1760_v61 = vpop.f32.mrb[49].mxu0 }
 0x1a2   :  { %v1580_v40 = vpack.c.bf16 %v1334_v38, %v1333_v37  ;;  %v1296_v41 = vadd.f32 %v2293_v50, %v1276_v34  ;;  %v1277_v43 = vmul.f32 %v2290_v47, %v1243_v35  ;;  %v1761_v45 = vadd.f32 %v1760_v61, %v1759_v36  ;;  %v1818_v48 = vpop.f32.mrb[49].mxu1  ;;  %v1762_v46 = vpop.f32.mrb[50].mxu0 }
 0x1a3   :  { %v1819_v49 = vadd.f32 %v1818_v48, %v1817_v39  ;;  %v1820_v63 = vpop.f32.mrb[50].mxu1  ;;  %v1763_v26 = vpop.f32.mrb[51].mxu0 }
 0x1a4   :  { %1594 = vst [vmem:[%s2358_s5 + $0x18] sm:$0xff] %v1580_v40   ;;  %v1322_v51 = vmul.f32 0.2, %v1296_v41  ;;  %v1297_v52 = vadd.f32 %v2293_v50, %v1277_v43  ;;  %v1160_v53 = vadd.f32 %v1761_v45, %v2281_v15  ;;  %v1821_v54 = vpop.f32.mrb[51].mxu1  ;;  %vm1309_vm8 = vcmp.ge.f32.partialorder %v1296_v41, 0.0 }
 0x1a5   :  { %v1764_v55 = vadd.f32 %v1763_v26, %v1762_v46  ;;  %v1822_v56 = vadd.f32 %v1821_v54, %v1820_v63 }
 0x1a6   :  { %vm1310_vm9 = vcmp.ge.f32.partialorder %v1297_v52, 0.0  ;;  %v1323_v58 = vmul.f32 0.2, %v1297_v52  ;;  %v1248_v28 = vadd.f32 %v1819_v49, %v1160_v53  ;;  %v1335_v59 = vsel %vm1309_vm8, %v1296_v41, %v1322_v51 }
 0x1a7   :  { %v1163_v57 = vadd.f32 %v1764_v55, %v2284_v17 }
 0x1a8   :  { %v1336_v62 = vsel %vm1310_vm9, %v1297_v52, %v1323_v58  ;;  %v1278_v0 = vmul.f32 %v2290_v47, %v1248_v28  ;;  %v1765_v1 = vpop.f32.mrb[52].mxu0 }
 0x1a9   :  { %v1585_v2 = vpack.c.bf16 %v1336_v62, %v1335_v59  ;;  %v1251_v3 = vadd.f32 %v1822_v56, %v1163_v57  ;;  %v1823_v60 = vpop.f32.mrb[52].mxu1  ;;  %v1766_v4 = vpop.f32.mrb[53].mxu0 }
 0x1aa   :  { %v1298_v15 = vadd.f32 %v2293_v50, %v1278_v0  ;;  %v1767_v5 = vadd.f32 %v1766_v4, %v1765_v1  ;;  %v1824_v6 = vpop.f32.mrb[53].mxu1  ;;  %v1768_v7 = vpop.f32.mrb[54].mxu0 }
 0x1ab   :  { %1595 = vst [vmem:[%s2358_s5 + $0x20] sm:$0xff] %v1585_v2   ;;  %v1279_v17 = vmul.f32 %v2290_v47, %v1251_v3  ;;  %v1825_v8 = vadd.f32 %v1824_v6, %v1823_v60  ;;  %v1826_v9 = vpop.f32.mrb[54].mxu1  ;;  %v1769_v11 = vpop.f32.mrb[55].mxu0 }
 0x1ac   :  { %v1168_v13 = vadd.f32 %v1767_v5, %v2287_v31  ;;  %v1827_v14 = vpop.f32.mrb[55].mxu1  ;;  %v1324_v16 = vmul.f32 0.2, %v1298_v15  ;;  %vm1311_vm10 = vcmp.ge.f32.partialorder %v1298_v15, 0.0 }
 0x1ad   :  { %v1299_v42 = vadd.f32 %v2293_v50, %v1279_v17 }
 0x1ae   :  { %v1256_v18 = vadd.f32 %v1825_v8, %v1168_v13  ;;  %v1337_v44 = vsel %vm1311_vm10, %v1298_v15, %v1324_v16 }
 0x1af   :  { %vm1312_vm11 = vcmp.ge.f32.partialorder %v1299_v42, 0.0  ;;  %v1325_v19 = vmul.f32 0.2, %v1299_v42 }
 0x1b0   :  { %v1280_v20 = vmul.f32 %v2290_v47, %v1256_v18 }
 0x1b1   :  { %v1338_v21 = vsel %vm1312_vm11, %v1299_v42, %v1325_v19 }
 0x1b2   :  { %v1590_v22 = vpack.c.bf16 %v1338_v21, %v1337_v44  ;;  %v1300_v10 = vadd.f32 %v2293_v50, %v1280_v20 }
 0x1b4   :  { %1596 = vst [vmem:[%s2358_s5 + $0x28] sm:$0xff] %v1590_v22   ;;  %vm1313_vm12 = vcmp.ge.f32.partialorder %v1300_v10, 0.0  ;;  %v1326_v31 = vmul.f32 0.2, %v1300_v10 }
 0x1b6   :  { %v1339_v23 = vsel %vm1313_vm12, %v1300_v10, %v1326_v31 }
 0x1b7   :  { %v1561_v24 = vpack.c.bf16 %v1339_v23, %v1339_v23 }
 0x1b9   :  { %1405 = vst [vmem:[%s2358_s5 + $0x30] sm:$0x1] %v1561_v24 }
 0x1ba   :  { %1410 = vsyncpa [#allocation3], 1 }
 0x1bb   :  { %1411 = vsyncpa [#allocation5], 1 }
 0x1bc   :  { %1412 = vsyncpa [#allocation8], 1 }

// kernel: discriminator_forward.5
= control target key start
LH: loop header
LB: loop body
LE: loop exit
PB: predicated region body
PF: predicated region fallthrough
CT: control target
= control target key end

     0   :  { %s6962_s0 = inlined_call_operand.vmem [shape: bf16[2,6272], index: 0, kind: input, shape index: {}]   ;;  %s6963_s1 = inlined_call_operand.hbm [shape: bf16[6272,1024], index: 1, kind: input, shape index: {}]   ;;  %s6964_s2 = inlined_call_operand.hbm [shape: f32[1,1024], index: 2, kind: input, shape index: {}]   ;;  %s6965_s3 = inlined_call_operand.hbm [shape: f32[1,1024], index: 3, kind: input, shape index: {}]   ;;  %s6966_s4 = inlined_call_operand.hbm [shape: f32[1,1024], index: 4, kind: input, shape index: {}]   ;;  %s6967_s5 = inlined_call_operand.hbm [shape: bf16[1024,128], index: 5, kind: input, shape index: {}]   ;;  %s6968_s6 = inlined_call_operand.hbm [shape: f32[1,128], index: 6, kind: input, shape index: {}]   ;;  %s6969_s7 = inlined_call_operand.vmem [shape: f32[2,128], index: 7, kind: output, shape index: {}]  }
   0x1   :  { %6973 = sst [smem:[#allocation17_spill]] %s6964_s2 }
   0x2   :  { %12 = vsyncpa [#allocation4], 0 }
   0x3   :  { %14 = vsyncpa [#allocation4 + $0x1], 0 }
   0x4   :  { %15 = vsyncpa [#allocation6], 0 }
   0x5   :  { %16 = vsyncpa [#allocation9], 0 }
   0x6   :  { %17 = vsyncpa [#allocation12], 0  ;;  %s6113_s24 = smov 0   ;;  %s6115_s25 = smov 0  }
   0x7   :  { %s6117_s26 = smov 0   ;;  %s6119_s27 = smov 0  }
   0x8   :  { %s6121_s28 = smov 0   ;;  %s6123_s29 = smov 0  }
   0x9 LB: > { %s4966_s30 = sadd.s32 4294967295, %s6057_s29   ;;  %p4967_p0 = scmp.ge.s32.totalorder %s6057_s29, 1  ;;  %s6057_s29 = sphi %s6123_s29, %s23_s29   ;;  %s6053_s28 = sphi %s6121_s28, %s6988_s28   ;;  %s6049_s27 = sphi %s6119_s27, %s6987_s27   ;;  %s6045_s26 = sphi %s6117_s26, %s6986_s26   ;;  %s6041_s25 = sphi %s6115_s25, %s6985_s25   ;;  %s6037_s24 = sphi %s6113_s24, %s6984_s24  }
   0xa   : > { %p6145_p1 = scmp.eq.s32.totalorder %s4966_s30, 0  ;;  %p225_p2 = scmp.lt.s32.totalorder %s6057_s29, 8 }
   0xb   : > { %s6059_s10 = smov [#allocation5]   ;;  %s6060_s12 = smov [#allocation8]  }
   0xc   : > { %s6974_s8 = scalar_select %p6145_p1, 1, 0 }
   0xd   : > { %p6150_p3 = pnand %p4967_p0, %p225_p2  ;;  %s238_s11 = sshll.u32 %s6059_s10, 4  ;;  %s239_s11 = int_to_ptr.vmem [resolvable:$true] %s238_s11 }
   0xe   : > { %s260_s13 = sshll.u32 %s6060_s12, 4  ;;  %s6061_s15 = smov [#allocation7]   ;;  %s6162_s13 = int_to_ptr.vmem [resolvable:$true] %s260_s13 }
   0xf   : > { %s6975_s9 = scalar_select %p6150_p3, 1, 0 }
  0x10   : > { %p5664_p4 = pneg %p6150_p3  ;;  %s249_s16 = sshll.u32 %s6061_s15, 4  ;;  %s6164_s16 = int_to_ptr.vmem [resolvable:$true] %s249_s16 }
  0x11   : > { %s6977_s2 = sld [smem:[#allocation17_spill]] }
  0x12   : > { %p6158_p5 = pnand %p5664_p4, %p6145_p1 }
  0x14   : > { %p6174_p7 = pneg %p6158_p5 }
  0x17   : > { %s5825_s19 = scalar_lea.hbm %s6977_s2, 128 }
  0x18   : > { %p5826_p6 = scmp.ne.s32.totalorder %s6977_s2, %s5825_s19  ;;  %p5832_p10 = scmp.lt.u32.totalorder %s5825_s19, %s6977_s2 }
  0x1a   : > { %p5828_p8 = pnand %p6174_p7, %p5826_p6 }
  0x1c   : > { %p5829_p9 = pneg %p5828_p8 }
  0x1e   : > { %p5834_p11 = pnand %p5832_p10, %p5829_p9 }
  0x20   : > { %5837 = shalt.err (!%p5834_p11)
}
  0x21   : > { %s5838_s10 = scalar_lea.vmem %s239_s11, 128  ;;  %p5846_p2 = scmp.lt.s32.totalorder %s239_s11, %s239_s11 }
  0x22   : > { %p5839_p12 = scmp.ne.s32.totalorder %s239_s11, %s5838_s10  ;;  %p5847_p4 = scmp.lt.s32.totalorder %s5838_s10, %s5838_s10 }
  0x24   : > { %p5841_p13 = pnand %p5839_p12, %p6174_p7  ;;  %p5848_p3 = por %p5847_p4, %p5846_p2 }
  0x26   : > { %p5842_p0 = pneg %p5841_p13 }
  0x28   : > { %p5849_p1 = pnand %p5848_p3, %p5842_p0 }
  0x2a   : > { %5852 = shalt.err (!%p5849_p1)
}
  0x2b   : > { %5667 = dma.hbm_to_vmem [thread:$0]  (!%p6158_p5), %s6977_s2, 128, %s239_s11, [#allocation6]  }
  0x2c   : > { %s5853_s19 = scalar_lea.hbm %s6966_s4, 128 }
  0x2d   : > { %p5854_p6 = scmp.ne.s32.totalorder %s6966_s4, %s5853_s19  ;;  %p5860_p1 = scmp.lt.u32.totalorder %s5853_s19, %s6966_s4 }
  0x2f   : > { %p5856_p8 = pnand %p5854_p6, %p6174_p7 }
  0x31   : > { %p5857_p9 = pneg %p5856_p8 }
  0x33   : > { %p5862_p3 = pnand %p5860_p1, %p5857_p9 }
  0x35   : > { %5865 = shalt.err (!%p5862_p3)
}
  0x36   : > { %s5866_s11 = scalar_lea.vmem %s6162_s13, 128  ;;  %p5874_p13 = scmp.lt.s32.totalorder %s6162_s13, %s6162_s13 }
  0x37   : > { %p5867_p10 = scmp.ne.s32.totalorder %s6162_s13, %s5866_s11  ;;  %p5875_p0 = scmp.lt.s32.totalorder %s5866_s11, %s5866_s11 }
  0x39   : > { %p5869_p11 = pnand %p5867_p10, %p6174_p7  ;;  %p5876_p2 = por %p5875_p0, %p5874_p13 }
  0x3b   : > { %p5870_p12 = pneg %p5869_p11 }
  0x3d   : > { %p5877_p4 = pnand %p5876_p2, %p5870_p12 }
  0x3f   : > { %5880 = shalt.err (!%p5877_p4)
}
  0x40   : > { %5673 = dma.hbm_to_vmem [thread:$0]  (!%p6158_p5), %s6966_s4, 128, %s6162_s13, [#allocation9]  }
  0x41   : > { %s5881_s18 = scalar_lea.hbm %s6965_s3, 128 }
  0x42   : > { %p5882_p6 = scmp.ne.s32.totalorder %s6965_s3, %s5881_s18  ;;  %p5888_p1 = scmp.lt.u32.totalorder %s5881_s18, %s6965_s3 }
  0x44   : > { %p5884_p8 = pnand %p5882_p6, %p6174_p7 }
  0x46   : > { %p5885_p9 = pneg %p5884_p8 }
  0x48   : > { %p5890_p3 = pnand %p5888_p1, %p5885_p9 }
  0x4a   : > { %5893 = shalt.err (!%p5890_p3)
}
  0x4b   : > { %s5894_s13 = scalar_lea.vmem %s6164_s16, 128  ;;  %p5902_p13 = scmp.lt.s32.totalorder %s6164_s16, %s6164_s16 }
  0x4c   : > { %p5895_p10 = scmp.ne.s32.totalorder %s6164_s16, %s5894_s13  ;;  %p5903_p0 = scmp.lt.s32.totalorder %s5894_s13, %s5894_s13 }
  0x4e   : > { %p5897_p11 = pnand %p5895_p10, %p6174_p7  ;;  %p5904_p2 = por %p5903_p0, %p5902_p13 }
  0x50   : > { %p5898_p12 = pneg %p5897_p11 }
  0x52   : > { %p5905_p4 = pnand %p5904_p2, %p5898_p12 }
  0x54   : > { %5908 = shalt.err (!%p5905_p4)
}
  0x55   : > { %5670 = dma.hbm_to_vmem [thread:$0]  (!%p6158_p5), %s6965_s3, 128, %s6164_s16, [#allocation6]  }
  0x56   : > { %s6062_s10 = smov [#allocation10]   ;;  %s5909_s18 = scalar_lea.hbm %s6967_s5, 8192 }
  0x57   : > { %s270_s12 = sshll.u32 %s6062_s10, 4  ;;  %p5910_p6 = scmp.ne.s32.totalorder %s6967_s5, %s5909_s18  ;;  %s271_s12 = int_to_ptr.vmem [resolvable:$true] %s270_s12 }
  0x58   : > { %p5916_p1 = scmp.lt.u32.totalorder %s5909_s18, %s6967_s5 }
  0x59   : > { %p5912_p8 = pnand %p5910_p6, %p6174_p7 }
  0x5b   : > { %p5913_p9 = pneg %p5912_p8 }
  0x5d   : > { %p5918_p3 = pnand %p5916_p1, %p5913_p9 }
  0x5f   : > { %5921 = shalt.err (!%p5918_p3)
}
  0x60   : > { %s5922_s16 = scalar_lea.vmem %s271_s12, 8192  ;;  %p5930_p13 = scmp.lt.s32.totalorder %s271_s12, %s271_s12 }
  0x61   : > { %p5923_p10 = scmp.ne.s32.totalorder %s271_s12, %s5922_s16  ;;  %p5931_p0 = scmp.lt.s32.totalorder %s5922_s16, %s5922_s16 }
  0x63   : > { %p5925_p11 = pnand %p5923_p10, %p6174_p7  ;;  %p5932_p2 = por %p5931_p0, %p5930_p13 }
  0x65   : > { %p5926_p12 = pneg %p5925_p11 }
  0x67   : > { %p5933_p4 = pnand %p5932_p2, %p5926_p12 }
  0x69   : > { %5936 = shalt.err (!%p5933_p4)
}
  0x6a   : > { %s6063_s13 = smov 64   ;;  %s6064_s30 = smov 4  }
  0x6b   : > { %5676 = dma.hbm_to_vmem [thread:$0]  (!%p6158_p5), %s6967_s5, 8192, %s271_s12, [#allocation9], %s6063_s13, %s6063_s13, %s6064_s30  }
  0x6c   : > { %s6065_s15 = smov [#allocation11]   ;;  %s5937_s20 = scalar_lea.hbm %s6968_s6, 16 }
  0x6d   : > { %s284_s17 = sshll.u32 %s6065_s15, 4  ;;  %p5938_p6 = scmp.ne.s32.totalorder %s6968_s6, %s5937_s20  ;;  %s285_s17 = int_to_ptr.vmem [resolvable:$true] %s284_s17 }
  0x6e   : > { %p5944_p1 = scmp.lt.u32.totalorder %s5937_s20, %s6968_s6 }
  0x6f   : > { %p5940_p8 = pnand %p5938_p6, %p6174_p7 }
  0x71   : > { %p5941_p9 = pneg %p5940_p8 }
  0x73   : > { %p5946_p3 = pnand %p5944_p1, %p5941_p9 }
  0x75   : > { %5949 = shalt.err (!%p5946_p3)
}
  0x76   : > { %s5950_s12 = scalar_lea.vmem %s285_s17, 16  ;;  %s5957_s13 = scalar_lea.vmem %s285_s17, 32 }
  0x77   : > { %p5951_p10 = scmp.ne.s32.totalorder %s285_s17, %s5950_s12  ;;  %p5958_p13 = scmp.lt.s32.totalorder %s285_s17, %s285_s17 }
  0x78   : > { %p5959_p0 = scmp.lt.s32.totalorder %s5957_s13, %s5950_s12 }
  0x79   : > { %p5953_p11 = pnand %p5951_p10, %p6174_p7 }
  0x7a   : > { %p5960_p2 = por %p5959_p0, %p5958_p13 }
  0x7b   : > { %p5954_p12 = pneg %p5953_p11 }
  0x7d   : > { %p5961_p4 = pnand %p5960_p2, %p5954_p12 }
  0x7f   : > { %5964 = shalt.err (!%p5961_p4)
}
  0x80   : > { %5679 = dma.hbm_to_vmem [thread:$0]  (!%p6158_p5), %s6968_s6, 16, %s285_s17, [#allocation12]  }
  0x81   : > { %s32_s2 = sadd.s32 1, %s6053_s28  ;;  %s70_s14 = sadd.s32 1, %s6045_s26 }
  0x82   : > { %p33_p7 = scmp.ge.s32.totalorder %s32_s2, 7  ;;  %p77_p6 = scmp.ne.s32.totalorder %s6045_s26, %s6041_s25 }
  0x83   : > { %p78_p8 = scmp.eq.s32.totalorder %s6057_s29, 0  ;;  %p83_p1 = scmp.ne.s32.totalorder %s6041_s25, %s6037_s24 }
  0x84   : > { %s6990_s2 = smov (%p33_p7, %s32_s2), 0  ;;  %p5689_p3 = scmp.lt.s32.totalorder %s6057_s29, 7 }
  0x85   : > { %p79_p9 = por %p78_p8, %p77_p6  ;;  %s67_s22 = ssub.s32 %s6053_s28, %s6990_s2 }
  0x86   : > { %p68_p10 = scmp.eq.s32.totalorder %s67_s22, 0  ;;  %p6979_p11 = scmp.ne.s32.totalorder %s6974_s8, 0 }
  0x87   : > { %s307_s15 = sand.u32 1, %s6045_s26   ;;  %s5503_s17 = smul.u32 57344, %s6053_s28 }
  0x88   : > { %p6286_p12 = por %p6979_p11, %p83_p1  ;;  %s5640_s19 = smul.u32 3584, %s307_s15 }
  0x89   : > { %s6293_s18 = scalar_select %p68_p10, %s6045_s26, %s70_s14  }
  0x8a   : > { %s6298_s23 = scalar_lea.hbm %s6963_s1, %s5503_s17  ;;  %p6300_p5 = pnand %p5689_p3, %p79_p9 }
  0x8b   : > { %s311_s16 = scalar_lea.vmem [#allocation3], %s5640_s19  ;;  %s6306_s13 = scalar_lea.sflag [#allocation4], %s307_s15 }
  0x8c   : > { %s319_s12 = sshll.u32 %s311_s16, 4  ;;  %s5965_s30 = scalar_lea.hbm %s6298_s23, 57344  ;;  %s6304_s12 = int_to_ptr.vmem [resolvable:$true] %s319_s12 }
  0x8d   : > { %p5966_p13 = scmp.ne.s32.totalorder %s6298_s23, %s5965_s30  ;;  %p5967_p0 = pneg %p6300_p5 }
  0x8e   : > { %s5970_s22 = scalar_lea.hbm %s6963_s1, 401408  ;;  %p5971_p7 = scmp.lt.u32.totalorder %s6298_s23, %s6963_s1 }
  0x8f   : > { %p5968_p2 = pnand %p5967_p0, %p5966_p13  ;;  %p5972_p6 = scmp.lt.u32.totalorder %s5970_s22, %s5965_s30 }
  0x90   : > { %p5974_p9 = scmp.lt.u32.totalorder %s5965_s30, %s6298_s23 }
  0x91   : > { %p5969_p4 = pneg %p5968_p2  ;;  %p5973_p8 = por %p5972_p6, %p5971_p7 }
  0x93   : > { %p5975_p1 = por %p5974_p9, %p5973_p8 }
  0x95   : > { %p5976_p3 = pnand %p5975_p1, %p5969_p4 }
  0x97   : > { %5979 = shalt.err (!%p5976_p3)
}
  0x98   : > { %s5980_s15 = scalar_lea.vmem %s6304_s12, 57344  ;;  %s6066_s19 = smov [#allocation3]  }
  0x99   : > { %p5981_p10 = scmp.ne.s32.totalorder %s6304_s12, %s5980_s15  ;;  %s5985_s21 = sshll.u32 %s6066_s19, 4  ;;  %s5986_s21 = int_to_ptr.vmem [resolvable:$false] %s5985_s21 }
  0x9a   : > { %s5987_s16 = scalar_lea.vmem %s5986_s21, 114688  ;;  %p5988_p2 = scmp.lt.s32.totalorder %s6304_s12, %s5986_s21 }
  0x9b   : > { %p5983_p11 = pnand %p5981_p10, %p5967_p0  ;;  %p5989_p7 = scmp.lt.s32.totalorder %s5987_s16, %s5980_s15 }
  0x9d   : > { %p5984_p13 = pneg %p5983_p11  ;;  %p5990_p6 = por %p5989_p7, %p5988_p2 }
  0x9f   : > { %p5991_p8 = pnand %p5990_p6, %p5984_p13 }
  0xa1   : > { %5994 = shalt.err (!%p5991_p8)
}
  0xa2   : > { %s6067_s30 = smov 512   ;;  %s6068_s11 = smov 32  }
  0xa3   : > { %5683 = dma.hbm_to_vmem [thread:$0]  (!%p6300_p5), %s6298_s23, 57344, %s6304_s12, %s6306_s13, %s6067_s30, %s6067_s30, %s6068_s11  }
  0xa4   : > { %p6982_p0 = scmp.ne.s32.totalorder %s6975_s9, 0 }
  0xa5   : > { %s333_s14 = sand.u32 (!%p6982_p0), 1, %s6041_s25  }
  0xa6   : > { %331 = sbr.rel (%p6982_p0) target bundleno = 1159 (0x487), region = 48  ;;  %s334_s17 = scalar_lea.sflag (!%p6982_p0), [#allocation4], %s333_s14 }
  0xa7   : > { %s5641_s22 = smul.u32 (!%p6982_p0), 3584, %s333_s14 }
  0xa9   : > { %s6337_s20 = scalar_lea.vmem (!%p6982_p0), [#allocation3], %s5641_s22 }
  0xad   : > { %6020 = dma.done.wait (%p6286_p12), %s334_s17, 57344  }
  0xae   : > { %6022 = vsyncadd (%p6286_p12), %s334_s17, 4294909952  ;;  %p6983_p4 = scmp.ne.s32.totalorder %s6974_s8, 0 }
  0xb0   : > { %6024 = dma.done.wait (%p6983_p4), [#allocation6], 256  }
  0xb1   : > { %6026 = vsyncadd (%p6983_p4), [#allocation6], 4294967040 }
  0xb2   : > { %6028 = dma.done.wait (%p6983_p4), [#allocation9], 8320  }
  0xb3   : > { %6030 = vsyncadd (%p6983_p4), [#allocation9], 4294958976 }
  0xb4   : > { %6032 = dma.done.wait (%p6983_p4), [#allocation12], 16  }
  0xb5   : > { %6034 = vsyncadd (%p6983_p4), [#allocation12], 4294967280  ;;  %s395_s9 = smul.u32 7, %s6049_s27  ;;  %p4982_p5 = scmp.ne.s32.totalorder %s6049_s27, 0 }
  0xb6   : > { %v6069_v0 = vmov (!%p4982_p5), 0.0  }
  0xb7   : > { %p398_p12 = scmp.lt.s32.totalorder %s395_s9, 48  ;;  %413 = sbr.rel (%p4982_p5) target bundleno = 190 (0xbe), region = 76  ;;  %414 = vst [vmem:[#allocation2] sm:$0xff] (!%p4982_p5), %v6069_v0  ;;  %415 = vst [vmem:[#allocation2 + $0x8] sm:$0xff] (!%p4982_p5), %v6069_v0 }
  0xb9   : > { %s6992_s9 = smov (!%p398_p12, %s395_s9), 48 }
  0xba   : > { %s402_s24 = scalar_lea.vmem %s6962_s0, %s6992_s9 }
  0xbe PF: > { %v419_v1 = vld [vmem:[%s6337_s20] sm:$0xff]  ;;  %v420_v3 = vld [vmem:[%s6337_s20 + $0x8] sm:$0xff]  ;;  %v6070_v33 = vmov 1966171168   ;;  %v872_v35 = vlaneseq  ;;  %v6401_v60 = vld [vmem:[%s402_s24] sm:$0x7f] }
  0xbf   : > { %v423_v2 = vld [vmem:[%s6337_s20 + $0x20] sm:$0xff]  ;;  %v424_v5 = vld [vmem:[%s6337_s20 + $0x28] sm:$0xff]  ;;  %v870_v34 = vunpack.c.l.s4 %v6070_v33  ;;  %p5431_p9 = scmp.ne.s32.totalorder %s6049_s27, 6 }
  0xc0   : > { %v4984_v4 = vcombine.high %v419_v1, %v423_v2  ;;  %v4983_v6 = vcombine.low %v419_v1, %v423_v2  ;;  %v427_v7 = vld [vmem:[%s6337_s20 + $0x40] sm:$0xff]  ;;  %v4986_v9 = vcombine.high %v420_v3, %v424_v5  ;;  %v4985_v10 = vcombine.low %v420_v3, %v424_v5  ;;  %v428_v12 = vld [vmem:[%s6337_s20 + $0x48] sm:$0xff] }
  0xc1   : > { %v431_v8 = vld [vmem:[%s6337_s20 + $0x60] sm:$0xff]  ;;  %v432_v13 = vld [vmem:[%s6337_s20 + $0x68] sm:$0xff]  ;;  %v871_v44 = vunpack.c.0.s8 %v870_v34  ;;  %v6385_v45 = vshrl.u32 %v872_v35, 7 }
  0xc2   : > { %v4992_v11 = vcombine.high %v427_v7, %v431_v8  ;;  %v435_v14 = vld [vmem:[%s6337_s20 + $0x80] sm:$0xff]  ;;  %3163 = vmatprep.subr.bf16.mxu0 %v4984_v4  ;;  %v4994_v15 = vcombine.high %v428_v12, %v432_v13  ;;  %v436_v17 = vld [vmem:[%s6337_s20 + $0x88] sm:$0xff]  ;;  %3327 = vmatprep.subr.bf16.mxu1 %v4986_v9  ;;  %v4991_v19 = vcombine.low %v427_v7, %v431_v8 }
  0xc3   : > { %v439_v16 = vld [vmem:[%s6337_s20 + $0xa0] sm:$0xff]  ;;  %v440_v18 = vld [vmem:[%s6337_s20 + $0xa8] sm:$0xff]  ;;  %3164 = vmatpush1.bf16.msra.mxu0 %v4983_v6  ;;  %3328 = vmatpush1.bf16.msra.mxu1 %v4985_v10  ;;  %v4993_v20 = vcombine.low %v428_v12, %v432_v13  ;;  %v6392_v54 = vsub.s32 %v871_v44, %v6385_v45 }
  0xc4   : > { %3165 = vmatprep.subr.bf16.mxu0 %v4992_v11  ;;  %v5000_v21 = vcombine.high %v435_v14, %v439_v16  ;;  %3329 = vmatprep.subr.bf16.mxu1 %v4994_v15  ;;  %v5002_v22 = vcombine.high %v436_v17, %v440_v18  ;;  %v443_v23 = vld [vmem:[%s6337_s20 + $0xc0] sm:$0xff]  ;;  %v444_v25 = vld [vmem:[%s6337_s20 + $0xc8] sm:$0xff]  ;;  %v4999_v27 = vcombine.low %v435_v14, %v439_v16 }
  0xc5   : > { %v447_v24 = vld [vmem:[%s6337_s20 + $0xe0] sm:$0xff]  ;;  %v448_v26 = vld [vmem:[%s6337_s20 + $0xe8] sm:$0xff]  ;;  %v5001_v28 = vcombine.low %v436_v17, %v440_v18  ;;  %v6407_v0 = vrot.slane %v6401_v60, %v6392_v54 }
  0xc6   : > { %v5008_v29 = vcombine.high %v443_v23, %v447_v24  ;;  %v5010_v30 = vcombine.high %v444_v25, %v448_v26  ;;  %v451_v31 = vld [vmem:[%s6337_s20 + $0x100] sm:$0xff]  ;;  %v452_v36 = vld [vmem:[%s6337_s20 + $0x108] sm:$0xff]  ;;  %v5007_v38 = vcombine.low %v443_v23, %v447_v24  ;;  %v5009_v39 = vcombine.low %v444_v25, %v448_v26 }
  0xc7   : > { %3166 = vmatpush1.bf16.msra.mxu0 %v4991_v19  ;;  %3330 = vmatpush1.bf16.msra.mxu1 %v4993_v20  ;;  %v455_v32 = vld [vmem:[%s6337_s20 + $0x120] sm:$0xff]  ;;  %v456_v37 = vld [vmem:[%s6337_s20 + $0x128] sm:$0xff]  ;;  %v883_v4 = vcombine.high %v6407_v0, %v6407_v0 }
  0xc8   : > { %3167 = vmatprep.subr.bf16.mxu0 %v5000_v21  ;;  %3331 = vmatprep.subr.bf16.mxu1 %v5002_v22  ;;  %v5016_v40 = vcombine.high %v451_v31, %v455_v32  ;;  %v5018_v41 = vcombine.high %v452_v36, %v456_v37  ;;  %v459_v42 = vld [vmem:[%s6337_s20 + $0x140] sm:$0xff]  ;;  %v460_v46 = vld [vmem:[%s6337_s20 + $0x148] sm:$0xff]  ;;  %v5015_v48 = vcombine.low %v451_v31, %v455_v32 }
  0xc9   : > { %v463_v43 = vld [vmem:[%s6337_s20 + $0x160] sm:$0xff]  ;;  %v464_v47 = vld [vmem:[%s6337_s20 + $0x168] sm:$0xff]  ;;  %v5017_v49 = vcombine.low %v452_v36, %v456_v37  ;;  %v6416_v10 = vrot.slane %v883_v4, %v6392_v54 }
  0xca   : > { %v5024_v50 = vcombine.high %v459_v42, %v463_v43  ;;  %v5026_v51 = vcombine.high %v460_v46, %v464_v47  ;;  %v467_v52 = vld [vmem:[%s6337_s20 + $0x180] sm:$0xff]  ;;  %v468_v55 = vld [vmem:[%s6337_s20 + $0x188] sm:$0xff]  ;;  %v5023_v57 = vcombine.low %v459_v42, %v463_v43  ;;  %v5025_v58 = vcombine.low %v460_v46, %v464_v47 }
  0xcb   : > { %3168 = vmatpush1.bf16.msra.mxu0 %v4999_v27  ;;  %3332 = vmatpush1.bf16.msra.mxu1 %v5001_v28  ;;  %v471_v53 = vld [vmem:[%s6337_s20 + $0x1a0] sm:$0xff]  ;;  %v472_v56 = vld [vmem:[%s6337_s20 + $0x1a8] sm:$0xff] }
  0xcc   : > { %3169 = vmatprep.subr.bf16.mxu0 %v5008_v29  ;;  %3333 = vmatprep.subr.bf16.mxu1 %v5010_v30  ;;  %v5032_v59 = vcombine.high %v467_v52, %v471_v53  ;;  %v5034_v61 = vcombine.high %v468_v55, %v472_v56  ;;  %v475_v62 = vld [vmem:[%s6337_s20 + $0x1c0] sm:$0xff]  ;;  %v476_v1 = vld [vmem:[%s6337_s20 + $0x1c8] sm:$0xff]  ;;  %v5031_v3 = vcombine.low %v467_v52, %v471_v53 }
  0xcd   : > { %v479_v63 = vld [vmem:[%s6337_s20 + $0x1e0] sm:$0xff]  ;;  %v480_v2 = vld [vmem:[%s6337_s20 + $0x1e8] sm:$0xff]  ;;  %v5033_v5 = vcombine.low %v468_v55, %v472_v56  ;;  %3195 = vmatprep.mubr.bf16.mxu0 %v6416_v10  ;;  %3359 = vmatprep.mubr.bf16.mxu1 %v6416_v10 }
  0xce   : > { %v5040_v6 = vcombine.high %v475_v62, %v479_v63  ;;  %v5042_v7 = vcombine.high %v476_v1, %v480_v2  ;;  %v483_v8 = vld [vmem:[%s6337_s20 + $0x200] sm:$0xff]  ;;  %v484_v11 = vld [vmem:[%s6337_s20 + $0x208] sm:$0xff]  ;;  %v5039_v13 = vcombine.low %v475_v62, %v479_v63  ;;  %v5041_v14 = vcombine.low %v476_v1, %v480_v2 }
  0xcf   : > { %3170 = vmatpush1.bf16.msra.mxu0 %v5007_v38  ;;  %3334 = vmatpush1.bf16.msra.mxu1 %v5009_v39  ;;  %v487_v9 = vld [vmem:[%s6337_s20 + $0x220] sm:$0xff]  ;;  %v488_v12 = vld [vmem:[%s6337_s20 + $0x228] sm:$0xff] }
  0xd0   : > { %3171 = vmatprep.subr.bf16.mxu0 %v5016_v40  ;;  %3335 = vmatprep.subr.bf16.mxu1 %v5018_v41  ;;  %v5048_v15 = vcombine.high %v483_v8, %v487_v9  ;;  %v5050_v16 = vcombine.high %v484_v11, %v488_v12  ;;  %v491_v17 = vld [vmem:[%s6337_s20 + $0x240] sm:$0xff]  ;;  %v492_v19 = vld [vmem:[%s6337_s20 + $0x248] sm:$0xff]  ;;  %v5047_v21 = vcombine.low %v483_v8, %v487_v9 }
  0xd1   : > { %v495_v18 = vld [vmem:[%s6337_s20 + $0x260] sm:$0xff]  ;;  %v496_v20 = vld [vmem:[%s6337_s20 + $0x268] sm:$0xff]  ;;  %v5049_v22 = vcombine.low %v484_v11, %v488_v12 }
  0xd2   : > { %v5056_v23 = vcombine.high %v491_v17, %v495_v18  ;;  %v5058_v24 = vcombine.high %v492_v19, %v496_v20  ;;  %v499_v25 = vld [vmem:[%s6337_s20 + $0x280] sm:$0xff]  ;;  %v500_v27 = vld [vmem:[%s6337_s20 + $0x288] sm:$0xff]  ;;  %v5055_v29 = vcombine.low %v491_v17, %v495_v18  ;;  %v5057_v30 = vcombine.low %v492_v19, %v496_v20 }
  0xd3   : > { %3172 = vmatpush1.bf16.msra.mxu0 %v5015_v48  ;;  %3336 = vmatpush1.bf16.msra.mxu1 %v5017_v49  ;;  %v503_v26 = vld [vmem:[%s6337_s20 + $0x2a0] sm:$0xff]  ;;  %v504_v28 = vld [vmem:[%s6337_s20 + $0x2a8] sm:$0xff]  ;;  %v868_v19 = vcombine.high %v6401_v60, %v6401_v60 }
  0xd4   : > { %3173 = vmatprep.subr.bf16.mxu0 %v5024_v50  ;;  %3337 = vmatprep.subr.bf16.mxu1 %v5026_v51  ;;  %v5064_v31 = vcombine.high %v499_v25, %v503_v26  ;;  %v5066_v32 = vcombine.high %v500_v27, %v504_v28  ;;  %v507_v33 = vld [vmem:[%s6337_s20 + $0x2c0] sm:$0xff]  ;;  %v508_v35 = vld [vmem:[%s6337_s20 + $0x2c8] sm:$0xff]  ;;  %v5063_v37 = vcombine.low %v499_v25, %v503_v26 }
  0xd5   : > { %v511_v34 = vld [vmem:[%s6337_s20 + $0x2e0] sm:$0xff]  ;;  %v512_v36 = vld [vmem:[%s6337_s20 + $0x2e8] sm:$0xff]  ;;  %v5065_v38 = vcombine.low %v500_v27, %v504_v28  ;;  %v882_v25 = vrot.slane %v868_v19, %v6392_v54  ;;  %v6461_v26 = vrot.slane %v6407_v0, %v6392_v54  ;;  %v6469_v0 = vcombine.high %v6416_v10, %v6416_v10 }
  0xd6   : > { %v5072_v39 = vcombine.high %v507_v33, %v511_v34  ;;  %v5074_v40 = vcombine.high %v508_v35, %v512_v36  ;;  %v515_v41 = vld [vmem:[%s6337_s20 + $0x300] sm:$0xff]  ;;  %v516_v43 = vld [vmem:[%s6337_s20 + $0x308] sm:$0xff]  ;;  %v5071_v46 = vcombine.low %v507_v33, %v511_v34  ;;  %v5073_v47 = vcombine.low %v508_v35, %v512_v36 }
  0xd7   : > { %3174 = vmatpush1.bf16.msra.mxu0 %v5023_v57  ;;  %3338 = vmatpush1.bf16.msra.mxu1 %v5025_v58  ;;  %v519_v42 = vld [vmem:[%s6337_s20 + $0x320] sm:$0xff]  ;;  %v520_v44 = vld [vmem:[%s6337_s20 + $0x328] sm:$0xff]  ;;  %v6475_v36 = vrot.slane %v882_v25, %v6392_v54 }
  0xd8   : > { %3175 = vmatprep.subr.bf16.mxu0 %v5032_v59  ;;  %3339 = vmatprep.subr.bf16.mxu1 %v5034_v61  ;;  %v5080_v48 = vcombine.high %v515_v41, %v519_v42  ;;  %v5082_v49 = vcombine.high %v516_v43, %v520_v44  ;;  %v523_v50 = vld [vmem:[%s6337_s20 + $0x340] sm:$0xff]  ;;  %v524_v52 = vld [vmem:[%s6337_s20 + $0x348] sm:$0xff]  ;;  %v5079_v55 = vcombine.low %v515_v41, %v519_v42 }
  0xd9   : > { %v527_v51 = vld [vmem:[%s6337_s20 + $0x360] sm:$0xff]  ;;  %v528_v53 = vld [vmem:[%s6337_s20 + $0x368] sm:$0xff]  ;;  %v5081_v56 = vcombine.low %v516_v43, %v520_v44 }
  0xda   : > { %v5088_v57 = vcombine.high %v523_v50, %v527_v51  ;;  %v5090_v58 = vcombine.high %v524_v52, %v528_v53  ;;  %v531_v59 = vld [vmem:[%s6337_s20 + $0x380] sm:$0xff]  ;;  %v532_v62 = vld [vmem:[%s6337_s20 + $0x388] sm:$0xff]  ;;  %v5087_v1 = vcombine.low %v523_v50, %v527_v51  ;;  %v5089_v2 = vcombine.low %v524_v52, %v528_v53 }
  0xdb   : > { %3176 = vmatpush1.bf16.msra.mxu0 %v5031_v3  ;;  %3340 = vmatpush1.bf16.msra.mxu1 %v5033_v5  ;;  %v535_v61 = vld [vmem:[%s6337_s20 + $0x3a0] sm:$0xff]  ;;  %v536_v63 = vld [vmem:[%s6337_s20 + $0x3a8] sm:$0xff] }
  0xdc   : > { %3177 = vmatprep.subr.bf16.mxu0 %v5040_v6  ;;  %3341 = vmatprep.subr.bf16.mxu1 %v5042_v7  ;;  %v5096_v3 = vcombine.high %v531_v59, %v535_v61  ;;  %v5098_v4 = vcombine.high %v532_v62, %v536_v63  ;;  %v539_v5 = vld [vmem:[%s6337_s20 + $0x3c0] sm:$0xff]  ;;  %v540_v7 = vld [vmem:[%s6337_s20 + $0x3c8] sm:$0xff]  ;;  %v5095_v9 = vcombine.low %v531_v59, %v535_v61 }
  0xdd   : > { %v543_v6 = vld [vmem:[%s6337_s20 + $0x3e0] sm:$0xff]  ;;  %v544_v8 = vld [vmem:[%s6337_s20 + $0x3e8] sm:$0xff]  ;;  %v5097_v11 = vcombine.low %v532_v62, %v536_v63 }
  0xde   : > { %v5104_v12 = vcombine.high %v539_v5, %v543_v6  ;;  %v552_v17 = vld [vmem:[%s6337_s20 + $0x428] sm:$0xff]  ;;  %v5103_v18 = vcombine.low %v539_v5, %v543_v6  ;;  %v5105_v20 = vcombine.low %v540_v7, %v544_v8  ;;  %v563_v33 = vld [vmem:[%s6337_s20 + $0x480] sm:$0xff] }
  0xdf   : > { %3178 = vmatpush1.bf16.msra.mxu0 %v5039_v13  ;;  %3342 = vmatpush1.bf16.msra.mxu1 %v5041_v14  ;;  %v5106_v13 = vcombine.high %v540_v7, %v544_v8  ;;  %v547_v14 = vld [vmem:[%s6337_s20 + $0x400] sm:$0xff]  ;;  %v556_v27 = vld [vmem:[%s6337_s20 + $0x448] sm:$0xff] }
  0xe0   : > { %3179 = vmatprep.subr.bf16.mxu0 %v5048_v15  ;;  %3343 = vmatprep.subr.bf16.mxu1 %v5050_v16  ;;  %v551_v15 = vld [vmem:[%s6337_s20 + $0x420] sm:$0xff]  ;;  %v548_v16 = vld [vmem:[%s6337_s20 + $0x408] sm:$0xff] }
  0xe1   : > { %v560_v28 = vld [vmem:[%s6337_s20 + $0x468] sm:$0xff]  ;;  %v5111_v60 = vcombine.low %v547_v14, %v551_v15  ;;  %v567_v34 = vld [vmem:[%s6337_s20 + $0x4a0] sm:$0xff] }
  0xe2   : > { %v5128_v41 = vcombine.high %v563_v33, %v567_v34  ;;  %v575_v43 = vld [vmem:[%s6337_s20 + $0x4e0] sm:$0xff]  ;;  %v572_v44 = vld [vmem:[%s6337_s20 + $0x4c8] sm:$0xff] }
  0xe3   : > { %3180 = vmatpush1.bf16.msra.mxu0 %v5047_v21  ;;  %3344 = vmatpush1.bf16.msra.mxu1 %v5049_v22  ;;  %v5112_v21 = vcombine.high %v547_v14, %v551_v15  ;;  %v5114_v22 = vcombine.high %v548_v16, %v552_v17  ;;  %v579_v51 = vld [vmem:[%s6337_s20 + $0x500] sm:$0xff]  ;;  %v580_v53 = vld [vmem:[%s6337_s20 + $0x508] sm:$0xff] }
  0xe4   : > { %3181 = vmatprep.subr.bf16.mxu0 %v5056_v23  ;;  %3345 = vmatprep.subr.bf16.mxu1 %v5058_v24  ;;  %v555_v23 = vld [vmem:[%s6337_s20 + $0x440] sm:$0xff]  ;;  %v588_v63 = vld [vmem:[%s6337_s20 + $0x548] sm:$0xff] }
  0xe5   : > { %v559_v24 = vld [vmem:[%s6337_s20 + $0x460] sm:$0xff]  ;;  %v596_v8 = vld [vmem:[%s6337_s20 + $0x588] sm:$0xff] }
  0xe6   : > { %v583_v52 = vld [vmem:[%s6337_s20 + $0x520] sm:$0xff] }
  0xe7   : > { %3182 = vmatpush1.bf16.msra.mxu0 %v5055_v29  ;;  %3346 = vmatpush1.bf16.msra.mxu1 %v5057_v30  ;;  %v884_v29 = vcombine.high %v882_v25, %v882_v25  ;;  %v5113_v30 = vcombine.low %v548_v16, %v552_v17  ;;  %v587_v61 = vld [vmem:[%s6337_s20 + $0x540] sm:$0xff]  ;;  %v604_v17 = vld [vmem:[%s6337_s20 + $0x5c8] sm:$0xff] }
  0xe8   : > { %3183 = vmatprep.subr.bf16.mxu0 %v5064_v31  ;;  %3347 = vmatprep.subr.bf16.mxu1 %v5066_v32  ;;  %v5120_v31 = vcombine.high %v555_v23, %v559_v24  ;;  %v5122_v32 = vcombine.high %v556_v27, %v560_v28  ;;  %v591_v62 = vld [vmem:[%s6337_s20 + $0x560] sm:$0xff]  ;;  %v612_v25 = vld [vmem:[%s6337_s20 + $0x608] sm:$0xff] }
  0xe9   : > { %v6472_v35 = vrot.slane %v884_v29, %v6392_v54  ;;  %v571_v54 = vld [vmem:[%s6337_s20 + $0x4c0] sm:$0xff] }
  0xea   : > { %v595_v6 = vld [vmem:[%s6337_s20 + $0x580] sm:$0xff] }
  0xeb   : > { %3184 = vmatpush1.bf16.msra.mxu0 %v5063_v37  ;;  %3348 = vmatpush1.bf16.msra.mxu1 %v5065_v38  ;;  %v564_v37 = vld [vmem:[%s6337_s20 + $0x488] sm:$0xff]  ;;  %v599_v7 = vld [vmem:[%s6337_s20 + $0x5a0] sm:$0xff] }
  0xec   : > { %3185 = vmatprep.subr.bf16.mxu0 %v5072_v39  ;;  %3349 = vmatprep.subr.bf16.mxu1 %v5074_v40  ;;  %v568_v38 = vld [vmem:[%s6337_s20 + $0x4a8] sm:$0xff]  ;;  %v5119_v39 = vcombine.low %v555_v23, %v559_v24  ;;  %v5121_v40 = vcombine.low %v556_v27, %v560_v28  ;;  %v603_v15 = vld [vmem:[%s6337_s20 + $0x5c0] sm:$0xff]  ;;  %v5159_v19 = vcombine.low %v595_v6, %v599_v7 }
  0xed   : > { %v5130_v42 = vcombine.high %v564_v37, %v568_v38  ;;  %v607_v16 = vld [vmem:[%s6337_s20 + $0x5e0] sm:$0xff]  ;;  %v616_v27 = vld [vmem:[%s6337_s20 + $0x628] sm:$0xff] }
  0xee   : > { %v611_v23 = vld [vmem:[%s6337_s20 + $0x600] sm:$0xff]  ;;  %v5167_v28 = vcombine.low %v603_v15, %v607_v16 }
  0xef   : > { %3186 = vmatpush1.bf16.msra.mxu0 %v5071_v46  ;;  %3350 = vmatpush1.bf16.msra.mxu1 %v5073_v47  ;;  %v576_v46 = vld [vmem:[%s6337_s20 + $0x4e8] sm:$0xff]  ;;  %v5127_v47 = vcombine.low %v563_v33, %v567_v34  ;;  %v615_v24 = vld [vmem:[%s6337_s20 + $0x620] sm:$0xff] }
  0xf0   : > { %3187 = vmatprep.subr.bf16.mxu0 %v5080_v48  ;;  %3351 = vmatprep.subr.bf16.mxu1 %v5082_v49  ;;  %v5129_v48 = vcombine.low %v564_v37, %v568_v38  ;;  %v5136_v49 = vcombine.high %v571_v54, %v575_v43  ;;  %v5138_v50 = vcombine.high %v572_v44, %v576_v46  ;;  %v620_v33 = vld [vmem:[%s6337_s20 + $0x648] sm:$0xff] }
  0xf1   : > { %v5176_v29 = vcombine.high %v611_v23, %v615_v24  ;;  %v624_v34 = vld [vmem:[%s6337_s20 + $0x668] sm:$0xff]  ;;  %v5175_v37 = vcombine.low %v611_v23, %v615_v24  ;;  %v5177_v38 = vcombine.low %v612_v25, %v616_v27 }
  0xf2   : > { %v668_v23 = vld [vmem:[%s6337_s20 + $0x7c8] sm:$0xff] }
  0xf3   : > { %3188 = vmatpush1.bf16.msra.mxu0 %v5079_v55  ;;  %3352 = vmatpush1.bf16.msra.mxu1 %v5081_v56  ;;  %v584_v55 = vld [vmem:[%s6337_s20 + $0x528] sm:$0xff]  ;;  %v5135_v56 = vcombine.low %v571_v54, %v575_v43 }
  0xf4   : > { %3189 = vmatprep.subr.bf16.mxu0 %v5088_v57  ;;  %3353 = vmatprep.subr.bf16.mxu1 %v5090_v58  ;;  %v5137_v57 = vcombine.low %v572_v44, %v576_v46  ;;  %v5144_v58 = vcombine.high %v579_v51, %v583_v52  ;;  %v5146_v59 = vcombine.high %v580_v53, %v584_v55  ;;  %v628_v54 = vld [vmem:[%s6337_s20 + $0x688] sm:$0xff] }
  0xf5   : > { %v632_v43 = vld [vmem:[%s6337_s20 + $0x6a8] sm:$0xff]  ;;  %v5185_v46 = vcombine.low %v620_v33, %v624_v34 }
  0xf6   : > { %v672_v24 = vld [vmem:[%s6337_s20 + $0x7e8] sm:$0xff] }
  0xf7   : > { %3190 = vmatpush1.bf16.msra.mxu0 %v5087_v1  ;;  %3354 = vmatpush1.bf16.msra.mxu1 %v5089_v2  ;;  %v592_v1 = vld [vmem:[%s6337_s20 + $0x568] sm:$0xff]  ;;  %v5143_v2 = vcombine.low %v579_v51, %v583_v52 }
  0xf8   : > { %3191 = vmatprep.subr.bf16.mxu0 %v5096_v3  ;;  %3355 = vmatprep.subr.bf16.mxu1 %v5098_v4  ;;  %v5145_v3 = vcombine.low %v580_v53, %v584_v55  ;;  %v5152_v4 = vcombine.high %v587_v61, %v591_v62  ;;  %v5154_v5 = vcombine.high %v588_v63, %v592_v1  ;;  %v636_v51 = vld [vmem:[%s6337_s20 + $0x6c8] sm:$0xff] }
  0xf9   : > { %v640_v52 = vld [vmem:[%s6337_s20 + $0x6e8] sm:$0xff]  ;;  %v5193_v55 = vcombine.low %v628_v54, %v632_v43 }
  0xfb   : > { %3192 = vmatpush1.bf16.msra.mxu0 %v5095_v9  ;;  %3356 = vmatpush1.bf16.msra.mxu1 %v5097_v11  ;;  %v600_v9 = vld [vmem:[%s6337_s20 + $0x5a8] sm:$0xff]  ;;  %v5151_v11 = vcombine.low %v587_v61, %v591_v62 }
  0xfc   : > { %3193 = vmatprep.subr.bf16.mxu0 %v5104_v12  ;;  %3357 = vmatprep.subr.bf16.mxu1 %v5106_v13  ;;  %v5153_v12 = vcombine.low %v588_v63, %v592_v1  ;;  %v5160_v13 = vcombine.high %v595_v6, %v599_v7  ;;  %v5162_v14 = vcombine.high %v596_v8, %v600_v9  ;;  %v644_v61 = vld [vmem:[%s6337_s20 + $0x708] sm:$0xff] }
  0xfd   : > { %v648_v62 = vld [vmem:[%s6337_s20 + $0x728] sm:$0xff]  ;;  %v5201_v1 = vcombine.low %v636_v51, %v640_v52 }
  0xfe   : > { %v652_v6 = vld [vmem:[%s6337_s20 + $0x748] sm:$0xff] }
  0xff   : > { %3194 = vmatpush1.bf16.msra.mxu0 %v5103_v18  ;;  %3358 = vmatpush1.bf16.msra.mxu1 %v5105_v20  ;;  %v608_v18 = vld [vmem:[%s6337_s20 + $0x5e8] sm:$0xff]  ;;  %v5161_v20 = vcombine.low %v596_v8, %v600_v9  ;;  %v5209_v9 = vcombine.low %v644_v61, %v648_v62 }
 0x100   : > { %3204 = vmatprep.subr.bf16.mxu0 %v5112_v21  ;;  %3368 = vmatprep.subr.bf16.mxu1 %v5114_v22  ;;  %v5168_v21 = vcombine.high %v603_v15, %v607_v16  ;;  %v5170_v22 = vcombine.high %v604_v17, %v608_v18  ;;  %v656_v7 = vld [vmem:[%s6337_s20 + $0x768] sm:$0xff] }
 0x101   : > { %v660_v15 = vld [vmem:[%s6337_s20 + $0x788] sm:$0xff] }
 0x102   : > { %3196 = vmatmul.mubr.bf16.vlgmr.msra.gmra.mrb[0].mxu0 %v6461_v26  ;;  %3360 = vmatmul.mubr.bf16.vlgmr.msra.gmra.mrb[0].mxu1 %v6461_v26  ;;  %v664_v16 = vld [vmem:[%s6337_s20 + $0x7a8] sm:$0xff] }
 0x103   : > { %3205 = vmatpush1.bf16.msra.mxu0 %v5111_v60  ;;  %3369 = vmatpush1.bf16.msra.mxu1 %v5113_v30  ;;  %v5169_v60 = vcombine.low %v604_v17, %v608_v18  ;;  %v5178_v30 = vcombine.high %v612_v25, %v616_v27  ;;  %v5217_v18 = vcombine.low %v652_v6, %v656_v7 }
 0x104   : > { %3206 = vmatprep.subr.bf16.mxu0 %v5120_v31  ;;  %3370 = vmatprep.subr.bf16.mxu1 %v5122_v32  ;;  %v619_v31 = vld [vmem:[%s6337_s20 + $0x640] sm:$0xff]  ;;  %v5225_v27 = vcombine.low %v660_v15, %v664_v16 }
 0x105   : > { %3236 = vmatprep.mubr.bf16.mxu0 %v6469_v0  ;;  %3400 = vmatprep.mubr.bf16.mxu1 %v6469_v0  ;;  %v623_v32 = vld [vmem:[%s6337_s20 + $0x660] sm:$0xff] }
 0x106   : > { %v5183_v44 = vcombine.low %v619_v31, %v623_v32 }
 0x107   : > { %3207 = vmatpush1.bf16.msra.mxu0 %v5119_v39  ;;  %3371 = vmatpush1.bf16.msra.mxu1 %v5121_v40  ;;  %v5184_v39 = vcombine.high %v619_v31, %v623_v32  ;;  %v5186_v40 = vcombine.high %v620_v33, %v624_v34  ;;  %v676_v31 = vld [vmem:[%s6337_s20 + $0x808] sm:$0xff]  ;;  %v5233_v34 = vcombine.low %v668_v23, %v672_v24 }
 0x108   : > { %3208 = vmatprep.subr.bf16.mxu0 %v5128_v41  ;;  %3372 = vmatprep.subr.bf16.mxu1 %v5130_v42  ;;  %v627_v41 = vld [vmem:[%s6337_s20 + $0x680] sm:$0xff]  ;;  %v680_v32 = vld [vmem:[%s6337_s20 + $0x828] sm:$0xff] }
 0x109   : > { %v631_v42 = vld [vmem:[%s6337_s20 + $0x6a0] sm:$0xff] }
 0x10a   : > { %v5191_v53 = vcombine.low %v627_v41, %v631_v42 }
 0x10b   : > { %3209 = vmatpush1.bf16.msra.mxu0 %v5127_v47  ;;  %3373 = vmatpush1.bf16.msra.mxu1 %v5129_v48  ;;  %v5192_v47 = vcombine.high %v627_v41, %v631_v42  ;;  %v5194_v48 = vcombine.high %v628_v54, %v632_v43  ;;  %v6543_v41 = vcombine.high %v6461_v26, %v6461_v26  ;;  %v684_v42 = vld [vmem:[%s6337_s20 + $0x848] sm:$0xff] }
 0x10c   : > { %3210 = vmatprep.subr.bf16.mxu0 %v5136_v49  ;;  %3374 = vmatprep.subr.bf16.mxu1 %v5138_v50  ;;  %v635_v49 = vld [vmem:[%s6337_s20 + $0x6c0] sm:$0xff]  ;;  %v688_v54 = vld [vmem:[%s6337_s20 + $0x868] sm:$0xff] }
 0x10d   : > { %v639_v50 = vld [vmem:[%s6337_s20 + $0x6e0] sm:$0xff] }
 0x10e   : > { %v5199_v63 = vcombine.low %v635_v49, %v639_v50 }
 0x10f   : > { %3211 = vmatpush1.bf16.msra.mxu0 %v5135_v56  ;;  %3375 = vmatpush1.bf16.msra.mxu1 %v5137_v57  ;;  %v5200_v56 = vcombine.high %v635_v49, %v639_v50  ;;  %v5202_v57 = vcombine.high %v636_v51, %v640_v52  ;;  %v695_v49 = vld [vmem:[%s6337_s20 + $0x8a0] sm:$0xff]  ;;  %v692_v50 = vld [vmem:[%s6337_s20 + $0x888] sm:$0xff] }
 0x110   : > { %3212 = vmatprep.subr.bf16.mxu0 %v5144_v58  ;;  %3376 = vmatprep.subr.bf16.mxu1 %v5146_v59  ;;  %v643_v58 = vld [vmem:[%s6337_s20 + $0x700] sm:$0xff]  ;;  %v696_v51 = vld [vmem:[%s6337_s20 + $0x8a8] sm:$0xff] }
 0x111   : > { %v647_v59 = vld [vmem:[%s6337_s20 + $0x720] sm:$0xff] }
 0x112   : > { %v5207_v8 = vcombine.low %v643_v58, %v647_v59 }
 0x113   : > { %3213 = vmatpush1.bf16.msra.mxu0 %v5143_v2  ;;  %3377 = vmatpush1.bf16.msra.mxu1 %v5145_v3  ;;  %v5208_v2 = vcombine.high %v643_v58, %v647_v59  ;;  %v5210_v3 = vcombine.high %v644_v61, %v648_v62  ;;  %v703_v58 = vld [vmem:[%s6337_s20 + $0x8e0] sm:$0xff]  ;;  %v700_v59 = vld [vmem:[%s6337_s20 + $0x8c8] sm:$0xff] }
 0x114   : > { %3214 = vmatprep.subr.bf16.mxu0 %v5152_v4  ;;  %3378 = vmatprep.subr.bf16.mxu1 %v5154_v5  ;;  %v651_v4 = vld [vmem:[%s6337_s20 + $0x740] sm:$0xff]  ;;  %v704_v61 = vld [vmem:[%s6337_s20 + $0x8e8] sm:$0xff] }
 0x115   : > { %v655_v5 = vld [vmem:[%s6337_s20 + $0x760] sm:$0xff] }
 0x116   : > { %v5215_v17 = vcombine.low %v651_v4, %v655_v5 }
 0x117   : > { %3215 = vmatpush1.bf16.msra.mxu0 %v5151_v11  ;;  %3379 = vmatpush1.bf16.msra.mxu1 %v5153_v12  ;;  %v5216_v11 = vcombine.high %v651_v4, %v655_v5  ;;  %v5218_v12 = vcombine.high %v652_v6, %v656_v7  ;;  %v711_v4 = vld [vmem:[%s6337_s20 + $0x920] sm:$0xff]  ;;  %v708_v5 = vld [vmem:[%s6337_s20 + $0x908] sm:$0xff] }
 0x118   : > { %3216 = vmatprep.subr.bf16.mxu0 %v5160_v13  ;;  %3380 = vmatprep.subr.bf16.mxu1 %v5162_v14  ;;  %v659_v13 = vld [vmem:[%s6337_s20 + $0x780] sm:$0xff]  ;;  %v712_v6 = vld [vmem:[%s6337_s20 + $0x928] sm:$0xff] }
 0x119   : > { %v663_v14 = vld [vmem:[%s6337_s20 + $0x7a0] sm:$0xff] }
 0x11a   : > { %v5223_v25 = vcombine.low %v659_v13, %v663_v14 }
 0x11b   : > { %3217 = vmatpush1.bf16.msra.mxu0 %v5159_v19  ;;  %3381 = vmatpush1.bf16.msra.mxu1 %v5161_v20  ;;  %v5224_v19 = vcombine.high %v659_v13, %v663_v14  ;;  %v5226_v20 = vcombine.high %v660_v15, %v664_v16  ;;  %v719_v13 = vld [vmem:[%s6337_s20 + $0x960] sm:$0xff]  ;;  %v716_v14 = vld [vmem:[%s6337_s20 + $0x948] sm:$0xff] }
 0x11c   : > { %3218 = vmatprep.subr.bf16.mxu0 %v5168_v21  ;;  %3382 = vmatprep.subr.bf16.mxu1 %v5170_v22  ;;  %v667_v21 = vld [vmem:[%s6337_s20 + $0x7c0] sm:$0xff]  ;;  %v720_v15 = vld [vmem:[%s6337_s20 + $0x968] sm:$0xff] }
 0x11d   : > { %v671_v22 = vld [vmem:[%s6337_s20 + $0x7e0] sm:$0xff] }
 0x11e   : > { %v5231_v33 = vcombine.low %v667_v21, %v671_v22 }
 0x11f   : > { %3219 = vmatpush1.bf16.msra.mxu0 %v5167_v28  ;;  %3383 = vmatpush1.bf16.msra.mxu1 %v5169_v60  ;;  %v5232_v28 = vcombine.high %v667_v21, %v671_v22  ;;  %v5234_v60 = vcombine.high %v668_v23, %v672_v24  ;;  %v727_v21 = vld [vmem:[%s6337_s20 + $0x9a0] sm:$0xff]  ;;  %v724_v22 = vld [vmem:[%s6337_s20 + $0x988] sm:$0xff] }
 0x120   : > { %3220 = vmatprep.subr.bf16.mxu0 %v5176_v29  ;;  %3384 = vmatprep.subr.bf16.mxu1 %v5178_v30  ;;  %v675_v29 = vld [vmem:[%s6337_s20 + $0x800] sm:$0xff]  ;;  %v728_v23 = vld [vmem:[%s6337_s20 + $0x9a8] sm:$0xff] }
 0x121   : > { %v679_v30 = vld [vmem:[%s6337_s20 + $0x820] sm:$0xff] }
 0x122   : > { %v5239_v43 = vcombine.low %v675_v29, %v679_v30 }
 0x123   : > { %3221 = vmatpush1.bf16.msra.mxu0 %v5175_v37  ;;  %3385 = vmatpush1.bf16.msra.mxu1 %v5177_v38  ;;  %v5240_v37 = vcombine.high %v675_v29, %v679_v30  ;;  %v5242_v38 = vcombine.high %v676_v31, %v680_v32  ;;  %v735_v29 = vld [vmem:[%s6337_s20 + $0x9e0] sm:$0xff]  ;;  %v732_v30 = vld [vmem:[%s6337_s20 + $0x9c8] sm:$0xff] }
 0x124   : > { %3222 = vmatprep.subr.bf16.mxu0 %v5184_v39  ;;  %3386 = vmatprep.subr.bf16.mxu1 %v5186_v40  ;;  %v683_v39 = vld [vmem:[%s6337_s20 + $0x840] sm:$0xff] }
 0x125   : > { %v687_v40 = vld [vmem:[%s6337_s20 + $0x860] sm:$0xff] }
 0x126   : > { %v5247_v52 = vcombine.low %v683_v39, %v687_v40 }
 0x127   : > { %3223 = vmatpush1.bf16.msra.mxu0 %v5183_v44  ;;  %3387 = vmatpush1.bf16.msra.mxu1 %v5185_v46  ;;  %v5241_v44 = vcombine.low %v676_v31, %v680_v32  ;;  %v5248_v46 = vcombine.high %v683_v39, %v687_v40  ;;  %v736_v31 = vld [vmem:[%s6337_s20 + $0x9e8] sm:$0xff]  ;;  %v743_v39 = vld [vmem:[%s6337_s20 + $0xa20] sm:$0xff] }
 0x128   : > { %3224 = vmatprep.subr.bf16.mxu0 %v5192_v47  ;;  %3388 = vmatprep.subr.bf16.mxu1 %v5194_v48  ;;  %v5250_v47 = vcombine.high %v684_v42, %v688_v54  ;;  %v691_v48 = vld [vmem:[%s6337_s20 + $0x880] sm:$0xff]  ;;  %v740_v40 = vld [vmem:[%s6337_s20 + $0xa08] sm:$0xff] }
 0x129   : > { %v5255_v62 = vcombine.low %v691_v48, %v695_v49 }
 0x12b   : > { %3225 = vmatpush1.bf16.msra.mxu0 %v5191_v53  ;;  %3389 = vmatpush1.bf16.msra.mxu1 %v5193_v55  ;;  %v5249_v53 = vcombine.low %v684_v42, %v688_v54  ;;  %v5256_v55 = vcombine.high %v691_v48, %v695_v49  ;;  %v744_v42 = vld [vmem:[%s6337_s20 + $0xa28] sm:$0xff]  ;;  %v751_v48 = vld [vmem:[%s6337_s20 + $0xa60] sm:$0xff] }
 0x12c   : > { %3226 = vmatprep.subr.bf16.mxu0 %v5200_v56  ;;  %3390 = vmatprep.subr.bf16.mxu1 %v5202_v57  ;;  %v5258_v56 = vcombine.high %v692_v50, %v696_v51  ;;  %v699_v57 = vld [vmem:[%s6337_s20 + $0x8c0] sm:$0xff]  ;;  %v748_v49 = vld [vmem:[%s6337_s20 + $0xa48] sm:$0xff] }
 0x12d   : > { %v5263_v7 = vcombine.low %v699_v57, %v703_v58 }
 0x12f   : > { %3227 = vmatpush1.bf16.msra.mxu0 %v5199_v63  ;;  %3391 = vmatpush1.bf16.msra.mxu1 %v5201_v1  ;;  %v5257_v63 = vcombine.low %v692_v50, %v696_v51  ;;  %v5264_v1 = vcombine.high %v699_v57, %v703_v58  ;;  %v752_v50 = vld [vmem:[%s6337_s20 + $0xa68] sm:$0xff]  ;;  %v759_v57 = vld [vmem:[%s6337_s20 + $0xaa0] sm:$0xff] }
 0x130   : > { %3228 = vmatprep.subr.bf16.mxu0 %v5208_v2  ;;  %3392 = vmatprep.subr.bf16.mxu1 %v5210_v3  ;;  %v5266_v2 = vcombine.high %v700_v59, %v704_v61  ;;  %v707_v3 = vld [vmem:[%s6337_s20 + $0x900] sm:$0xff]  ;;  %v756_v58 = vld [vmem:[%s6337_s20 + $0xa88] sm:$0xff] }
 0x131   : > { %v5271_v16 = vcombine.low %v707_v3, %v711_v4 }
 0x133   : > { %3229 = vmatpush1.bf16.msra.mxu0 %v5207_v8  ;;  %3393 = vmatpush1.bf16.msra.mxu1 %v5209_v9  ;;  %v5265_v8 = vcombine.low %v700_v59, %v704_v61  ;;  %v5272_v9 = vcombine.high %v707_v3, %v711_v4  ;;  %v760_v59 = vld [vmem:[%s6337_s20 + $0xaa8] sm:$0xff]  ;;  %v767_v3 = vld [vmem:[%s6337_s20 + $0xae0] sm:$0xff] }
 0x134   : > { %3230 = vmatprep.subr.bf16.mxu0 %v5216_v11  ;;  %3394 = vmatprep.subr.bf16.mxu1 %v5218_v12  ;;  %v5274_v11 = vcombine.high %v708_v5, %v712_v6  ;;  %v715_v12 = vld [vmem:[%s6337_s20 + $0x940] sm:$0xff]  ;;  %v764_v4 = vld [vmem:[%s6337_s20 + $0xac8] sm:$0xff] }
 0x135   : > { %v5279_v24 = vcombine.low %v715_v12, %v719_v13 }
 0x137   : > { %3231 = vmatpush1.bf16.msra.mxu0 %v5215_v17  ;;  %3395 = vmatpush1.bf16.msra.mxu1 %v5217_v18  ;;  %v5273_v17 = vcombine.low %v708_v5, %v712_v6  ;;  %v5280_v18 = vcombine.high %v715_v12, %v719_v13  ;;  %v768_v5 = vld [vmem:[%s6337_s20 + $0xae8] sm:$0xff]  ;;  %v775_v12 = vld [vmem:[%s6337_s20 + $0xb20] sm:$0xff] }
 0x138   : > { %3232 = vmatprep.subr.bf16.mxu0 %v5224_v19  ;;  %3396 = vmatprep.subr.bf16.mxu1 %v5226_v20  ;;  %v5282_v19 = vcombine.high %v716_v14, %v720_v15  ;;  %v723_v20 = vld [vmem:[%s6337_s20 + $0x980] sm:$0xff]  ;;  %v772_v13 = vld [vmem:[%s6337_s20 + $0xb08] sm:$0xff] }
 0x139   : > { %v5287_v32 = vcombine.low %v723_v20, %v727_v21 }
 0x13b   : > { %3233 = vmatpush1.bf16.msra.mxu0 %v5223_v25  ;;  %3397 = vmatpush1.bf16.msra.mxu1 %v5225_v27  ;;  %v5281_v25 = vcombine.low %v716_v14, %v720_v15  ;;  %v5288_v27 = vcombine.high %v723_v20, %v727_v21  ;;  %v776_v14 = vld [vmem:[%s6337_s20 + $0xb28] sm:$0xff]  ;;  %v783_v20 = vld [vmem:[%s6337_s20 + $0xb60] sm:$0xff] }
 0x13c   : > { %3234 = vmatprep.subr.bf16.mxu0 %v5232_v28  ;;  %3398 = vmatprep.subr.bf16.mxu1 %v5234_v60  ;;  %v5290_v28 = vcombine.high %v724_v22, %v728_v23  ;;  %v731_v60 = vld [vmem:[%s6337_s20 + $0x9c0] sm:$0xff]  ;;  %v780_v21 = vld [vmem:[%s6337_s20 + $0xb48] sm:$0xff] }
 0x13d   : > { %v5295_v54 = vcombine.low %v731_v60, %v735_v29 }
 0x13f   : > { %3235 = vmatpush1.bf16.msra.mxu0 %v5231_v33  ;;  %3399 = vmatpush1.bf16.msra.mxu1 %v5233_v34  ;;  %v5289_v33 = vcombine.low %v724_v22, %v728_v23  ;;  %v5296_v34 = vcombine.high %v731_v60, %v735_v29  ;;  %v784_v22 = vld [vmem:[%s6337_s20 + $0xb68] sm:$0xff]  ;;  %v791_v60 = vld [vmem:[%s6337_s20 + $0xba0] sm:$0xff] }
 0x140   : > { %3245 = vmatprep.subr.bf16.mxu0 %v5240_v37  ;;  %3409 = vmatprep.subr.bf16.mxu1 %v5242_v38  ;;  %v5298_v37 = vcombine.high %v732_v30, %v736_v31  ;;  %v739_v38 = vld [vmem:[%s6337_s20 + $0xa00] sm:$0xff]  ;;  %v788_v29 = vld [vmem:[%s6337_s20 + $0xb88] sm:$0xff] }
 0x141   : > { %v5303_v51 = vcombine.low %v739_v38, %v743_v39 }
 0x142   : > { %3237 = vmatmul.mubr.bf16.vlgmr.msra.gmra.mrb[0].mxu0 %v6543_v41  ;;  %3401 = vmatmul.mubr.bf16.vlgmr.msra.gmra.mrb[0].mxu1 %v6543_v41 }
 0x143   : > { %3246 = vmatpush1.bf16.msra.mxu0 %v5239_v43  ;;  %3410 = vmatpush1.bf16.msra.mxu1 %v5241_v44  ;;  %v5297_v43 = vcombine.low %v732_v30, %v736_v31  ;;  %v5304_v44 = vcombine.high %v739_v38, %v743_v39  ;;  %v792_v30 = vld [vmem:[%s6337_s20 + $0xba8] sm:$0xff]  ;;  %v799_v38 = vld [vmem:[%s6337_s20 + $0xbe0] sm:$0xff] }
 0x144   : > { %3247 = vmatprep.subr.bf16.mxu0 %v5248_v46  ;;  %3411 = vmatprep.subr.bf16.mxu1 %v5250_v47  ;;  %v5306_v46 = vcombine.high %v740_v40, %v744_v42  ;;  %v747_v47 = vld [vmem:[%s6337_s20 + $0xa40] sm:$0xff]  ;;  %v796_v39 = vld [vmem:[%s6337_s20 + $0xbc8] sm:$0xff] }
 0x145   : > { %3277 = vmatprep.mubr.bf16.mxu0 %v6472_v35  ;;  %3441 = vmatprep.mubr.bf16.mxu1 %v6472_v35  ;;  %v5311_v61 = vcombine.low %v747_v47, %v751_v48 }
 0x147   : > { %3248 = vmatpush1.bf16.msra.mxu0 %v5247_v52  ;;  %3412 = vmatpush1.bf16.msra.mxu1 %v5249_v53  ;;  %v5305_v52 = vcombine.low %v740_v40, %v744_v42  ;;  %v5312_v53 = vcombine.high %v747_v47, %v751_v48  ;;  %v800_v40 = vld [vmem:[%s6337_s20 + $0xbe8] sm:$0xff]  ;;  %v807_v47 = vld [vmem:[%s6337_s20 + $0xc20] sm:$0xff] }
 0x148   : > { %3249 = vmatprep.subr.bf16.mxu0 %v5256_v55  ;;  %3413 = vmatprep.subr.bf16.mxu1 %v5258_v56  ;;  %v5314_v55 = vcombine.high %v748_v49, %v752_v50  ;;  %v755_v56 = vld [vmem:[%s6337_s20 + $0xa80] sm:$0xff]  ;;  %v804_v48 = vld [vmem:[%s6337_s20 + $0xc08] sm:$0xff] }
 0x149   : > { %v5319_v6 = vcombine.low %v755_v56, %v759_v57 }
 0x14b   : > { %3250 = vmatpush1.bf16.msra.mxu0 %v5255_v62  ;;  %3414 = vmatpush1.bf16.msra.mxu1 %v5257_v63  ;;  %v5313_v62 = vcombine.low %v748_v49, %v752_v50  ;;  %v5320_v63 = vcombine.high %v755_v56, %v759_v57  ;;  %v808_v49 = vld [vmem:[%s6337_s20 + $0xc28] sm:$0xff]  ;;  %v815_v56 = vld [vmem:[%s6337_s20 + $0xc60] sm:$0xff] }
 0x14c   : > { %3251 = vmatprep.subr.bf16.mxu0 %v5264_v1  ;;  %3415 = vmatprep.subr.bf16.mxu1 %v5266_v2  ;;  %v5322_v1 = vcombine.high %v756_v58, %v760_v59  ;;  %v763_v2 = vld [vmem:[%s6337_s20 + $0xac0] sm:$0xff]  ;;  %v812_v57 = vld [vmem:[%s6337_s20 + $0xc48] sm:$0xff] }
 0x14d   : > { %v5327_v15 = vcombine.low %v763_v2, %v767_v3 }
 0x14f   : > { %3252 = vmatpush1.bf16.msra.mxu0 %v5263_v7  ;;  %3416 = vmatpush1.bf16.msra.mxu1 %v5265_v8  ;;  %v5321_v7 = vcombine.low %v756_v58, %v760_v59  ;;  %v5328_v8 = vcombine.high %v763_v2, %v767_v3  ;;  %v816_v58 = vld [vmem:[%s6337_s20 + $0xc68] sm:$0xff]  ;;  %v823_v2 = vld [vmem:[%s6337_s20 + $0xca0] sm:$0xff] }
 0x150   : > { %3253 = vmatprep.subr.bf16.mxu0 %v5272_v9  ;;  %3417 = vmatprep.subr.bf16.mxu1 %v5274_v11  ;;  %v5330_v9 = vcombine.high %v764_v4, %v768_v5  ;;  %v771_v11 = vld [vmem:[%s6337_s20 + $0xb00] sm:$0xff]  ;;  %v820_v3 = vld [vmem:[%s6337_s20 + $0xc88] sm:$0xff] }
 0x151   : > { %v5335_v23 = vcombine.low %v771_v11, %v775_v12 }
 0x153   : > { %3254 = vmatpush1.bf16.msra.mxu0 %v5271_v16  ;;  %3418 = vmatpush1.bf16.msra.mxu1 %v5273_v17  ;;  %v5329_v16 = vcombine.low %v764_v4, %v768_v5  ;;  %v5336_v17 = vcombine.high %v771_v11, %v775_v12  ;;  %v824_v4 = vld [vmem:[%s6337_s20 + $0xca8] sm:$0xff]  ;;  %v831_v11 = vld [vmem:[%s6337_s20 + $0xce0] sm:$0xff]  ;;  %v6071_v12 = vmov 0  }
 0x154   : > { %3255 = vmatprep.subr.bf16.mxu0 %v5280_v18  ;;  %3419 = vmatprep.subr.bf16.mxu1 %v5282_v19  ;;  %v5338_v18 = vcombine.high %v772_v13, %v776_v14  ;;  %v779_v19 = vld [vmem:[%s6337_s20 + $0xb40] sm:$0xff] }
 0x155   : > { %v5343_v31 = vcombine.low %v779_v19, %v783_v20 }
 0x157   : > { %3256 = vmatpush1.bf16.msra.mxu0 %v5279_v24  ;;  %3420 = vmatpush1.bf16.msra.mxu1 %v5281_v25  ;;  %v5337_v24 = vcombine.low %v772_v13, %v776_v14  ;;  %v5344_v25 = vcombine.high %v779_v19, %v783_v20  ;;  %v828_v13 = vld [vmem:[%s6337_s20 + $0xcc8] sm:$0xff]  ;;  %v835_v19 = vld [vmem:[%s6337_s20 + $0xd00] sm:$0xff] }
 0x158   : > { %3257 = vmatprep.subr.bf16.mxu0 %v5288_v27  ;;  %3421 = vmatprep.subr.bf16.mxu1 %v5290_v28  ;;  %v5346_v27 = vcombine.high %v780_v21, %v784_v22  ;;  %v787_v28 = vld [vmem:[%s6337_s20 + $0xb80] sm:$0xff]  ;;  %v832_v14 = vld [vmem:[%s6337_s20 + $0xce8] sm:$0xff] }
 0x159   : > { %v5351_v42 = vcombine.low %v787_v28, %v791_v60  ;;  %v839_v20 = vld [vmem:[%s6337_s20 + $0xd20] sm:$0xff] }
 0x15b   : > { %3258 = vmatpush1.bf16.msra.mxu0 %v5287_v32  ;;  %3422 = vmatpush1.bf16.msra.mxu1 %v5289_v33  ;;  %v5345_v32 = vcombine.low %v780_v21, %v784_v22  ;;  %v5352_v33 = vcombine.high %v787_v28, %v791_v60  ;;  %v836_v21 = vld [vmem:[%s6337_s20 + $0xd08] sm:$0xff]  ;;  %v843_v28 = vld [vmem:[%s6337_s20 + $0xd40] sm:$0xff] }
 0x15c   : > { %3259 = vmatprep.subr.bf16.mxu0 %v5296_v34  ;;  %3423 = vmatprep.subr.bf16.mxu1 %v5298_v37  ;;  %v5354_v34 = vcombine.high %v788_v29, %v792_v30  ;;  %v795_v37 = vld [vmem:[%s6337_s20 + $0xbc0] sm:$0xff]  ;;  %v840_v22 = vld [vmem:[%s6337_s20 + $0xd28] sm:$0xff] }
 0x15d   : > { %v5359_v50 = vcombine.low %v795_v37, %v799_v38  ;;  %v847_v60 = vld [vmem:[%s6337_s20 + $0xd60] sm:$0xff] }
 0x15f   : > { %3260 = vmatpush1.bf16.msra.mxu0 %v5295_v54  ;;  %3424 = vmatpush1.bf16.msra.mxu1 %v5297_v43  ;;  %v5353_v54 = vcombine.low %v788_v29, %v792_v30  ;;  %v5360_v43 = vcombine.high %v795_v37, %v799_v38  ;;  %v844_v29 = vld [vmem:[%s6337_s20 + $0xd48] sm:$0xff]  ;;  %v851_v37 = vld [vmem:[%s6337_s20 + $0xd80] sm:$0xff] }
 0x160   : > { %3261 = vmatprep.subr.bf16.mxu0 %v5304_v44  ;;  %3425 = vmatprep.subr.bf16.mxu1 %v5306_v46  ;;  %v5362_v44 = vcombine.high %v796_v39, %v800_v40  ;;  %v803_v46 = vld [vmem:[%s6337_s20 + $0xc00] sm:$0xff]  ;;  %v848_v30 = vld [vmem:[%s6337_s20 + $0xd68] sm:$0xff] }
 0x161   : > { %v5367_v59 = vcombine.low %v803_v46, %v807_v47  ;;  %v855_v38 = vld [vmem:[%s6337_s20 + $0xda0] sm:$0xff] }
 0x163   : > { %3262 = vmatpush1.bf16.msra.mxu0 %v5303_v51  ;;  %3426 = vmatpush1.bf16.msra.mxu1 %v5305_v52  ;;  %v5361_v51 = vcombine.low %v796_v39, %v800_v40  ;;  %v5368_v52 = vcombine.high %v803_v46, %v807_v47  ;;  %v852_v39 = vld [vmem:[%s6337_s20 + $0xd88] sm:$0xff]  ;;  %v859_v46 = vld [vmem:[%s6337_s20 + $0xdc0] sm:$0xff] }
 0x164   : > { %3263 = vmatprep.subr.bf16.mxu0 %v5312_v53  ;;  %3427 = vmatprep.subr.bf16.mxu1 %v5314_v55  ;;  %v5370_v53 = vcombine.high %v804_v48, %v808_v49  ;;  %v811_v55 = vld [vmem:[%s6337_s20 + $0xc40] sm:$0xff]  ;;  %v856_v40 = vld [vmem:[%s6337_s20 + $0xda8] sm:$0xff] }
 0x165   : > { %v5375_v5 = vcombine.low %v811_v55, %v815_v56  ;;  %v863_v47 = vld [vmem:[%s6337_s20 + $0xde0] sm:$0xff] }
 0x167   : > { %3264 = vmatpush1.bf16.msra.mxu0 %v5311_v61  ;;  %3428 = vmatpush1.bf16.msra.mxu1 %v5313_v62  ;;  %v5369_v61 = vcombine.low %v804_v48, %v808_v49  ;;  %v5376_v62 = vcombine.high %v811_v55, %v815_v56  ;;  %v860_v48 = vld [vmem:[%s6337_s20 + $0xdc8] sm:$0xff]  ;;  %v421_v55 = vld [vmem:[%s6337_s20 + $0x10] sm:$0xff] }
 0x168   : > { %3265 = vmatprep.subr.bf16.mxu0 %v5320_v63  ;;  %3429 = vmatprep.subr.bf16.mxu1 %v5322_v1  ;;  %v5378_v63 = vcombine.high %v812_v57, %v816_v58  ;;  %v819_v1 = vld [vmem:[%s6337_s20 + $0xc80] sm:$0xff]  ;;  %v864_v49 = vld [vmem:[%s6337_s20 + $0xde8] sm:$0xff]  ;;  %v425_v56 = vld [vmem:[%s6337_s20 + $0x30] sm:$0xff] }
 0x16b   : > { %3266 = vmatpush1.bf16.msra.mxu0 %v5319_v6  ;;  %3430 = vmatpush1.bf16.msra.mxu1 %v5321_v7  ;;  %v5377_v6 = vcombine.low %v812_v57, %v816_v58  ;;  %v5384_v7 = vcombine.high %v819_v1, %v823_v2  ;;  %v422_v57 = vld [vmem:[%s6337_s20 + $0x18] sm:$0xff] }
 0x16c   : > { %3267 = vmatprep.subr.bf16.mxu0 %v5328_v8  ;;  %3431 = vmatprep.subr.bf16.mxu1 %v5330_v9  ;;  %v5386_v8 = vcombine.high %v820_v3, %v824_v4  ;;  %v827_v9 = vld [vmem:[%s6337_s20 + $0xcc0] sm:$0xff]  ;;  %v426_v58 = vld [vmem:[%s6337_s20 + $0x38] sm:$0xff] }
 0x16f   : > { %3268 = vmatpush1.bf16.msra.mxu0 %v5327_v15  ;;  %3432 = vmatpush1.bf16.msra.mxu1 %v5329_v16  ;;  %v5383_v15 = vcombine.low %v819_v1, %v823_v2  ;;  %v5385_v16 = vcombine.low %v820_v3, %v824_v4  ;;  %v429_v1 = vld [vmem:[%s6337_s20 + $0x50] sm:$0xff]  ;;  %v6651_v3 = vcombine.high %v6475_v36, %v6475_v36  ;;  %v430_v4 = vld [vmem:[%s6337_s20 + $0x58] sm:$0xff] }
 0x170   : > { %3269 = vmatprep.subr.bf16.mxu0 %v5336_v17  ;;  %3433 = vmatprep.subr.bf16.mxu1 %v5338_v18  ;;  %v5392_v17 = vcombine.high %v827_v9, %v831_v11  ;;  %v5394_v18 = vcombine.high %v828_v13, %v832_v14  ;;  %v433_v2 = vld [vmem:[%s6337_s20 + $0x70] sm:$0xff] }
 0x173   : > { %3270 = vmatpush1.bf16.msra.mxu0 %v5335_v23  ;;  %3434 = vmatpush1.bf16.msra.mxu1 %v5337_v24  ;;  %v5391_v23 = vcombine.low %v827_v9, %v831_v11  ;;  %v5393_v24 = vcombine.low %v828_v13, %v832_v14  ;;  %v437_v11 = vld [vmem:[%s6337_s20 + $0x90] sm:$0xff]  ;;  %v438_v14 = vld [vmem:[%s6337_s20 + $0x98] sm:$0xff] }
 0x174   : > { %3271 = vmatprep.subr.bf16.mxu0 %v5344_v25  ;;  %3435 = vmatprep.subr.bf16.mxu1 %v5346_v27  ;;  %v5400_v25 = vcombine.high %v835_v19, %v839_v20  ;;  %v5402_v27 = vcombine.high %v836_v21, %v840_v22  ;;  %v441_v13 = vld [vmem:[%s6337_s20 + $0xb0] sm:$0xff] }
 0x177   : > { %3272 = vmatpush1.bf16.msra.mxu0 %v5343_v31  ;;  %3436 = vmatpush1.bf16.msra.mxu1 %v5345_v32  ;;  %v5399_v31 = vcombine.low %v835_v19, %v839_v20  ;;  %v5401_v32 = vcombine.low %v836_v21, %v840_v22  ;;  %v445_v20 = vld [vmem:[%s6337_s20 + $0xd0] sm:$0xff]  ;;  %v446_v22 = vld [vmem:[%s6337_s20 + $0xd8] sm:$0xff] }
 0x178   : > { %3273 = vmatprep.subr.bf16.mxu0 %v5352_v33  ;;  %3437 = vmatprep.subr.bf16.mxu1 %v5354_v34  ;;  %v5408_v33 = vcombine.high %v843_v28, %v847_v60  ;;  %v5410_v34 = vcombine.high %v844_v29, %v848_v30  ;;  %v449_v21 = vld [vmem:[%s6337_s20 + $0xf0] sm:$0xff] }
 0x17b   : > { %3274 = vmatpush1.bf16.msra.mxu0 %v5351_v42  ;;  %3438 = vmatpush1.bf16.msra.mxu1 %v5353_v54  ;;  %v5407_v42 = vcombine.low %v843_v28, %v847_v60  ;;  %v5409_v54 = vcombine.low %v844_v29, %v848_v30  ;;  %v453_v60 = vld [vmem:[%s6337_s20 + $0x110] sm:$0xff]  ;;  %v454_v30 = vld [vmem:[%s6337_s20 + $0x118] sm:$0xff] }
 0x17c   : > { %3275 = vmatprep.subr.bf16.mxu0 %v5360_v43  ;;  %3439 = vmatprep.subr.bf16.mxu1 %v5362_v44  ;;  %v5416_v43 = vcombine.high %v851_v37, %v855_v38  ;;  %v5418_v44 = vcombine.high %v852_v39, %v856_v40  ;;  %v457_v29 = vld [vmem:[%s6337_s20 + $0x130] sm:$0xff] }
 0x17f   : > { %3276 = vmatpush1.bf16.msra.mxu0 %v5359_v50  ;;  %3440 = vmatpush1.bf16.msra.mxu1 %v5361_v51  ;;  %v5415_v50 = vcombine.low %v851_v37, %v855_v38  ;;  %v5417_v51 = vcombine.low %v852_v39, %v856_v40  ;;  %v461_v37 = vld [vmem:[%s6337_s20 + $0x150] sm:$0xff]  ;;  %v462_v39 = vld [vmem:[%s6337_s20 + $0x158] sm:$0xff] }
 0x180   : > { %3286 = vmatprep.subr.bf16.mxu0 %v5368_v52  ;;  %3450 = vmatprep.subr.bf16.mxu1 %v5370_v53  ;;  %v5424_v52 = vcombine.high %v859_v46, %v863_v47  ;;  %v5426_v53 = vcombine.high %v860_v48, %v864_v49  ;;  %v465_v38 = vld [vmem:[%s6337_s20 + $0x170] sm:$0xff]  ;;  %v466_v40 = vld [vmem:[%s6337_s20 + $0x178] sm:$0xff] }
 0x182   : > { %3278 = vmatmul.mubr.bf16.vlgmr.msra.gmra.mrb[0].mxu0 %v6475_v36  ;;  %3442 = vmatmul.mubr.bf16.vlgmr.msra.gmra.mrb[0].mxu1 %v6475_v36 }
 0x183   : > { %3287 = vmatpush1.bf16.msra.mxu0 %v5367_v59  ;;  %3451 = vmatpush1.bf16.msra.mxu1 %v5369_v61  ;;  %v5423_v59 = vcombine.low %v859_v46, %v863_v47  ;;  %v5425_v61 = vcombine.low %v860_v48, %v864_v49  ;;  %v469_v46 = vld [vmem:[%s6337_s20 + $0x190] sm:$0xff]  ;;  %v470_v48 = vld [vmem:[%s6337_s20 + $0x198] sm:$0xff] }
 0x184   : > { %3288 = vmatprep.subr.bf16.mxu0 %v5376_v62  ;;  %3452 = vmatprep.subr.bf16.mxu1 %v5378_v63  ;;  %v4988_v62 = vcombine.high %v421_v55, %v425_v56  ;;  %v4990_v63 = vcombine.high %v422_v57, %v426_v58  ;;  %v473_v47 = vld [vmem:[%s6337_s20 + $0x1b0] sm:$0xff]  ;;  %v474_v49 = vld [vmem:[%s6337_s20 + $0x1b8] sm:$0xff] }
 0x185   : > { %3318 = vmatprep.mubr.bf16.mxu0 %v6071_v12  ;;  %3482 = vmatprep.mubr.bf16.mxu1 %v6071_v12 }
 0x187   : > { %3289 = vmatpush1.bf16.msra.mxu0 %v5375_v5  ;;  %3453 = vmatpush1.bf16.msra.mxu1 %v5377_v6  ;;  %v434_v5 = vld [vmem:[%s6337_s20 + $0x78] sm:$0xff]  ;;  %v4987_v6 = vcombine.low %v421_v55, %v425_v56  ;;  %v477_v55 = vld [vmem:[%s6337_s20 + $0x1d0] sm:$0xff] }
 0x188   : > { %3290 = vmatprep.subr.bf16.mxu0 %v5384_v7  ;;  %3454 = vmatprep.subr.bf16.mxu1 %v5386_v8  ;;  %v4989_v7 = vcombine.low %v422_v57, %v426_v58  ;;  %v4996_v8 = vcombine.high %v429_v1, %v433_v2  ;;  %v4998_v9 = vcombine.high %v430_v4, %v434_v5  ;;  %v481_v56 = vld [vmem:[%s6337_s20 + $0x1f0] sm:$0xff]  ;;  %v478_v57 = vld [vmem:[%s6337_s20 + $0x1d8] sm:$0xff] }
 0x189   : > { %v482_v58 = vld [vmem:[%s6337_s20 + $0x1f8] sm:$0xff] }
 0x18b   : > { %3291 = vmatpush1.bf16.msra.mxu0 %v5383_v15  ;;  %3455 = vmatpush1.bf16.msra.mxu1 %v5385_v16  ;;  %v442_v15 = vld [vmem:[%s6337_s20 + $0xb8] sm:$0xff]  ;;  %v4995_v16 = vcombine.low %v429_v1, %v433_v2  ;;  %v485_v1 = vld [vmem:[%s6337_s20 + $0x210] sm:$0xff] }
 0x18c   : > { %3292 = vmatprep.subr.bf16.mxu0 %v5392_v17  ;;  %3456 = vmatprep.subr.bf16.mxu1 %v5394_v18  ;;  %v4997_v17 = vcombine.low %v430_v4, %v434_v5  ;;  %v5004_v18 = vcombine.high %v437_v11, %v441_v13  ;;  %v5006_v19 = vcombine.high %v438_v14, %v442_v15  ;;  %v489_v2 = vld [vmem:[%s6337_s20 + $0x230] sm:$0xff]  ;;  %v486_v4 = vld [vmem:[%s6337_s20 + $0x218] sm:$0xff] }
 0x18d   : > { %v490_v5 = vld [vmem:[%s6337_s20 + $0x238] sm:$0xff] }
 0x18f   : > { %3293 = vmatpush1.bf16.msra.mxu0 %v5391_v23  ;;  %3457 = vmatpush1.bf16.msra.mxu1 %v5393_v24  ;;  %v450_v23 = vld [vmem:[%s6337_s20 + $0xf8] sm:$0xff]  ;;  %v5003_v24 = vcombine.low %v437_v11, %v441_v13  ;;  %v493_v11 = vld [vmem:[%s6337_s20 + $0x250] sm:$0xff] }
 0x190   : > { %3294 = vmatprep.subr.bf16.mxu0 %v5400_v25  ;;  %3458 = vmatprep.subr.bf16.mxu1 %v5402_v27  ;;  %v5005_v25 = vcombine.low %v438_v14, %v442_v15  ;;  %v5012_v27 = vcombine.high %v445_v20, %v449_v21  ;;  %v5014_v28 = vcombine.high %v446_v22, %v450_v23  ;;  %v497_v13 = vld [vmem:[%s6337_s20 + $0x270] sm:$0xff]  ;;  %v494_v14 = vld [vmem:[%s6337_s20 + $0x258] sm:$0xff] }
 0x191   : > { %v498_v15 = vld [vmem:[%s6337_s20 + $0x278] sm:$0xff] }
 0x193   : > { %3295 = vmatpush1.bf16.msra.mxu0 %v5399_v31  ;;  %3459 = vmatpush1.bf16.msra.mxu1 %v5401_v32  ;;  %v458_v31 = vld [vmem:[%s6337_s20 + $0x138] sm:$0xff]  ;;  %v5011_v32 = vcombine.low %v445_v20, %v449_v21  ;;  %v501_v20 = vld [vmem:[%s6337_s20 + $0x290] sm:$0xff] }
 0x194   : > { %3296 = vmatprep.subr.bf16.mxu0 %v5408_v33  ;;  %3460 = vmatprep.subr.bf16.mxu1 %v5410_v34  ;;  %v5020_v33 = vcombine.high %v453_v60, %v457_v29  ;;  %v5022_v34 = vcombine.high %v454_v30, %v458_v31  ;;  %v505_v21 = vld [vmem:[%s6337_s20 + $0x2b0] sm:$0xff] }
 0x197   : > { %3297 = vmatpush1.bf16.msra.mxu0 %v5407_v42  ;;  %3461 = vmatpush1.bf16.msra.mxu1 %v5409_v54  ;;  %v5019_v42 = vcombine.low %v453_v60, %v457_v29  ;;  %v5021_v54 = vcombine.low %v454_v30, %v458_v31  ;;  %v509_v60 = vld [vmem:[%s6337_s20 + $0x2d0] sm:$0xff]  ;;  %v510_v30 = vld [vmem:[%s6337_s20 + $0x2d8] sm:$0xff] }
 0x198   : > { %3298 = vmatprep.subr.bf16.mxu0 %v5416_v43  ;;  %3462 = vmatprep.subr.bf16.mxu1 %v5418_v44  ;;  %v5028_v43 = vcombine.high %v461_v37, %v465_v38  ;;  %v5030_v44 = vcombine.high %v462_v39, %v466_v40  ;;  %v513_v29 = vld [vmem:[%s6337_s20 + $0x2f0] sm:$0xff]  ;;  %v514_v31 = vld [vmem:[%s6337_s20 + $0x2f8] sm:$0xff] }
 0x19b   : > { %3299 = vmatpush1.bf16.msra.mxu0 %v5415_v50  ;;  %3463 = vmatpush1.bf16.msra.mxu1 %v5417_v51  ;;  %v5027_v50 = vcombine.low %v461_v37, %v465_v38  ;;  %v5029_v51 = vcombine.low %v462_v39, %v466_v40  ;;  %v517_v37 = vld [vmem:[%s6337_s20 + $0x310] sm:$0xff]  ;;  %v518_v39 = vld [vmem:[%s6337_s20 + $0x318] sm:$0xff] }
 0x19c   : > { %3300 = vmatprep.subr.bf16.mxu0 %v5424_v52  ;;  %3464 = vmatprep.subr.bf16.mxu1 %v5426_v53  ;;  %v5036_v52 = vcombine.high %v469_v46, %v473_v47  ;;  %v5038_v53 = vcombine.high %v470_v48, %v474_v49  ;;  %v521_v38 = vld [vmem:[%s6337_s20 + $0x330] sm:$0xff]  ;;  %v522_v40 = vld [vmem:[%s6337_s20 + $0x338] sm:$0xff] }
 0x19f   : > { %3301 = vmatpush1.bf16.msra.mxu0 %v5423_v59  ;;  %3465 = vmatpush1.bf16.msra.mxu1 %v5425_v61  ;;  %v5035_v59 = vcombine.low %v469_v46, %v473_v47  ;;  %v5037_v61 = vcombine.low %v470_v48, %v474_v49  ;;  %v525_v46 = vld [vmem:[%s6337_s20 + $0x350] sm:$0xff]  ;;  %v526_v48 = vld [vmem:[%s6337_s20 + $0x358] sm:$0xff] }
 0x1a0   : > { %3491 = vmatprep.subr.bf16.mxu0 %v4988_v62  ;;  %3655 = vmatprep.subr.bf16.mxu1 %v4990_v63  ;;  %v5044_v62 = vcombine.high %v477_v55, %v481_v56  ;;  %v5046_v63 = vcombine.high %v478_v57, %v482_v58  ;;  %v529_v47 = vld [vmem:[%s6337_s20 + $0x370] sm:$0xff]  ;;  %v530_v49 = vld [vmem:[%s6337_s20 + $0x378] sm:$0xff] }
 0x1a2   : > { %3319 = vmatmul.mubr.bf16.vlgmr.msra.gmra.mrb[0].mxu0 %v6651_v3  ;;  %3483 = vmatmul.mubr.bf16.vlgmr.msra.gmra.mrb[0].mxu1 %v6651_v3 }
 0x1a3   : > { %3492 = vmatpush1.bf16.msra.mxu0 %v4987_v6  ;;  %3656 = vmatpush1.bf16.msra.mxu1 %v4989_v7  ;;  %v5043_v6 = vcombine.low %v477_v55, %v481_v56  ;;  %v5045_v7 = vcombine.low %v478_v57, %v482_v58  ;;  %v533_v55 = vld [vmem:[%s6337_s20 + $0x390] sm:$0xff]  ;;  %v534_v57 = vld [vmem:[%s6337_s20 + $0x398] sm:$0xff] }
 0x1a4   : > { %3493 = vmatprep.subr.bf16.mxu0 %v4996_v8  ;;  %3657 = vmatprep.subr.bf16.mxu1 %v4998_v9  ;;  %v5052_v8 = vcombine.high %v485_v1, %v489_v2  ;;  %v5054_v9 = vcombine.high %v486_v4, %v490_v5  ;;  %v537_v56 = vld [vmem:[%s6337_s20 + $0x3b0] sm:$0xff]  ;;  %v538_v58 = vld [vmem:[%s6337_s20 + $0x3b8] sm:$0xff] }
 0x1a5   : > { %3523 = vmatprep.mubr.bf16.mxu0 %v6416_v10  ;;  %3687 = vmatprep.mubr.bf16.mxu1 %v6416_v10  ;;  %v5013_v10 = vcombine.low %v446_v22, %v450_v23  ;;  %v502_v22 = vld [vmem:[%s6337_s20 + $0x298] sm:$0xff] }
 0x1a6   : > { %v506_v23 = vld [vmem:[%s6337_s20 + $0x2b8] sm:$0xff] }
 0x1a7   : > { %3494 = vmatpush1.bf16.msra.mxu0 %v4995_v16  ;;  %3658 = vmatpush1.bf16.msra.mxu1 %v4997_v17  ;;  %v5051_v16 = vcombine.low %v485_v1, %v489_v2  ;;  %v5053_v17 = vcombine.low %v486_v4, %v490_v5  ;;  %v541_v1 = vld [vmem:[%s6337_s20 + $0x3d0] sm:$0xff]  ;;  %v542_v4 = vld [vmem:[%s6337_s20 + $0x3d8] sm:$0xff] }
 0x1a8   : > { %3495 = vmatprep.subr.bf16.mxu0 %v5004_v18  ;;  %3659 = vmatprep.subr.bf16.mxu1 %v5006_v19  ;;  %v5060_v18 = vcombine.high %v493_v11, %v497_v13  ;;  %v5062_v19 = vcombine.high %v494_v14, %v498_v15  ;;  %v545_v2 = vld [vmem:[%s6337_s20 + $0x3f0] sm:$0xff]  ;;  %v546_v5 = vld [vmem:[%s6337_s20 + $0x3f8] sm:$0xff] }
 0x1ab   : > { %3496 = vmatpush1.bf16.msra.mxu0 %v5003_v24  ;;  %3660 = vmatpush1.bf16.msra.mxu1 %v5005_v25  ;;  %v5059_v24 = vcombine.low %v493_v11, %v497_v13  ;;  %v5061_v25 = vcombine.low %v494_v14, %v498_v15  ;;  %v549_v11 = vld [vmem:[%s6337_s20 + $0x410] sm:$0xff]  ;;  %v550_v14 = vld [vmem:[%s6337_s20 + $0x418] sm:$0xff] }
 0x1ac   : > { %3497 = vmatprep.subr.bf16.mxu0 %v5012_v27  ;;  %3661 = vmatprep.subr.bf16.mxu1 %v5014_v28  ;;  %v5068_v27 = vcombine.high %v501_v20, %v505_v21  ;;  %v5070_v28 = vcombine.high %v502_v22, %v506_v23  ;;  %v553_v13 = vld [vmem:[%s6337_s20 + $0x430] sm:$0xff]  ;;  %v554_v15 = vld [vmem:[%s6337_s20 + $0x438] sm:$0xff] }
 0x1af   : > { %3498 = vmatpush1.bf16.msra.mxu0 %v5011_v32  ;;  %3662 = vmatpush1.bf16.msra.mxu1 %v5013_v10  ;;  %v5067_v32 = vcombine.low %v501_v20, %v505_v21  ;;  %v5069_v10 = vcombine.low %v502_v22, %v506_v23  ;;  %v557_v20 = vld [vmem:[%s6337_s20 + $0x450] sm:$0xff]  ;;  %v558_v22 = vld [vmem:[%s6337_s20 + $0x458] sm:$0xff] }
 0x1b0   : > { %3499 = vmatprep.subr.bf16.mxu0 %v5020_v33  ;;  %3663 = vmatprep.subr.bf16.mxu1 %v5022_v34  ;;  %v5076_v33 = vcombine.high %v509_v60, %v513_v29  ;;  %v5078_v34 = vcombine.high %v510_v30, %v514_v31  ;;  %v561_v21 = vld [vmem:[%s6337_s20 + $0x470] sm:$0xff]  ;;  %v562_v23 = vld [vmem:[%s6337_s20 + $0x478] sm:$0xff] }
 0x1b3   : > { %3500 = vmatpush1.bf16.msra.mxu0 %v5019_v42  ;;  %3664 = vmatpush1.bf16.msra.mxu1 %v5021_v54  ;;  %v5075_v42 = vcombine.low %v509_v60, %v513_v29  ;;  %v5077_v54 = vcombine.low %v510_v30, %v514_v31  ;;  %v565_v60 = vld [vmem:[%s6337_s20 + $0x490] sm:$0xff]  ;;  %v566_v30 = vld [vmem:[%s6337_s20 + $0x498] sm:$0xff] }
 0x1b4   : > { %3501 = vmatprep.subr.bf16.mxu0 %v5028_v43  ;;  %3665 = vmatprep.subr.bf16.mxu1 %v5030_v44  ;;  %v5084_v43 = vcombine.high %v517_v37, %v521_v38  ;;  %v5086_v44 = vcombine.high %v518_v39, %v522_v40  ;;  %v569_v29 = vld [vmem:[%s6337_s20 + $0x4b0] sm:$0xff]  ;;  %v570_v31 = vld [vmem:[%s6337_s20 + $0x4b8] sm:$0xff] }
 0x1b7   : > { %3502 = vmatpush1.bf16.msra.mxu0 %v5027_v50  ;;  %3666 = vmatpush1.bf16.msra.mxu1 %v5029_v51  ;;  %v5083_v50 = vcombine.low %v517_v37, %v521_v38  ;;  %v5085_v51 = vcombine.low %v518_v39, %v522_v40  ;;  %v573_v37 = vld [vmem:[%s6337_s20 + $0x4d0] sm:$0xff]  ;;  %v574_v39 = vld [vmem:[%s6337_s20 + $0x4d8] sm:$0xff] }
 0x1b8   : > { %3503 = vmatprep.subr.bf16.mxu0 %v5036_v52  ;;  %3667 = vmatprep.subr.bf16.mxu1 %v5038_v53  ;;  %v5092_v52 = vcombine.high %v525_v46, %v529_v47  ;;  %v5094_v53 = vcombine.high %v526_v48, %v530_v49  ;;  %v577_v38 = vld [vmem:[%s6337_s20 + $0x4f0] sm:$0xff]  ;;  %v578_v40 = vld [vmem:[%s6337_s20 + $0x4f8] sm:$0xff] }
 0x1bb   : > { %3504 = vmatpush1.bf16.msra.mxu0 %v5035_v59  ;;  %3668 = vmatpush1.bf16.msra.mxu1 %v5037_v61  ;;  %v5091_v59 = vcombine.low %v525_v46, %v529_v47  ;;  %v5093_v61 = vcombine.low %v526_v48, %v530_v49  ;;  %v585_v46 = vld [vmem:[%s6337_s20 + $0x530] sm:$0xff]  ;;  %v582_v47 = vld [vmem:[%s6337_s20 + $0x518] sm:$0xff]  ;;  %v5139_v49 = vcombine.low %v573_v37, %v577_v38 }
 0x1bc   : > { %3505 = vmatprep.subr.bf16.mxu0 %v5044_v62  ;;  %3669 = vmatprep.subr.bf16.mxu1 %v5046_v63  ;;  %v5100_v62 = vcombine.high %v533_v55, %v537_v56  ;;  %v5102_v63 = vcombine.high %v534_v57, %v538_v58  ;;  %v586_v48 = vld [vmem:[%s6337_s20 + $0x538] sm:$0xff] }
 0x1bf   : > { %3506 = vmatpush1.bf16.msra.mxu0 %v5043_v6  ;;  %3670 = vmatpush1.bf16.msra.mxu1 %v5045_v7  ;;  %v5099_v6 = vcombine.low %v533_v55, %v537_v56  ;;  %v5101_v7 = vcombine.low %v534_v57, %v538_v58  ;;  %v590_v55 = vld [vmem:[%s6337_s20 + $0x558] sm:$0xff]  ;;  %v5149_v58 = vcombine.low %v582_v47, %v586_v48 }
 0x1c0   : > { %3507 = vmatprep.subr.bf16.mxu0 %v5052_v8  ;;  %3671 = vmatprep.subr.bf16.mxu1 %v5054_v9  ;;  %v5108_v8 = vcombine.high %v541_v1, %v545_v2  ;;  %v5110_v9 = vcombine.high %v542_v4, %v546_v5  ;;  %v594_v56 = vld [vmem:[%s6337_s20 + $0x578] sm:$0xff] }
 0x1c3   : > { %3508 = vmatpush1.bf16.msra.mxu0 %v5051_v16  ;;  %3672 = vmatpush1.bf16.msra.mxu1 %v5053_v17  ;;  %v5107_v16 = vcombine.low %v541_v1, %v545_v2  ;;  %v5109_v17 = vcombine.low %v542_v4, %v546_v5  ;;  %v598_v1 = vld [vmem:[%s6337_s20 + $0x598] sm:$0xff]  ;;  %v5157_v5 = vcombine.low %v590_v55, %v594_v56 }
 0x1c4   : > { %3509 = vmatprep.subr.bf16.mxu0 %v5060_v18  ;;  %3673 = vmatprep.subr.bf16.mxu1 %v5062_v19  ;;  %v5116_v18 = vcombine.high %v549_v11, %v553_v13  ;;  %v5118_v19 = vcombine.high %v550_v14, %v554_v15  ;;  %v602_v2 = vld [vmem:[%s6337_s20 + $0x5b8] sm:$0xff] }
 0x1c7   : > { %3510 = vmatpush1.bf16.msra.mxu0 %v5059_v24  ;;  %3674 = vmatpush1.bf16.msra.mxu1 %v5061_v25  ;;  %v5115_v24 = vcombine.low %v549_v11, %v553_v13  ;;  %v5117_v25 = vcombine.low %v550_v14, %v554_v15  ;;  %v606_v11 = vld [vmem:[%s6337_s20 + $0x5d8] sm:$0xff]  ;;  %v5165_v15 = vcombine.low %v598_v1, %v602_v2 }
 0x1c8   : > { %3511 = vmatprep.subr.bf16.mxu0 %v5068_v27  ;;  %3675 = vmatprep.subr.bf16.mxu1 %v5070_v28  ;;  %v5124_v27 = vcombine.high %v557_v20, %v561_v21  ;;  %v5126_v28 = vcombine.high %v558_v22, %v562_v23  ;;  %v610_v13 = vld [vmem:[%s6337_s20 + $0x5f8] sm:$0xff] }
 0x1cb   : > { %3512 = vmatpush1.bf16.msra.mxu0 %v5067_v32  ;;  %3676 = vmatpush1.bf16.msra.mxu1 %v5069_v10  ;;  %v5123_v32 = vcombine.low %v557_v20, %v561_v21  ;;  %v5125_v10 = vcombine.low %v558_v22, %v562_v23  ;;  %v614_v20 = vld [vmem:[%s6337_s20 + $0x618] sm:$0xff]  ;;  %v5173_v23 = vcombine.low %v606_v11, %v610_v13 }
 0x1cc   : > { %3513 = vmatprep.subr.bf16.mxu0 %v5076_v33  ;;  %3677 = vmatprep.subr.bf16.mxu1 %v5078_v34  ;;  %v5132_v33 = vcombine.high %v565_v60, %v569_v29  ;;  %v5134_v34 = vcombine.high %v566_v30, %v570_v31  ;;  %v618_v21 = vld [vmem:[%s6337_s20 + $0x638] sm:$0xff] }
 0x1cf   : > { %3514 = vmatpush1.bf16.msra.mxu0 %v5075_v42  ;;  %3678 = vmatpush1.bf16.msra.mxu1 %v5077_v54  ;;  %v5133_v42 = vcombine.low %v566_v30, %v570_v31  ;;  %v5140_v54 = vcombine.high %v573_v37, %v577_v38  ;;  %v5181_v31 = vcombine.low %v614_v20, %v618_v21  ;;  %v630_v37 = vld [vmem:[%s6337_s20 + $0x698] sm:$0xff] }
 0x1d0   : > { %3515 = vmatprep.subr.bf16.mxu0 %v5084_v43  ;;  %3679 = vmatprep.subr.bf16.mxu1 %v5086_v44  ;;  %v5142_v43 = vcombine.high %v574_v39, %v578_v40  ;;  %v581_v44 = vld [vmem:[%s6337_s20 + $0x510] sm:$0xff]  ;;  %v634_v38 = vld [vmem:[%s6337_s20 + $0x6b8] sm:$0xff] }
 0x1d1   : > { %v5147_v57 = vcombine.low %v581_v44, %v585_v46 }
 0x1d3   : > { %3516 = vmatpush1.bf16.msra.mxu0 %v5083_v50  ;;  %3680 = vmatpush1.bf16.msra.mxu1 %v5085_v51  ;;  %v5148_v50 = vcombine.high %v581_v44, %v585_v46  ;;  %v5150_v51 = vcombine.high %v582_v47, %v586_v48  ;;  %v638_v44 = vld [vmem:[%s6337_s20 + $0x6d8] sm:$0xff]  ;;  %v5197_v48 = vcombine.low %v630_v37, %v634_v38 }
 0x1d4   : > { %3517 = vmatprep.subr.bf16.mxu0 %v5092_v52  ;;  %3681 = vmatprep.subr.bf16.mxu1 %v5094_v53  ;;  %v589_v52 = vld [vmem:[%s6337_s20 + $0x550] sm:$0xff]  ;;  %v642_v46 = vld [vmem:[%s6337_s20 + $0x6f8] sm:$0xff] }
 0x1d5   : > { %v593_v53 = vld [vmem:[%s6337_s20 + $0x570] sm:$0xff] }
 0x1d6   : > { %v5155_v4 = vcombine.low %v589_v52, %v593_v53 }
 0x1d7   : > { %3518 = vmatpush1.bf16.msra.mxu0 %v5091_v59  ;;  %3682 = vmatpush1.bf16.msra.mxu1 %v5093_v61  ;;  %v5156_v59 = vcombine.high %v589_v52, %v593_v53  ;;  %v5158_v61 = vcombine.high %v590_v55, %v594_v56  ;;  %v646_v52 = vld [vmem:[%s6337_s20 + $0x718] sm:$0xff]  ;;  %v5205_v56 = vcombine.low %v638_v44, %v642_v46 }
 0x1d8   : > { %3519 = vmatprep.subr.bf16.mxu0 %v5100_v62  ;;  %3683 = vmatprep.subr.bf16.mxu1 %v5102_v63  ;;  %v597_v62 = vld [vmem:[%s6337_s20 + $0x590] sm:$0xff]  ;;  %v650_v53 = vld [vmem:[%s6337_s20 + $0x738] sm:$0xff] }
 0x1d9   : > { %v601_v63 = vld [vmem:[%s6337_s20 + $0x5b0] sm:$0xff] }
 0x1da   : > { %v5163_v14 = vcombine.low %v597_v62, %v601_v63 }
 0x1db   : > { %3520 = vmatpush1.bf16.msra.mxu0 %v5099_v6  ;;  %3684 = vmatpush1.bf16.msra.mxu1 %v5101_v7  ;;  %v5164_v6 = vcombine.high %v597_v62, %v601_v63  ;;  %v5166_v7 = vcombine.high %v598_v1, %v602_v2  ;;  %v654_v62 = vld [vmem:[%s6337_s20 + $0x758] sm:$0xff]  ;;  %v5213_v2 = vcombine.low %v646_v52, %v650_v53 }
 0x1dc   : > { %3521 = vmatprep.subr.bf16.mxu0 %v5108_v8  ;;  %3685 = vmatprep.subr.bf16.mxu1 %v5110_v9  ;;  %v605_v8 = vld [vmem:[%s6337_s20 + $0x5d0] sm:$0xff]  ;;  %v658_v63 = vld [vmem:[%s6337_s20 + $0x778] sm:$0xff] }
 0x1dd   : > { %v609_v9 = vld [vmem:[%s6337_s20 + $0x5f0] sm:$0xff] }
 0x1de   : > { %v5171_v22 = vcombine.low %v605_v8, %v609_v9 }
 0x1df   : > { %3522 = vmatpush1.bf16.msra.mxu0 %v5107_v16  ;;  %3686 = vmatpush1.bf16.msra.mxu1 %v5109_v17  ;;  %v5172_v16 = vcombine.high %v605_v8, %v609_v9  ;;  %v5174_v17 = vcombine.high %v606_v11, %v610_v13  ;;  %v662_v8 = vld [vmem:[%s6337_s20 + $0x798] sm:$0xff]  ;;  %v5221_v13 = vcombine.low %v654_v62, %v658_v63 }
 0x1e0   : > { %3532 = vmatprep.subr.bf16.mxu0 %v5116_v18  ;;  %3696 = vmatprep.subr.bf16.mxu1 %v5118_v19  ;;  %v613_v18 = vld [vmem:[%s6337_s20 + $0x610] sm:$0xff]  ;;  %v666_v9 = vld [vmem:[%s6337_s20 + $0x7b8] sm:$0xff] }
 0x1e1   : > { %v617_v19 = vld [vmem:[%s6337_s20 + $0x630] sm:$0xff] }
 0x1e2   : > { %3524 = vmatmul.mubr.bf16.vlgmr.msra.gmra.mrb[4].mxu0 %v6461_v26  ;;  %3688 = vmatmul.mubr.bf16.vlgmr.msra.gmra.mrb[4].mxu1 %v6461_v26  ;;  %v5131_v26 = vcombine.low %v565_v60, %v569_v29  ;;  %v622_v60 = vld [vmem:[%s6337_s20 + $0x658] sm:$0xff]  ;;  %v5179_v30 = vcombine.low %v613_v18, %v617_v19 }
 0x1e3   : > { %3533 = vmatpush1.bf16.msra.mxu0 %v5115_v24  ;;  %3697 = vmatpush1.bf16.msra.mxu1 %v5117_v25  ;;  %v5180_v24 = vcombine.high %v613_v18, %v617_v19  ;;  %v5182_v25 = vcombine.high %v614_v20, %v618_v21  ;;  %v626_v29 = vld [vmem:[%s6337_s20 + $0x678] sm:$0xff]  ;;  %v5229_v21 = vcombine.low %v662_v8, %v666_v9 }
 0x1e4   : > { %3534 = vmatprep.subr.bf16.mxu0 %v5124_v27  ;;  %3698 = vmatprep.subr.bf16.mxu1 %v5126_v28  ;;  %v621_v27 = vld [vmem:[%s6337_s20 + $0x650] sm:$0xff]  ;;  %v670_v18 = vld [vmem:[%s6337_s20 + $0x7d8] sm:$0xff] }
 0x1e5   : > { %3564 = vmatprep.mubr.bf16.mxu0 %v6469_v0  ;;  %3728 = vmatprep.mubr.bf16.mxu1 %v6469_v0  ;;  %v5141_v0 = vcombine.low %v574_v39, %v578_v40  ;;  %v625_v28 = vld [vmem:[%s6337_s20 + $0x670] sm:$0xff]  ;;  %v5189_v40 = vcombine.low %v622_v60, %v626_v29  ;;  %v674_v19 = vld [vmem:[%s6337_s20 + $0x7f8] sm:$0xff] }
 0x1e6   : > { %v5187_v39 = vcombine.low %v621_v27, %v625_v28 }
 0x1e7   : > { %3535 = vmatpush1.bf16.msra.mxu0 %v5123_v32  ;;  %3699 = vmatpush1.bf16.msra.mxu1 %v5125_v10  ;;  %v5188_v32 = vcombine.high %v621_v27, %v625_v28  ;;  %v5190_v10 = vcombine.high %v622_v60, %v626_v29  ;;  %v678_v27 = vld [vmem:[%s6337_s20 + $0x818] sm:$0xff]  ;;  %v5237_v29 = vcombine.low %v670_v18, %v674_v19 }
 0x1e8   : > { %3536 = vmatprep.subr.bf16.mxu0 %v5132_v33  ;;  %3700 = vmatprep.subr.bf16.mxu1 %v5134_v34  ;;  %v629_v33 = vld [vmem:[%s6337_s20 + $0x690] sm:$0xff]  ;;  %v682_v28 = vld [vmem:[%s6337_s20 + $0x838] sm:$0xff] }
 0x1e9   : > { %v633_v34 = vld [vmem:[%s6337_s20 + $0x6b0] sm:$0xff] }
 0x1ea   : > { %v5195_v47 = vcombine.low %v629_v33, %v633_v34 }
 0x1eb   : > { %3537 = vmatpush1.bf16.msra.mxu0 %v5131_v26  ;;  %3701 = vmatpush1.bf16.msra.mxu1 %v5133_v42  ;;  %v5196_v26 = vcombine.high %v629_v33, %v633_v34  ;;  %v5198_v42 = vcombine.high %v630_v37, %v634_v38  ;;  %v686_v33 = vld [vmem:[%s6337_s20 + $0x858] sm:$0xff]  ;;  %v5245_v38 = vcombine.low %v678_v27, %v682_v28 }
 0x1ec   : > { %3538 = vmatprep.subr.bf16.mxu0 %v5140_v54  ;;  %3702 = vmatprep.subr.bf16.mxu1 %v5142_v43  ;;  %v637_v54 = vld [vmem:[%s6337_s20 + $0x6d0] sm:$0xff]  ;;  %v690_v34 = vld [vmem:[%s6337_s20 + $0x878] sm:$0xff] }
 0x1ed   : > { %v641_v43 = vld [vmem:[%s6337_s20 + $0x6f0] sm:$0xff] }
 0x1ee   : > { %v5203_v55 = vcombine.low %v637_v54, %v641_v43 }
 0x1ef   : > { %3539 = vmatpush1.bf16.msra.mxu0 %v5139_v49  ;;  %3703 = vmatpush1.bf16.msra.mxu1 %v5141_v0  ;;  %v5204_v49 = vcombine.high %v637_v54, %v641_v43  ;;  %v5206_v0 = vcombine.high %v638_v44, %v642_v46  ;;  %v694_v54 = vld [vmem:[%s6337_s20 + $0x898] sm:$0xff]  ;;  %v5253_v46 = vcombine.low %v686_v33, %v690_v34 }
 0x1f0   : > { %3540 = vmatprep.subr.bf16.mxu0 %v5148_v50  ;;  %3704 = vmatprep.subr.bf16.mxu1 %v5150_v51  ;;  %v645_v50 = vld [vmem:[%s6337_s20 + $0x710] sm:$0xff]  ;;  %v698_v43 = vld [vmem:[%s6337_s20 + $0x8b8] sm:$0xff] }
 0x1f1   : > { %v649_v51 = vld [vmem:[%s6337_s20 + $0x730] sm:$0xff] }
 0x1f2   : > { %v5211_v1 = vcombine.low %v645_v50, %v649_v51 }
 0x1f3   : > { %3541 = vmatpush1.bf16.msra.mxu0 %v5147_v57  ;;  %3705 = vmatpush1.bf16.msra.mxu1 %v5149_v58  ;;  %v5212_v57 = vcombine.high %v645_v50, %v649_v51  ;;  %v5214_v58 = vcombine.high %v646_v52, %v650_v53  ;;  %v702_v50 = vld [vmem:[%s6337_s20 + $0x8d8] sm:$0xff]  ;;  %v5261_v52 = vcombine.low %v694_v54, %v698_v43 }
 0x1f4   : > { %3542 = vmatprep.subr.bf16.mxu0 %v5156_v59  ;;  %3706 = vmatprep.subr.bf16.mxu1 %v5158_v61  ;;  %v653_v59 = vld [vmem:[%s6337_s20 + $0x750] sm:$0xff]  ;;  %v706_v51 = vld [vmem:[%s6337_s20 + $0x8f8] sm:$0xff] }
 0x1f5   : > { %v657_v61 = vld [vmem:[%s6337_s20 + $0x770] sm:$0xff] }
 0x1f6   : > { %v5219_v11 = vcombine.low %v653_v59, %v657_v61 }
 0x1f7   : > { %3543 = vmatpush1.bf16.msra.mxu0 %v5155_v4  ;;  %3707 = vmatpush1.bf16.msra.mxu1 %v5157_v5  ;;  %v5220_v4 = vcombine.high %v653_v59, %v657_v61  ;;  %v5222_v5 = vcombine.high %v654_v62, %v658_v63  ;;  %v714_v59 = vld [vmem:[%s6337_s20 + $0x938] sm:$0xff] }
 0x1f8   : > { %3544 = vmatprep.subr.bf16.mxu0 %v5164_v6  ;;  %3708 = vmatprep.subr.bf16.mxu1 %v5166_v7  ;;  %v661_v6 = vld [vmem:[%s6337_s20 + $0x790] sm:$0xff] }
 0x1f9   : > { %v665_v7 = vld [vmem:[%s6337_s20 + $0x7b0] sm:$0xff] }
 0x1fa   : > { %v5227_v20 = vcombine.low %v661_v6, %v665_v7 }
 0x1fb   : > { %3545 = vmatpush1.bf16.msra.mxu0 %v5163_v14  ;;  %3709 = vmatpush1.bf16.msra.mxu1 %v5165_v15  ;;  %v5228_v14 = vcombine.high %v661_v6, %v665_v7  ;;  %v5230_v15 = vcombine.high %v662_v8, %v666_v9 }
 0x1fc   : > { %3546 = vmatprep.subr.bf16.mxu0 %v5172_v16  ;;  %3710 = vmatprep.subr.bf16.mxu1 %v5174_v17  ;;  %v669_v16 = vld [vmem:[%s6337_s20 + $0x7d0] sm:$0xff] }
 0x1fd   : > { %v673_v17 = vld [vmem:[%s6337_s20 + $0x7f0] sm:$0xff] }
 0x1fe   : > { %v5235_v60 = vcombine.low %v669_v16, %v673_v17 }
 0x1ff   : > { %3547 = vmatpush1.bf16.msra.mxu0 %v5171_v22  ;;  %3711 = vmatpush1.bf16.msra.mxu1 %v5173_v23  ;;  %v5236_v22 = vcombine.high %v669_v16, %v673_v17  ;;  %v5238_v23 = vcombine.high %v670_v18, %v674_v19 }
 0x200   : > { %3548 = vmatprep.subr.bf16.mxu0 %v5180_v24  ;;  %3712 = vmatprep.subr.bf16.mxu1 %v5182_v25  ;;  %v677_v24 = vld [vmem:[%s6337_s20 + $0x810] sm:$0xff] }
 0x201   : > { %v681_v25 = vld [vmem:[%s6337_s20 + $0x830] sm:$0xff] }
 0x202   : > { %v5243_v37 = vcombine.low %v677_v24, %v681_v25 }
 0x203   : > { %3549 = vmatpush1.bf16.msra.mxu0 %v5179_v30  ;;  %3713 = vmatpush1.bf16.msra.mxu1 %v5181_v31  ;;  %v5244_v30 = vcombine.high %v677_v24, %v681_v25  ;;  %v5246_v31 = vcombine.high %v678_v27, %v682_v28 }
 0x204   : > { %3550 = vmatprep.subr.bf16.mxu0 %v5188_v32  ;;  %3714 = vmatprep.subr.bf16.mxu1 %v5190_v10  ;;  %v685_v32 = vld [vmem:[%s6337_s20 + $0x850] sm:$0xff] }
 0x205   : > { %v689_v10 = vld [vmem:[%s6337_s20 + $0x870] sm:$0xff] }
 0x206   : > { %v5251_v44 = vcombine.low %v685_v32, %v689_v10 }
 0x207   : > { %3551 = vmatpush1.bf16.msra.mxu0 %v5187_v39  ;;  %3715 = vmatpush1.bf16.msra.mxu1 %v5189_v40  ;;  %v5252_v39 = vcombine.high %v685_v32, %v689_v10  ;;  %v5254_v40 = vcombine.high %v686_v33, %v690_v34 }
 0x208   : > { %3552 = vmatprep.subr.bf16.mxu0 %v5196_v26  ;;  %3716 = vmatprep.subr.bf16.mxu1 %v5198_v42  ;;  %v693_v26 = vld [vmem:[%s6337_s20 + $0x890] sm:$0xff] }
 0x209   : > { %v697_v42 = vld [vmem:[%s6337_s20 + $0x8b0] sm:$0xff] }
 0x20b   : > { %3553 = vmatpush1.bf16.msra.mxu0 %v5195_v47  ;;  %3717 = vmatpush1.bf16.msra.mxu1 %v5197_v48  ;;  %v5260_v47 = vcombine.high %v693_v26, %v697_v42  ;;  %v5262_v48 = vcombine.high %v694_v54, %v698_v43 }
 0x20c   : > { %3554 = vmatprep.subr.bf16.mxu0 %v5204_v49  ;;  %3718 = vmatprep.subr.bf16.mxu1 %v5206_v0  ;;  %v701_v49 = vld [vmem:[%s6337_s20 + $0x8d0] sm:$0xff] }
 0x20d   : > { %v705_v0 = vld [vmem:[%s6337_s20 + $0x8f0] sm:$0xff] }
 0x20e   : > { %v5268_v53 = vcombine.high %v701_v49, %v705_v0  ;;  %v5267_v61 = vcombine.low %v701_v49, %v705_v0 }
 0x20f   : > { %3555 = vmatpush1.bf16.msra.mxu0 %v5203_v55  ;;  %3719 = vmatpush1.bf16.msra.mxu1 %v5205_v56  ;;  %v5270_v55 = vcombine.high %v702_v50, %v706_v51  ;;  %v709_v56 = vld [vmem:[%s6337_s20 + $0x910] sm:$0xff] }
 0x210   : > { %3556 = vmatprep.subr.bf16.mxu0 %v5212_v57  ;;  %3720 = vmatprep.subr.bf16.mxu1 %v5214_v58  ;;  %v713_v57 = vld [vmem:[%s6337_s20 + $0x930] sm:$0xff]  ;;  %v710_v58 = vld [vmem:[%s6337_s20 + $0x918] sm:$0xff] }
 0x211   : > { %v5276_v62 = vcombine.high %v709_v56, %v713_v57  ;;  %v5278_v63 = vcombine.high %v710_v58, %v714_v59  ;;  %v5275_v6 = vcombine.low %v709_v56, %v713_v57  ;;  %v5277_v7 = vcombine.low %v710_v58, %v714_v59 }
 0x213   : > { %3557 = vmatpush1.bf16.msra.mxu0 %v5211_v1  ;;  %3721 = vmatpush1.bf16.msra.mxu1 %v5213_v2  ;;  %v717_v1 = vld [vmem:[%s6337_s20 + $0x950] sm:$0xff] }
 0x214   : > { %3558 = vmatprep.subr.bf16.mxu0 %v5220_v4  ;;  %3722 = vmatprep.subr.bf16.mxu1 %v5222_v5  ;;  %v721_v2 = vld [vmem:[%s6337_s20 + $0x970] sm:$0xff]  ;;  %v718_v4 = vld [vmem:[%s6337_s20 + $0x958] sm:$0xff] }
 0x215   : > { %v722_v5 = vld [vmem:[%s6337_s20 + $0x978] sm:$0xff]  ;;  %v5284_v8 = vcombine.high %v717_v1, %v721_v2  ;;  %v5283_v16 = vcombine.low %v717_v1, %v721_v2 }
 0x216   : > { %v5286_v9 = vcombine.high %v718_v4, %v722_v5  ;;  %v5285_v17 = vcombine.low %v718_v4, %v722_v5 }
 0x217   : > { %3559 = vmatpush1.bf16.msra.mxu0 %v5219_v11  ;;  %3723 = vmatpush1.bf16.msra.mxu1 %v5221_v13  ;;  %v725_v11 = vld [vmem:[%s6337_s20 + $0x990] sm:$0xff] }
 0x218   : > { %3560 = vmatprep.subr.bf16.mxu0 %v5228_v14  ;;  %3724 = vmatprep.subr.bf16.mxu1 %v5230_v15  ;;  %v729_v13 = vld [vmem:[%s6337_s20 + $0x9b0] sm:$0xff]  ;;  %v726_v14 = vld [vmem:[%s6337_s20 + $0x998] sm:$0xff] }
 0x219   : > { %v730_v15 = vld [vmem:[%s6337_s20 + $0x9b8] sm:$0xff]  ;;  %v5292_v18 = vcombine.high %v725_v11, %v729_v13  ;;  %v5291_v24 = vcombine.low %v725_v11, %v729_v13 }
 0x21a   : > { %v5294_v19 = vcombine.high %v726_v14, %v730_v15  ;;  %v5293_v25 = vcombine.low %v726_v14, %v730_v15 }
 0x21b   : > { %3561 = vmatpush1.bf16.msra.mxu0 %v5227_v20  ;;  %3725 = vmatpush1.bf16.msra.mxu1 %v5229_v21  ;;  %v733_v20 = vld [vmem:[%s6337_s20 + $0x9d0] sm:$0xff] }
 0x21c   : > { %3562 = vmatprep.subr.bf16.mxu0 %v5236_v22  ;;  %3726 = vmatprep.subr.bf16.mxu1 %v5238_v23  ;;  %v737_v21 = vld [vmem:[%s6337_s20 + $0x9f0] sm:$0xff]  ;;  %v734_v22 = vld [vmem:[%s6337_s20 + $0x9d8] sm:$0xff] }
 0x21d   : > { %v738_v23 = vld [vmem:[%s6337_s20 + $0x9f8] sm:$0xff]  ;;  %v5300_v27 = vcombine.high %v733_v20, %v737_v21  ;;  %v5299_v32 = vcombine.low %v733_v20, %v737_v21 }
 0x21e   : > { %v5302_v28 = vcombine.high %v734_v22, %v738_v23  ;;  %v5301_v10 = vcombine.low %v734_v22, %v738_v23 }
 0x21f   : > { %3563 = vmatpush1.bf16.msra.mxu0 %v5235_v60  ;;  %3727 = vmatpush1.bf16.msra.mxu1 %v5237_v29  ;;  %v741_v60 = vld [vmem:[%s6337_s20 + $0xa10] sm:$0xff] }
 0x220   : > { %3573 = vmatprep.subr.bf16.mxu0 %v5244_v30  ;;  %3737 = vmatprep.subr.bf16.mxu1 %v5246_v31  ;;  %v745_v29 = vld [vmem:[%s6337_s20 + $0xa30] sm:$0xff]  ;;  %v742_v30 = vld [vmem:[%s6337_s20 + $0xa18] sm:$0xff] }
 0x221   : > { %v746_v31 = vld [vmem:[%s6337_s20 + $0xa38] sm:$0xff]  ;;  %v5308_v33 = vcombine.high %v741_v60, %v745_v29 }
 0x222   : > { %3565 = vmatmul.mubr.bf16.vlgmr.msra.gmra.mrb[4].mxu0 %v6543_v41  ;;  %3729 = vmatmul.mubr.bf16.vlgmr.msra.gmra.mrb[4].mxu1 %v6543_v41  ;;  %v5259_v41 = vcombine.low %v693_v26, %v697_v42  ;;  %v5310_v34 = vcombine.high %v742_v30, %v746_v31  ;;  %v5307_v26 = vcombine.low %v741_v60, %v745_v29 }
 0x223   : > { %3574 = vmatpush1.bf16.msra.mxu0 %v5243_v37  ;;  %3738 = vmatpush1.bf16.msra.mxu1 %v5245_v38  ;;  %v749_v37 = vld [vmem:[%s6337_s20 + $0xa50] sm:$0xff]  ;;  %v5309_v42 = vcombine.low %v742_v30, %v746_v31 }
 0x224   : > { %3575 = vmatprep.subr.bf16.mxu0 %v5252_v39  ;;  %3739 = vmatprep.subr.bf16.mxu1 %v5254_v40  ;;  %v753_v38 = vld [vmem:[%s6337_s20 + $0xa70] sm:$0xff]  ;;  %v750_v39 = vld [vmem:[%s6337_s20 + $0xa58] sm:$0xff] }
 0x225   : > { %3605 = vmatprep.mubr.bf16.mxu0 %v6472_v35  ;;  %3769 = vmatprep.mubr.bf16.mxu1 %v6472_v35  ;;  %v5269_v35 = vcombine.low %v702_v50, %v706_v51  ;;  %v754_v40 = vld [vmem:[%s6337_s20 + $0xa78] sm:$0xff]  ;;  %v5316_v54 = vcombine.high %v749_v37, %v753_v38  ;;  %v5315_v49 = vcombine.low %v749_v37, %v753_v38 }
 0x226   : > { %v5318_v43 = vcombine.high %v750_v39, %v754_v40  ;;  %v5317_v0 = vcombine.low %v750_v39, %v754_v40 }
 0x227   : > { %3576 = vmatpush1.bf16.msra.mxu0 %v5251_v44  ;;  %3740 = vmatpush1.bf16.msra.mxu1 %v5253_v46  ;;  %v757_v44 = vld [vmem:[%s6337_s20 + $0xa90] sm:$0xff] }
 0x228   : > { %3577 = vmatprep.subr.bf16.mxu0 %v5260_v47  ;;  %3741 = vmatprep.subr.bf16.mxu1 %v5262_v48  ;;  %v761_v46 = vld [vmem:[%s6337_s20 + $0xab0] sm:$0xff]  ;;  %v758_v47 = vld [vmem:[%s6337_s20 + $0xa98] sm:$0xff] }
 0x229   : > { %v762_v48 = vld [vmem:[%s6337_s20 + $0xab8] sm:$0xff]  ;;  %v5324_v50 = vcombine.high %v757_v44, %v761_v46  ;;  %v5323_v56 = vcombine.low %v757_v44, %v761_v46 }
 0x22a   : > { %v5326_v51 = vcombine.high %v758_v47, %v762_v48  ;;  %v5325_v57 = vcombine.low %v758_v47, %v762_v48 }
 0x22b   : > { %3578 = vmatpush1.bf16.msra.mxu0 %v5259_v41  ;;  %3742 = vmatpush1.bf16.msra.mxu1 %v5261_v52  ;;  %v765_v41 = vld [vmem:[%s6337_s20 + $0xad0] sm:$0xff] }
 0x22c   : > { %3579 = vmatprep.subr.bf16.mxu0 %v5268_v53  ;;  %3743 = vmatprep.subr.bf16.mxu1 %v5270_v55  ;;  %v769_v52 = vld [vmem:[%s6337_s20 + $0xaf0] sm:$0xff]  ;;  %v766_v53 = vld [vmem:[%s6337_s20 + $0xad8] sm:$0xff] }
 0x22d   : > { %v770_v55 = vld [vmem:[%s6337_s20 + $0xaf8] sm:$0xff]  ;;  %v5332_v58 = vcombine.high %v765_v41, %v769_v52  ;;  %v5331_v1 = vcombine.low %v765_v41, %v769_v52 }
 0x22e   : > { %v5334_v59 = vcombine.high %v766_v53, %v770_v55  ;;  %v5333_v2 = vcombine.low %v766_v53, %v770_v55 }
 0x22f   : > { %3580 = vmatpush1.bf16.msra.mxu0 %v5267_v61  ;;  %3744 = vmatpush1.bf16.msra.mxu1 %v5269_v35  ;;  %v773_v61 = vld [vmem:[%s6337_s20 + $0xb10] sm:$0xff] }
 0x230   : > { %3581 = vmatprep.subr.bf16.mxu0 %v5276_v62  ;;  %3745 = vmatprep.subr.bf16.mxu1 %v5278_v63  ;;  %v777_v35 = vld [vmem:[%s6337_s20 + $0xb30] sm:$0xff]  ;;  %v774_v62 = vld [vmem:[%s6337_s20 + $0xb18] sm:$0xff] }
 0x231   : > { %v778_v63 = vld [vmem:[%s6337_s20 + $0xb38] sm:$0xff]  ;;  %v5340_v4 = vcombine.high %v773_v61, %v777_v35  ;;  %v5339_v11 = vcombine.low %v773_v61, %v777_v35 }
 0x232   : > { %v5342_v5 = vcombine.high %v774_v62, %v778_v63  ;;  %v5341_v13 = vcombine.low %v774_v62, %v778_v63  ;;  %v837_v63 = vld [vmem:[%s6337_s20 + $0xd10] sm:$0xff] }
 0x233   : > { %3582 = vmatpush1.bf16.msra.mxu0 %v5275_v6  ;;  %3746 = vmatpush1.bf16.msra.mxu1 %v5277_v7  ;;  %v781_v6 = vld [vmem:[%s6337_s20 + $0xb50] sm:$0xff] }
 0x234   : > { %3583 = vmatprep.subr.bf16.mxu0 %v5284_v8  ;;  %3747 = vmatprep.subr.bf16.mxu1 %v5286_v9  ;;  %v785_v7 = vld [vmem:[%s6337_s20 + $0xb70] sm:$0xff]  ;;  %v782_v8 = vld [vmem:[%s6337_s20 + $0xb58] sm:$0xff] }
 0x235   : > { %v786_v9 = vld [vmem:[%s6337_s20 + $0xb78] sm:$0xff]  ;;  %v5348_v14 = vcombine.high %v781_v6, %v785_v7  ;;  %v5347_v20 = vcombine.low %v781_v6, %v785_v7 }
 0x236   : > { %v5350_v15 = vcombine.high %v782_v8, %v786_v9  ;;  %v5349_v21 = vcombine.low %v782_v8, %v786_v9  ;;  %v6072_v8 = vmov 1983009808  }
 0x237   : > { %3584 = vmatpush1.bf16.msra.mxu0 %v5283_v16  ;;  %3748 = vmatpush1.bf16.msra.mxu1 %v5285_v17  ;;  %v789_v16 = vld [vmem:[%s6337_s20 + $0xb90] sm:$0xff]  ;;  %v3830_v9 = vunpack.c.l.s4 %v6072_v8  ;;  %v5760_v8 = vld [vmem:[#allocation10 + $0x80] sm:$0xff] (!%p5431_p9)  }
 0x238   : > { %3585 = vmatprep.subr.bf16.mxu0 %v5292_v18  ;;  %3749 = vmatprep.subr.bf16.mxu1 %v5294_v19  ;;  %v793_v17 = vld [vmem:[%s6337_s20 + $0xbb0] sm:$0xff]  ;;  %v790_v18 = vld [vmem:[%s6337_s20 + $0xb98] sm:$0xff] }
 0x239   : > { %v794_v19 = vld [vmem:[%s6337_s20 + $0xbb8] sm:$0xff]  ;;  %v5356_v22 = vcombine.high %v789_v16, %v793_v17  ;;  %v5355_v60 = vcombine.low %v789_v16, %v793_v17 }
 0x23a   : > { %v5358_v23 = vcombine.high %v790_v18, %v794_v19  ;;  %v5357_v29 = vcombine.low %v790_v18, %v794_v19  ;;  %v3831_v19 = vunpack.c.0.s8 %v3830_v9  ;;  %v5761_v9 = vld [vmem:[#allocation10 + $0x48] sm:$0xff] (!%p5431_p9)  }
 0x23b   : > { %3586 = vmatpush1.bf16.msra.mxu0 %v5291_v24  ;;  %3750 = vmatpush1.bf16.msra.mxu1 %v5293_v25  ;;  %v797_v24 = vld [vmem:[%s6337_s20 + $0xbd0] sm:$0xff] }
 0x23c   : > { %3587 = vmatprep.subr.bf16.mxu0 %v5300_v27  ;;  %3751 = vmatprep.subr.bf16.mxu1 %v5302_v28  ;;  %v801_v25 = vld [vmem:[%s6337_s20 + $0xbf0] sm:$0xff]  ;;  %v798_v27 = vld [vmem:[%s6337_s20 + $0xbd8] sm:$0xff] }
 0x23d   : > { %v802_v28 = vld [vmem:[%s6337_s20 + $0xbf8] sm:$0xff]  ;;  %v5364_v30 = vcombine.high %v797_v24, %v801_v25  ;;  %v5363_v37 = vcombine.low %v797_v24, %v801_v25 }
 0x23e   : > { %v5366_v31 = vcombine.high %v798_v27, %v802_v28  ;;  %v5365_v38 = vcombine.low %v798_v27, %v802_v28  ;;  %v858_v24 = vld [vmem:[%s6337_s20 + $0xdb8] sm:$0xff] }
 0x23f   : > { %3588 = vmatpush1.bf16.msra.mxu0 %v5299_v32  ;;  %3752 = vmatpush1.bf16.msra.mxu1 %v5301_v10  ;;  %v805_v32 = vld [vmem:[%s6337_s20 + $0xc10] sm:$0xff] }
 0x240   : > { %3589 = vmatprep.subr.bf16.mxu0 %v5308_v33  ;;  %3753 = vmatprep.subr.bf16.mxu1 %v5310_v34  ;;  %v809_v10 = vld [vmem:[%s6337_s20 + $0xc30] sm:$0xff]  ;;  %v806_v33 = vld [vmem:[%s6337_s20 + $0xc18] sm:$0xff] }
 0x241   : > { %v810_v34 = vld [vmem:[%s6337_s20 + $0xc38] sm:$0xff]  ;;  %v5372_v39 = vcombine.high %v805_v32, %v809_v10  ;;  %v5371_v44 = vcombine.low %v805_v32, %v809_v10  ;;  %v865_v32 = vld [vmem:[%s6337_s20 + $0xdf0] sm:$0xff] }
 0x242   : > { %v5374_v40 = vcombine.high %v806_v33, %v810_v34  ;;  %v5373_v46 = vcombine.low %v806_v33, %v810_v34  ;;  %v862_v34 = vld [vmem:[%s6337_s20 + $0xdd8] sm:$0xff] }
 0x243   : > { %3590 = vmatpush1.bf16.msra.mxu0 %v5307_v26  ;;  %3754 = vmatpush1.bf16.msra.mxu1 %v5309_v42  ;;  %v813_v26 = vld [vmem:[%s6337_s20 + $0xc50] sm:$0xff] }
 0x244   : > { %3591 = vmatprep.subr.bf16.mxu0 %v5316_v54  ;;  %3755 = vmatprep.subr.bf16.mxu1 %v5318_v43  ;;  %v817_v42 = vld [vmem:[%s6337_s20 + $0xc70] sm:$0xff]  ;;  %v814_v54 = vld [vmem:[%s6337_s20 + $0xc58] sm:$0xff] }
 0x245   : > { %v818_v43 = vld [vmem:[%s6337_s20 + $0xc78] sm:$0xff]  ;;  %v5380_v47 = vcombine.high %v813_v26, %v817_v42  ;;  %v5379_v41 = vcombine.low %v813_v26, %v817_v42 }
 0x246   : > { %v5382_v48 = vcombine.high %v814_v54, %v818_v43  ;;  %v5381_v52 = vcombine.low %v814_v54, %v818_v43 }
 0x247   : > { %3592 = vmatpush1.bf16.msra.mxu0 %v5315_v49  ;;  %3756 = vmatpush1.bf16.msra.mxu1 %v5317_v0  ;;  %v821_v49 = vld [vmem:[%s6337_s20 + $0xc90] sm:$0xff] }
 0x248   : > { %3593 = vmatprep.subr.bf16.mxu0 %v5324_v50  ;;  %3757 = vmatprep.subr.bf16.mxu1 %v5326_v51  ;;  %v825_v0 = vld [vmem:[%s6337_s20 + $0xcb0] sm:$0xff]  ;;  %v822_v50 = vld [vmem:[%s6337_s20 + $0xc98] sm:$0xff] }
 0x249   : > { %v826_v51 = vld [vmem:[%s6337_s20 + $0xcb8] sm:$0xff]  ;;  %v5388_v53 = vcombine.high %v821_v49, %v825_v0 }
 0x24a   : > { %v5390_v55 = vcombine.high %v822_v50, %v826_v51  ;;  %v5389_v61 = vcombine.low %v822_v50, %v826_v51  ;;  %v416_v50 = vld [vmem:[#allocation2] sm:$0xff] }
 0x24b   : > { %3594 = vmatpush1.bf16.msra.mxu0 %v5323_v56  ;;  %3758 = vmatpush1.bf16.msra.mxu1 %v5325_v57  ;;  %v829_v56 = vld [vmem:[%s6337_s20 + $0xcd0] sm:$0xff] }
 0x24c   : > { %3595 = vmatprep.subr.bf16.mxu0 %v5332_v58  ;;  %3759 = vmatprep.subr.bf16.mxu1 %v5334_v59  ;;  %v833_v57 = vld [vmem:[%s6337_s20 + $0xcf0] sm:$0xff]  ;;  %v830_v58 = vld [vmem:[%s6337_s20 + $0xcd8] sm:$0xff] }
 0x24d   : > { %v834_v59 = vld [vmem:[%s6337_s20 + $0xcf8] sm:$0xff]  ;;  %v5396_v35 = vcombine.high %v829_v56, %v833_v57 }
 0x24e   : > { %v5398_v62 = vcombine.high %v830_v58, %v834_v59 }
 0x24f   : > { %3596 = vmatpush1.bf16.msra.mxu0 %v5331_v1  ;;  %3760 = vmatpush1.bf16.msra.mxu1 %v5333_v2  ;;  %v841_v1 = vld [vmem:[%s6337_s20 + $0xd30] sm:$0xff]  ;;  %v838_v2 = vld [vmem:[%s6337_s20 + $0xd18] sm:$0xff] }
 0x250   : > { %3597 = vmatprep.subr.bf16.mxu0 %v5340_v4  ;;  %3761 = vmatprep.subr.bf16.mxu1 %v5342_v5  ;;  %v842_v4 = vld [vmem:[%s6337_s20 + $0xd38] sm:$0xff]  ;;  %v5395_v5 = vcombine.low %v829_v56, %v833_v57  ;;  %v5404_v6 = vcombine.high %v837_v63, %v841_v1  ;;  %v5403_v16 = vcombine.low %v837_v63, %v841_v1 }
 0x251   : > { %v5406_v7 = vcombine.high %v838_v2, %v842_v4  ;;  %v5405_v17 = vcombine.low %v838_v2, %v842_v4  ;;  %v417_v4 = vld [vmem:[#allocation2 + $0x8] sm:$0xff] }
 0x253   : > { %3598 = vmatpush1.bf16.msra.mxu0 %v5339_v11  ;;  %3762 = vmatpush1.bf16.msra.mxu1 %v5341_v13  ;;  %v845_v11 = vld [vmem:[%s6337_s20 + $0xd50] sm:$0xff] }
 0x254   : > { %3599 = vmatprep.subr.bf16.mxu0 %v5348_v14  ;;  %3763 = vmatprep.subr.bf16.mxu1 %v5350_v15  ;;  %v849_v13 = vld [vmem:[%s6337_s20 + $0xd70] sm:$0xff]  ;;  %v846_v14 = vld [vmem:[%s6337_s20 + $0xd58] sm:$0xff] }
 0x255   : > { %v850_v15 = vld [vmem:[%s6337_s20 + $0xd78] sm:$0xff]  ;;  %v5412_v18 = vcombine.high %v845_v11, %v849_v13  ;;  %v5411_v25 = vcombine.low %v845_v11, %v849_v13  ;;  %v5762_v11 = vld [vmem:[#allocation10 + $0xc8] sm:$0xff] (!%p5431_p9)  }
 0x256   : > { %v5413_v27 = vcombine.low %v846_v14, %v850_v15  ;;  %v5763_v13 = vld [vmem:[#allocation10 + $0x8] sm:$0xff] (!%p5431_p9)  }
 0x257   : > { %3600 = vmatpush1.bf16.msra.mxu0 %v5347_v20  ;;  %3764 = vmatpush1.bf16.msra.mxu1 %v5349_v21  ;;  %v5414_v20 = vcombine.high %v846_v14, %v850_v15  ;;  %v853_v21 = vld [vmem:[%s6337_s20 + $0xd90] sm:$0xff]  ;;  %v5764_v14 = vld [vmem:[#allocation10 + $0x88] sm:$0xff] (!%p5431_p9)   ;;  %v5765_v15 = vld [vmem:[#allocation10 + $0x50] sm:$0xff] (!%p5431_p9)  }
 0x258   : > { %3601 = vmatprep.subr.bf16.mxu0 %v5356_v22  ;;  %3765 = vmatprep.subr.bf16.mxu1 %v5358_v23  ;;  %v857_v22 = vld [vmem:[%s6337_s20 + $0xdb0] sm:$0xff]  ;;  %v854_v23 = vld [vmem:[%s6337_s20 + $0xd98] sm:$0xff] }
 0x259   : > { %v5420_v28 = vcombine.high %v853_v21, %v857_v22  ;;  %v5419_v26 = vcombine.low %v853_v21, %v857_v22  ;;  %v5771_v21 = vld [vmem:[#allocation10 + $0x18] sm:$0xff] (!%p5431_p9)  }
 0x25a   : > { %v5772_v22 = vld [vmem:[#allocation10 + $0x98] sm:$0xff] (!%p5431_p9)  }
 0x25b   : > { %3602 = vmatpush1.bf16.msra.mxu0 %v5355_v60  ;;  %3766 = vmatpush1.bf16.msra.mxu1 %v5357_v29  ;;  %v6884_v29 = vsub.s32 %v3831_v19, %v6385_v45  ;;  %v5769_v19 = vld [vmem:[#allocation10 + $0x58] sm:$0xff] (!%p5431_p9)  }
 0x25c   : > { %3603 = vmatprep.subr.bf16.mxu0 %v5364_v30  ;;  %3767 = vmatprep.subr.bf16.mxu1 %v5366_v31  ;;  %v5422_v30 = vcombine.high %v854_v23, %v858_v24  ;;  %v861_v31 = vld [vmem:[%s6337_s20 + $0xdd0] sm:$0xff] }
 0x25d   : > { %v5427_v51 = vcombine.low %v861_v31, %v865_v32 }
 0x25f   : > { %3604 = vmatpush1.bf16.msra.mxu0 %v5363_v37  ;;  %3768 = vmatpush1.bf16.msra.mxu1 %v5365_v38  ;;  %v866_v37 = vld [vmem:[%s6337_s20 + $0xdf8] sm:$0xff] }
 0x260   : > { %3614 = vmatprep.subr.bf16.mxu0 %v5372_v39  ;;  %3778 = vmatprep.subr.bf16.mxu1 %v5374_v40 }
 0x262   : > { %3606 = vmatmul.mubr.bf16.vlgmr.msra.gmra.mrb[4].mxu0 %v6475_v36  ;;  %3770 = vmatmul.mubr.bf16.vlgmr.msra.gmra.mrb[4].mxu1 %v6475_v36  ;;  %v5387_v36 = vcombine.low %v821_v49, %v825_v0  ;;  %v5430_v49 = vcombine.high %v862_v34, %v866_v37 }
 0x263   : > { %3615 = vmatpush1.bf16.msra.mxu0 %v5371_v44  ;;  %3779 = vmatpush1.bf16.msra.mxu1 %v5373_v46  ;;  %v5421_v44 = vcombine.low %v854_v23, %v858_v24  ;;  %v5428_v46 = vcombine.high %v861_v31, %v865_v32  ;;  %v5773_v23 = vld [vmem:[#allocation10 + $0x60] sm:$0xff] (!%p5431_p9)   ;;  %v5780_v31 = vld [vmem:[#allocation10 + $0xa8] sm:$0xff] (!%p5431_p9)   ;;  %v5781_v32 = vld [vmem:[#allocation10 + $0x70] sm:$0xff] (!%p5431_p9)  }
 0x264   : > { %3616 = vmatprep.subr.bf16.mxu0 %v5380_v47  ;;  %3780 = vmatprep.subr.bf16.mxu1 %v5382_v48  ;;  %v5774_v24 = vld [vmem:[#allocation10 + $0xe0] sm:$0xff] (!%p5431_p9)  }
 0x265   : > { %3646 = vmatprep.mubr.bf16.mxu0 %v6071_v12  ;;  %3810 = vmatprep.mubr.bf16.mxu1 %v6071_v12  ;;  %v5397_v12 = vcombine.low %v830_v58, %v834_v59 }
 0x267   : > { %3617 = vmatpush1.bf16.msra.mxu0 %v5379_v41  ;;  %3781 = vmatpush1.bf16.msra.mxu1 %v5381_v52  ;;  %v5429_v52 = vcombine.low %v862_v34, %v866_v37  ;;  %v3877_v34 = vsub.s32 (!%p5431_p9), 0, %v6385_v45  ;;  %v5784_v37 = vld [vmem:[#allocation10 + $0xb0] sm:$0xff] (!%p5431_p9)  }
 0x268   : > { %3618 = vmatprep.subr.bf16.mxu0 %v5388_v53  ;;  %3782 = vmatprep.subr.bf16.mxu1 %v5390_v55 }
 0x26b   : > { %3619 = vmatpush1.bf16.msra.mxu0 %v5387_v36  ;;  %3783 = vmatpush1.bf16.msra.mxu1 %v5389_v61 }
 0x26c   : > { %3620 = vmatprep.subr.bf16.mxu0 %v5396_v35  ;;  %3784 = vmatprep.subr.bf16.mxu1 %v5398_v62 }
 0x26f   : > { %3621 = vmatpush1.bf16.msra.mxu0 %v5395_v5  ;;  %3785 = vmatpush1.bf16.msra.mxu1 %v5397_v12 }
 0x270   : > { %3622 = vmatprep.subr.bf16.mxu0 %v5404_v6  ;;  %3786 = vmatprep.subr.bf16.mxu1 %v5406_v7  ;;  %v5758_v6 = vld [vmem:[#allocation10 + $0xc0] sm:$0xff] (!%p5431_p9)  }
 0x271   : > { %v5759_v7 = vld [vmem:[#allocation10] sm:$0xff] (!%p5431_p9)  }
 0x273   : > { %3623 = vmatpush1.bf16.msra.mxu0 %v5403_v16  ;;  %3787 = vmatpush1.bf16.msra.mxu1 %v5405_v17  ;;  %v5766_v16 = vld [vmem:[#allocation10 + $0xd0] sm:$0xff] (!%p5431_p9)  }
 0x274   : > { %3624 = vmatprep.subr.bf16.mxu0 %v5412_v18  ;;  %3788 = vmatprep.subr.bf16.mxu1 %v5414_v20  ;;  %v5767_v17 = vld [vmem:[#allocation10 + $0x10] sm:$0xff] (!%p5431_p9)   ;;  %v5770_v20 = vld [vmem:[#allocation10 + $0xd8] sm:$0xff] (!%p5431_p9)  }
 0x275   : > { %v3320_v60 = vpop.f32.mrb[0].mxu0  ;;  %v3484_v10 = vpop.f32.mrb[0].mxu1  ;;  %v5768_v18 = vld [vmem:[#allocation10 + $0x90] sm:$0xff] (!%p5431_p9)  }
 0x276   : > { %v3322_v33 = vpop.f32.mrb[1].mxu0  ;;  %v3486_v39 = vpop.f32.mrb[1].mxu1 }
 0x277   : > { %v3827_v38 = vcombine.low %v3320_v60, %v3322_v33  ;;  %v3324_v40 = vpop.f32.mrb[2].mxu0  ;;  %3625 = vmatpush1.bf16.msra.mxu0 %v5411_v25  ;;  %v3828_v42 = vcombine.low %v3484_v10, %v3486_v39  ;;  %v3488_v54 = vpop.f32.mrb[2].mxu1  ;;  %3789 = vmatpush1.bf16.msra.mxu1 %v5413_v27  ;;  %v5775_v25 = vld [vmem:[#allocation10 + $0x20] sm:$0xff] (!%p5431_p9)   ;;  %v5778_v60 = vld [vmem:[#allocation10 + $0xe8] sm:$0xff] (!%p5431_p9)   ;;  %v5782_v10 = vld [vmem:[#allocation10 + $0xf0] sm:$0xff] (!%p5431_p9)  }
 0x278   : > { %v3325_v43 = vpop.f32.mrb[3].mxu0  ;;  %3626 = vmatprep.subr.bf16.mxu0 %v5420_v28  ;;  %v3489_v48 = vpop.f32.mrb[3].mxu1  ;;  %3790 = vmatprep.subr.bf16.mxu1 %v5422_v30  ;;  %v5776_v27 = vld [vmem:[#allocation10 + $0xa0] sm:$0xff] (!%p5431_p9)   ;;  %v5777_v28 = vld [vmem:[#allocation10 + $0x68] sm:$0xff] (!%p5431_p9)   ;;  %v5783_v33 = vld [vmem:[#allocation10 + $0x30] sm:$0xff] (!%p5431_p9)   ;;  %v3885_v40 = vsub.s32 (!%p5431_p9), 2, %v6385_v45 }
 0x279   : > { %v3835_v47 = vrot.slane %v3827_v38, %v6884_v29  ;;  %v3842_v0 = vrot.slane %v3828_v42, %v6884_v29  ;;  %v5779_v30 = vld [vmem:[#allocation10 + $0x28] sm:$0xff] (!%p5431_p9)   ;;  %v3881_v38 = vsub.s32 (!%p5431_p9), 1, %v6385_v45  ;;  %v5785_v39 = vld [vmem:[#allocation10 + $0x78] sm:$0xff] (!%p5431_p9)   ;;  %v3889_v42 = vsub.s32 (!%p5431_p9), 3, %v6385_v45 }
 0x27a   : > { %v5787_v54 = vld [vmem:[#allocation10 + $0x38] sm:$0xff] (!%p5431_p9)  }
 0x27b   : > { %3627 = vmatpush1.bf16.msra.mxu0 %v5419_v26  ;;  %v3843_v41 = vcombine.low %v3835_v47, %v3842_v0  ;;  %3791 = vmatpush1.bf16.msra.mxu1 %v5421_v44  ;;  %v5786_v26 = vld [vmem:[#allocation10 + $0xf8] sm:$0xff] (!%p5431_p9)   ;;  %v3873_v44 = vld [vmem:[#allocation5] sm:$0xff] (!%p5431_p9) }
 0x27c   : > { %3628 = vmatprep.subr.bf16.mxu0 %v5428_v46  ;;  %3792 = vmatprep.subr.bf16.mxu1 %v5430_v49  ;;  %v5788_v43 = vld [vmem:[#allocation10 + $0xb8] sm:$0xff] (!%p5431_p9)   ;;  %v6901_v46 = vld [vmem:[#allocation7] sm:$0xff] (!%p5431_p9)  ;;  %v3878_v47 = vrot.slane (!%p5431_p9), %v3873_v44, %v3877_v34  ;;  %v3882_v48 = vrot.slane (!%p5431_p9), %v3873_v44, %v3881_v38  ;;  %v3886_v49 = vrot.slane (!%p5431_p9), %v3873_v44, %v3885_v40 }
 0x27d   : > { %v3863_v53 = vadd.f32 %v3843_v41, %v416_v50  ;;  %v3890_v0 = vrot.slane (!%p5431_p9), %v3873_v44, %v3889_v42  ;;  %v6903_v50 = vld [vmem:[#allocation8] sm:$0xff] (!%p5431_p9)  ;;  %v3954_v41 = vrot.slane (!%p5431_p9), %v6901_v46, %v3881_v38 }
 0x27f   : > { %3629 = vmatpush1.bf16.msra.mxu0 %v5427_v51  ;;  %3865 = vst [vmem:[#allocation2] sm:$0xff] %v3863_v53  ;;  %3793 = vmatpush1.bf16.msra.mxu1 %v5429_v52  ;;  %v3950_v51 = vrot.slane (!%p5431_p9), %v6901_v46, %v3877_v34  ;;  %v3958_v52 = vrot.slane (!%p5431_p9), %v6901_v46, %v3885_v40 }
 0x280   : > { %5526 = vmatprep.subr.bf16.mxu1 (!%p5431_p9), %v5758_v6  ;;  %v3962_v53 = vrot.slane (!%p5431_p9), %v6901_v46, %v3889_v42 }
 0x282   : > { %3647 = vmatmul.mubr.bf16.vlgmr.msra.gmra.mrb[4].mxu0 %v6651_v3  ;;  %3811 = vmatmul.mubr.bf16.vlgmr.msra.gmra.mrb[4].mxu1 %v6651_v3  ;;  %v5757_v3 = vld [vmem:[#allocation10 + $0x40] sm:$0xff] (!%p5431_p9)  }
 0x283   : > { %5504 = vmatprep.subr.bf16.mxu0 (!%p5431_p9), %v5757_v3  ;;  %5527 = vmatpush3.bf16.msra.mxu1 (!%p5431_p9), %v5760_v8 }
 0x284   : > { %5505 = vmatpush3.bf16.msra.mxu0 (!%p5431_p9), %v5759_v7  ;;  %5528 = vmatprep.subr.bf16.mxu1 (!%p5431_p9), %v5762_v11 }
 0x285   : > { %5506 = vmatprep.subr.bf16.mxu0 (!%p5431_p9), %v5761_v9 }
 0x287   : > { %5529 = vmatpush3.bf16.msra.mxu1 (!%p5431_p9), %v5764_v14 }
 0x288   : > { %5507 = vmatpush3.bf16.msra.mxu0 (!%p5431_p9), %v5763_v13  ;;  %5530 = vmatprep.subr.bf16.mxu1 (!%p5431_p9), %v5766_v16  ;;  %v3893_v16 = vsub.s32 (!%p5431_p9), 4, %v6385_v45 }
 0x289   : > { %5508 = vmatprep.subr.bf16.mxu0 (!%p5431_p9), %v5765_v15 }
 0x28b   : > { %5531 = vmatpush3.bf16.msra.mxu1 (!%p5431_p9), %v5768_v18 }
 0x28c   : > { %5509 = vmatpush3.bf16.msra.mxu0 (!%p5431_p9), %v5767_v17  ;;  %5532 = vmatprep.subr.bf16.mxu1 (!%p5431_p9), %v5770_v20  ;;  %v3897_v17 = vsub.s32 (!%p5431_p9), 5, %v6385_v45  ;;  %v3905_v20 = vsub.s32 (!%p5431_p9), 7, %v6385_v45 }
 0x28d   : > { %5510 = vmatprep.subr.bf16.mxu0 (!%p5431_p9), %v5769_v19  ;;  %v3901_v19 = vsub.s32 (!%p5431_p9), 6, %v6385_v45 }
 0x28f   : > { %5533 = vmatpush3.bf16.msra.mxu1 (!%p5431_p9), %v5772_v22  ;;  %v3894_v22 = vrot.slane (!%p5431_p9), %v3873_v44, %v3893_v16  ;;  %v3974_v45 = vrot.slane (!%p5431_p9), %v6901_v46, %v3901_v19 }
 0x290   : > { %5511 = vmatpush3.bf16.msra.mxu0 (!%p5431_p9), %v5771_v21  ;;  %5534 = vmatprep.subr.bf16.mxu1 (!%p5431_p9), %v5774_v24 }
 0x291   : > { %5512 = vmatprep.subr.bf16.mxu0 (!%p5431_p9), %v5773_v23  ;;  %v3898_v23 = vrot.slane (!%p5431_p9), %v3873_v44, %v3897_v17 }
 0x293   : > { %5535 = vmatpush3.bf16.msra.mxu1 (!%p5431_p9), %v5776_v27  ;;  %v3906_v27 = vrot.slane (!%p5431_p9), %v3873_v44, %v3905_v20 }
 0x294   : > { %5513 = vmatpush3.bf16.msra.mxu0 (!%p5431_p9), %v5775_v25  ;;  %5536 = vmatprep.subr.bf16.mxu1 (!%p5431_p9), %v5778_v60  ;;  %v3902_v25 = vrot.slane (!%p5431_p9), %v3873_v44, %v3901_v19  ;;  %v4050_v44 = vrot.slane (!%p5431_p9), %v6903_v50, %v3905_v20 }
 0x295   : > { %5514 = vmatprep.subr.bf16.mxu0 (!%p5431_p9), %v5777_v28 }
 0x297   : > { %5537 = vmatpush3.bf16.msra.mxu1 (!%p5431_p9), %v5780_v31  ;;  %v3966_v31 = vrot.slane (!%p5431_p9), %v6901_v46, %v3893_v16 }
 0x298   : > { %5515 = vmatpush3.bf16.msra.mxu0 (!%p5431_p9), %v5779_v30  ;;  %5538 = vmatprep.subr.bf16.mxu1 (!%p5431_p9), %v5782_v10  ;;  %v3924_v30 = vcombine.low (!%p5431_p9), %v3894_v22, %v3898_v23  ;;  %v5813_v23 = vld [vmem:[#allocation10 + $0x170] sm:$0xff] (!%p5431_p9)  }
 0x299   : > { %5516 = vmatprep.subr.bf16.mxu0 (!%p5431_p9), %v5781_v32  ;;  %v3970_v32 = vrot.slane (!%p5431_p9), %v6901_v46, %v3897_v17 }
 0x29b   : > { %5539 = vmatpush3.bf16.msra.mxu1 (!%p5431_p9), %v5784_v37 }
 0x29c   : > { %5517 = vmatpush3.bf16.msra.mxu0 (!%p5431_p9), %v5783_v33  ;;  %5540 = vmatprep.subr.bf16.mxu1 (!%p5431_p9), %v5786_v26 }
 0x29d   : > { %5518 = vmatprep.subr.bf16.mxu0 (!%p5431_p9), %v5785_v39  ;;  %v4038_v39 = vrot.slane (!%p5431_p9), %v6903_v50, %v3893_v16 }
 0x29f   : > { %5541 = vmatpush3.bf16.msra.mxu1 (!%p5431_p9), %v5788_v43  ;;  %v4046_v43 = vrot.slane (!%p5431_p9), %v6903_v50, %v3901_v19 }
 0x2a0   : > { %5519 = vmatpush3.bf16.msra.mxu0 (!%p5431_p9), %v5787_v54  ;;  %v5791_v54 = vld [vmem:[#allocation10 + $0x100] sm:$0xff] (!%p5431_p9)  }
 0x355   : > { %v3648_v55 = vpop.f32.mrb[4].mxu0  ;;  %v3812_v56 = vpop.f32.mrb[4].mxu1 }
 0x356   : > { %v3650_v57 = vpop.f32.mrb[5].mxu0  ;;  %v3814_v59 = vpop.f32.mrb[5].mxu1 }
 0x357   : > { %v3844_v58 = vcombine.low %v3648_v55, %v3650_v57  ;;  %v3652_v36 = vpop.f32.mrb[6].mxu0  ;;  %v3845_v61 = vcombine.low %v3812_v56, %v3814_v59  ;;  %v3816_v35 = vpop.f32.mrb[6].mxu1  ;;  %v5789_v55 = vld [vmem:[#allocation10 + $0x140] sm:$0xff] (!%p5431_p9)   ;;  %v3907_v56 = vcombine.low (!%p5431_p9), %v3878_v47, %v3882_v48  ;;  %v3908_v57 = vcombine.low (!%p5431_p9), %v3886_v49, %v3890_v0  ;;  %v5793_v48 = vld [vmem:[#allocation10 + $0x148] sm:$0xff] (!%p5431_p9)  }
 0x358   : > { %v3653_v62 = vpop.f32.mrb[7].mxu0  ;;  %v3817_v1 = vpop.f32.mrb[7].mxu1  ;;  %v4026_v59 = vrot.slane (!%p5431_p9), %v6903_v50, %v3881_v38  ;;  %v5790_v36 = vld [vmem:[#allocation10 + $0x1c0] sm:$0xff] (!%p5431_p9)   ;;  %v3980_v35 = vcombine.low (!%p5431_p9), %v3958_v52, %v3962_v53  ;;  %5548 = vmatprep.subr.bf16.mxu0 (!%p5431_p9), %v5789_v55  ;;  %v3925_v38 = vcombine.low (!%p5431_p9), %v3902_v25, %v3906_v27  ;;  %v3932_v52 = vrot.slane (!%p5431_p9), %v3924_v30, %v6884_v29  ;;  %v5795_v53 = vld [vmem:[#allocation10 + $0x108] sm:$0xff] (!%p5431_p9)  }
 0x359   : > { %v3852_v63 = vrot.slane %v3844_v58, %v6884_v29  ;;  %v3859_v2 = vrot.slane %v3845_v61, %v6884_v29  ;;  %3870 = sbr.rel (%p5431_p9) target bundleno = 1159 (0x487), region = 80  ;;  %v4022_v58 = vrot.slane (!%p5431_p9), %v6903_v50, %v3877_v34  ;;  %v3979_v61 = vcombine.low (!%p5431_p9), %v3950_v51, %v3954_v41  ;;  %5570 = vmatprep.subr.bf16.mxu1 (!%p5431_p9), %v5790_v36  ;;  %v5792_v0 = vld [vmem:[#allocation10 + $0x180] sm:$0xff] (!%p5431_p9)   ;;  %v5794_v41 = vld [vmem:[#allocation10 + $0x1c8] sm:$0xff] (!%p5431_p9)  }
 0x35a   : > { %v4030_v62 = vrot.slane (!%p5431_p9), %v6903_v50, %v3885_v40  ;;  %v3915_v1 = vrot.slane (!%p5431_p9), %v3907_v56, %v6884_v29  ;;  %v3994_v3 = vrot.slane (!%p5431_p9), %v3980_v35, %v6884_v29  ;;  %v3978_v34 = vrot.slane (!%p5431_p9), %v6901_v46, %v3905_v20  ;;  %v5799_v35 = vld [vmem:[#allocation10 + $0x110] sm:$0xff] (!%p5431_p9)   ;;  %v5810_v20 = vld [vmem:[#allocation10 + $0x1e8] sm:$0xff] (!%p5431_p9)  }
 0x35b   : > { %v3860_v5 = vcombine.low %v3852_v63, %v3859_v2  ;;  %v4034_v63 = vrot.slane (!%p5431_p9), %v6903_v50, %v3889_v42  ;;  %v3922_v2 = vrot.slane (!%p5431_p9), %v3908_v57, %v6884_v29  ;;  %v4042_v40 = vrot.slane (!%p5431_p9), %v6903_v50, %v3897_v17  ;;  %v5797_v50 = vld [vmem:[#allocation10 + $0x150] sm:$0xff] (!%p5431_p9)   ;;  %v5809_v17 = vld [vmem:[#allocation10 + $0x168] sm:$0xff] (!%p5431_p9)  }
 0x35c   : > { %v3996_v51 = vcombine.low (!%p5431_p9), %v3966_v31, %v3970_v32  ;;  %v3997_v46 = vcombine.low (!%p5431_p9), %v3974_v45, %v3978_v34  ;;  %v3939_v55 = vrot.slane (!%p5431_p9), %v3925_v38, %v6884_v29  ;;  %v4069_v57 = vcombine.low (!%p5431_p9), %v4046_v43, %v4050_v44  ;;  %v5812_v27 = vld [vmem:[#allocation10 + $0x1a8] sm:$0xff] (!%p5431_p9)   ;;  %v5815_v31 = vld [vmem:[#allocation10 + $0x130] sm:$0xff] (!%p5431_p9)   ;;  %v5817_v32 = vld [vmem:[#allocation10 + $0x178] sm:$0xff] (!%p5431_p9)  }
 0x35d   : > { %v3864_v12 = vadd.f32 %v3860_v5, %v417_v4  ;;  %v4051_v4 = vcombine.low (!%p5431_p9), %v4022_v58, %v4026_v59  ;;  %v3871_v5 = vld [vmem:[#allocation2] sm:$0xff] (!%p5431_p9)  ;;  %v4052_v6 = vcombine.low (!%p5431_p9), %v4030_v62, %v4034_v63  ;;  %v3923_v7 = vcombine.low (!%p5431_p9), %v3915_v1, %v3922_v2  ;;  %v5796_v58 = vld [vmem:[#allocation10 + $0x188] sm:$0xff] (!%p5431_p9)   ;;  %v5816_v45 = vld [vmem:[#allocation10 + $0x1b0] sm:$0xff] (!%p5431_p9)  }
 0x35e   : > { %v4068_v56 = vcombine.low (!%p5431_p9), %v4038_v39, %v4042_v40  ;;  %v4004_v59 = vrot.slane (!%p5431_p9), %v3996_v51, %v6884_v29  ;;  %v4011_v36 = vrot.slane (!%p5431_p9), %v3997_v46, %v6884_v29  ;;  %v3940_v62 = vcombine.low (!%p5431_p9), %v3932_v52, %v3939_v55  ;;  %v5801_v2 = vld [vmem:[#allocation10 + $0x158] sm:$0xff] (!%p5431_p9)  }
 0x35f   : > { %3866 = vst [vmem:[#allocation2 + $0x8] sm:$0xff] %v3864_v12  ;;  %v3987_v12 = vrot.slane (!%p5431_p9), %v3979_v61, %v6884_v29  ;;  %v4059_v8 = vrot.slane (!%p5431_p9), %v4051_v4, %v6884_v29  ;;  %v4066_v11 = vrot.slane (!%p5431_p9), %v4052_v6, %v6884_v29  ;;  %v3943_v13 = vadd.f32 (!%p5431_p9), %v3923_v7, %v3871_v5  ;;  %v5798_v61 = vld [vmem:[#allocation10 + $0x1d0] sm:$0xff] (!%p5431_p9)   ;;  %v5803_v6 = vld [vmem:[#allocation10 + $0x118] sm:$0xff] (!%p5431_p9)  }
 0x360   : > { %v4076_v63 = vrot.slane %v4068_v56, %v6884_v29  ;;  %v4083_v1 = vrot.slane %v4069_v57, %v6884_v29  ;;  %v5800_v4 = vld [vmem:[#allocation10 + $0x190] sm:$0xff]   ;;  %v4012_v5 = vcombine.low %v4004_v59, %v4011_v36  ;;  %v5818_v34 = vld [vmem:[#allocation10 + $0x1f8] sm:$0xff]  }
 0x361   : > { %v3995_v9 = vcombine.low %v3987_v12, %v3994_v3  ;;  %v4067_v14 = vcombine.low %v4059_v8, %v4066_v11  ;;  %v5802_v12 = vld [vmem:[#allocation10 + $0x1d8] sm:$0xff]  }
 0x362   : > { %v4084_v8 = vcombine.low %v4076_v63, %v4083_v1  ;;  %v5804_v11 = vld [vmem:[#allocation10 + $0x198] sm:$0xff]  }
 0x363   : > { %v4015_v15 = vmul.f32 %v3995_v9, %v3943_v13  ;;  %v5805_v9 = vld [vmem:[#allocation10 + $0x160] sm:$0xff]   ;;  %v5819_v38 = vld [vmem:[#allocation10 + $0x138] sm:$0xff]  }
 0x364   : > { %v5820_v39 = vld [vmem:[#allocation10 + $0x1b8] sm:$0xff]  }
 0x365   : > { %v4087_v18 = vadd.f32 %v4067_v14, %v4015_v15  ;;  %v5806_v14 = vld [vmem:[#allocation10 + $0x1e0] sm:$0xff]  }
 0x366   : > { %v3872_v3 = vld [vmem:[#allocation2 + $0x8] sm:$0xff] }
 0x367   : > { %vm4089_vm0 = vcmp.ge.f32.partialorder %v4087_v18, 0.0  ;;  %v4091_v21 = vmul.f32 0.2, %v4087_v18  ;;  %v3944_v7 = vadd.f32 %v3940_v62, %v3872_v3  ;;  %v5807_v15 = vld [vmem:[#allocation10 + $0x120] sm:$0xff]  }
 0x369   : > { %v4093_v24 = vsel %vm4089_vm0, %v4087_v18, %v4091_v21  ;;  %v4016_v13 = vmul.f32 %v4012_v5, %v3944_v7  ;;  %v5808_v18 = vld [vmem:[#allocation10 + $0x1a0] sm:$0xff]   ;;  %v5811_v21 = vld [vmem:[#allocation10 + $0x128] sm:$0xff]  }
 0x36a   : > { %v4104_v28 = vrot.slane %v4093_v24, %v6884_v29  ;;  %v4097_v60 = vcombine.high %v4093_v24, %v4093_v24 }
 0x36b   : > { %v4088_v16 = vadd.f32 %v4084_v8, %v4016_v13 }
 0x36c   : > { %v4112_v10 = vcombine.high %v4104_v28, %v4104_v28  ;;  %v4111_v33 = vrot.slane %v4097_v60, %v6884_v29  ;;  %v4139_v37 = vpack.c.bf16 %v4104_v28, %v4104_v28  ;;  %v5814_v28 = vld [vmem:[#allocation10 + $0x1f0] sm:$0xff]  }
 0x36d   : > { %vm4090_vm1 = vcmp.ge.f32.partialorder %v4088_v16, 0.0  ;;  %v4092_v19 = vmul.f32 0.2, %v4088_v16 }
 0x36e   : > { %v4140_v26 = vpack.c.bf16 %v4112_v10, %v4112_v10  ;;  %v4113_v42 = vcombine.high %v4111_v33, %v4111_v33  ;;  %v4141_v47 = vpack.c.bf16 %v4111_v33, %v4111_v33 }
 0x36f   : > { %v4094_v22 = vsel %vm4090_vm1, %v4088_v16, %v4092_v19 }
 0x370   : > { %4698 = vmatprep.mubr.bf16.mxu0 %v4140_v26  ;;  %v4142_v49 = vpack.c.bf16 %v4113_v42, %v4113_v42  ;;  %v4121_v24 = vrot.slane %v4094_v22, %v6884_v29  ;;  %v4114_v25 = vcombine.high %v4094_v22, %v4094_v22  ;;  %v5432_v42 = vld [vmem:[#allocation11] ss:$0 sm:$0xff] }
 0x371   : > { %4699 = vmatmul.mubr.bf16.vlgmr.msra.gmra.mrb[0].mxu0 %v4139_v37 }
 0x372   : > { %4738 = vmatprep.mubr.bf16.mxu1 %v4142_v49  ;;  %5549 = vmatpush3.bf16.msra.mxu0 %v5791_v54  ;;  %v4129_v60 = vcombine.high %v4121_v24, %v4121_v24  ;;  %v4128_v30 = vrot.slane %v4114_v25, %v6884_v29  ;;  %v4143_v29 = vpack.c.bf16 %v4121_v24, %v4121_v24 }
 0x373   : > { %4739 = vmatmul.mubr.bf16.vlgmr.msra.gmra.mrb[0].mxu1 %v4141_v47  ;;  %5550 = vmatprep.subr.bf16.mxu0 %v5793_v48 }
 0x374   : > { %5571 = vmatpush3.bf16.msra.mxu1 %v5792_v0  ;;  %v4144_v10 = vpack.c.bf16 %v4129_v60, %v4129_v60  ;;  %v4130_v33 = vcombine.high %v4128_v30, %v4128_v30  ;;  %v4145_v40 = vpack.c.bf16 %v4128_v30, %v4128_v30 }
 0x375   : > { %5572 = vmatprep.subr.bf16.mxu1 %v5794_v41 }
 0x376   : > { %5551 = vmatpush3.bf16.msra.mxu0 %v5795_v53  ;;  %4778 = vmatprep.mubr.bf16.mxu0 %v4144_v10  ;;  %v4146_v37 = vpack.c.bf16 %v4130_v33, %v4130_v33 }
 0x377   : > { %5552 = vmatprep.subr.bf16.mxu0 %v5797_v50 }
 0x378   : > { %5573 = vmatpush3.bf16.msra.mxu1 %v5796_v58  ;;  %4818 = vmatprep.mubr.bf16.mxu1 %v4146_v37 }
 0x379   : > { %5574 = vmatprep.subr.bf16.mxu1 %v5798_v61 }
 0x37a   : > { %5553 = vmatpush3.bf16.msra.mxu0 %v5799_v35 }
 0x37b   : > { %5554 = vmatprep.subr.bf16.mxu0 %v5801_v2 }
 0x37c   : > { %5575 = vmatpush3.bf16.msra.mxu1 %v5800_v4 }
 0x37d   : > { %5576 = vmatprep.subr.bf16.mxu1 %v5802_v12 }
 0x37e   : > { %5555 = vmatpush3.bf16.msra.mxu0 %v5803_v6 }
 0x37f   : > { %5556 = vmatprep.subr.bf16.mxu0 %v5805_v9 }
 0x380   : > { %5577 = vmatpush3.bf16.msra.mxu1 %v5804_v11 }
 0x381   : > { %5578 = vmatprep.subr.bf16.mxu1 %v5806_v14 }
 0x382   : > { %5557 = vmatpush3.bf16.msra.mxu0 %v5807_v15 }
 0x383   : > { %5558 = vmatprep.subr.bf16.mxu0 %v5809_v17 }
 0x384   : > { %5579 = vmatpush3.bf16.msra.mxu1 %v5808_v18 }
 0x385   : > { %5580 = vmatprep.subr.bf16.mxu1 %v5810_v20 }
 0x386   : > { %5559 = vmatpush3.bf16.msra.mxu0 %v5811_v21 }
 0x387   : > { %5560 = vmatprep.subr.bf16.mxu0 %v5813_v23 }
 0x388   : > { %5581 = vmatpush3.bf16.msra.mxu1 %v5812_v27 }
 0x389   : > { %5582 = vmatprep.subr.bf16.mxu1 %v5814_v28 }
 0x38a   : > { %5561 = vmatpush3.bf16.msra.mxu0 %v5815_v31 }
 0x38b   : > { %5562 = vmatprep.subr.bf16.mxu0 %v5817_v32 }
 0x38c   : > { %5583 = vmatpush3.bf16.msra.mxu1 %v5816_v45 }
 0x38d   : > { %5584 = vmatprep.subr.bf16.mxu1 %v5818_v34 }
 0x38e   : > { %5563 = vmatpush3.bf16.msra.mxu0 %v5819_v38 }
 0x390   : > { %5585 = vmatpush3.bf16.msra.mxu1 %v5820_v39 }
 0x391   : > { %4779 = vmatmul.mubr.bf16.vlgmr.msra.gmra.mrb[4].mxu0 %v4143_v29 }
 0x393   : > { %4819 = vmatmul.mubr.bf16.vlgmr.msra.gmra.mrb[4].mxu1 %v4145_v40 }
 0x444   : > { %v5520_v26 = vpop.f32.mrb[0].mxu0 }
 0x445   : > { %v5521_v54 = vpop.f32.mrb[1].mxu0 }
 0x446   : > { %v5542_v43 = vpop.f32.mrb[0].mxu1  ;;  %v5522_v44 = vadd.f32 %v5521_v54, %v5520_v26  ;;  %v5523_v47 = vpop.f32.mrb[2].mxu0 }
 0x447   : > { %v5543_v48 = vpop.f32.mrb[1].mxu1  ;;  %v5524_v49 = vpop.f32.mrb[3].mxu0 }
 0x448   : > { %v4701_v0 = vadd.f32 %v5522_v44, %v5432_v42  ;;  %v5544_v51 = vadd.f32 %v5543_v48, %v5542_v43  ;;  %v5545_v46 = vpop.f32.mrb[2].mxu1 }
 0x449   : > { %v5546_v41 = vpop.f32.mrb[3].mxu1 }
 0x44a   : > { %v4741_v52 = vadd.f32 %v5544_v51, %v4701_v0 }
 0x464   : > { %v5564_v53 = vpop.f32.mrb[4].mxu0 }
 0x465   : > { %v5565_v55 = vpop.f32.mrb[5].mxu0 }
 0x466   : > { %v5586_v56 = vpop.f32.mrb[4].mxu1  ;;  %v5566_v57 = vadd.f32 %v5565_v55, %v5564_v53  ;;  %v5567_v50 = vpop.f32.mrb[6].mxu0 }
 0x467   : > { %v5587_v58 = vpop.f32.mrb[5].mxu1  ;;  %v5568_v59 = vpop.f32.mrb[7].mxu0 }
 0x468   : > { %v4781_v36 = vadd.f32 %v5566_v57, %v4741_v52  ;;  %v5588_v61 = vadd.f32 %v5587_v58, %v5586_v56  ;;  %v5589_v35 = vpop.f32.mrb[6].mxu1 }
 0x469   : > { %v5590_v62 = vpop.f32.mrb[7].mxu1 }
 0x46a   : > { %v4821_v63 = vadd.f32 %v5588_v61, %v4781_v36 }
 0x46c   : > { %v5497_v1 = vmul.f32 -1.442695, %v4821_v63 }
 0x46e   : > { %5821 = vpow2.f32 %v5497_v1 }
 0x478   : > { %v5822_v2 = vpop.eup %5821 }
 0x479   : > { %v4829_v4 = vadd.f32 1.0, %v5822_v2 }
 0x47b   : > { %5823 = vrcp.f32 %v4829_v4 }
 0x485   : > { %v5824_v5 = vpop.eup %5823 }
 0x486   : > { %4832 = vst [vmem:[%s6969_s7] sm:$0x3] %v5824_v5 }
 0x487 PF: > { %s23_s29 = sadd.s32 1, %s6057_s29   ;;  %s6984_s24 = smov %s6041_s25 }
 0x488   : > { %p20_p1 = scmp.ge.s32.totalorder %s23_s29, 9   ;;  %s6985_s25 = smov %s6045_s26 }
 0x489   : > { %s6986_s26 = smov %s6293_s18  ;;  %s6987_s27 = smov %s6053_s28 }
 0x48a   : > { %s6988_s28 = smov %s6990_s2  ;;  %22 = sbr.rel (!%p20_p1) target bundleno = 9 (0x9), region = 119 }
 0x491   :  { %4852 = vsyncpa [#allocation4], 1 }
 0x492   :  { %4854 = vsyncpa [#allocation4 + $0x1], 1 }
 0x493   :  { %4855 = vsyncpa [#allocation6], 1 }
 0x494   :  { %4856 = vsyncpa [#allocation9], 1 }
 0x495   :  { %4857 = vsyncpa [#allocation12], 1 }

</bundles_post_ra>
